<compile_context>
chip_gen: v6e
topology: v6e:2x2x1
jax: 0.10.0
libtpu: 0.0.40
codegen_flags: <defaults>
</compile_context>

<pallas_src>
import functools

import jax
import jax.numpy as jnp
from jax.experimental import pallas as pl
from jax.experimental.pallas import tpu as pltpu

MAX_OUTPUT = 30
M_PAD = 32           # MAX_OUTPUT padded to a sublane multiple for aligned stores
ITERATION = 1000
FOLD = 0


def _layernorm(v, g, b, eps=1e-5):
    mu = jnp.mean(v, axis=-1, keepdims=True)
    var = jnp.mean((v - mu) ** 2, axis=-1, keepdims=True)
    return (v - mu) * jax.lax.rsqrt(var + eps) * g + b


def _op_slots(combination):
    """Static (c, j) -> packed-slot maps for '0' and '1' ops (trace-time only)."""
    slot0, slot1 = {}, {}
    for c, combo in enumerate(combination):
        for j, a in enumerate(combo):
            if a == '0':
                slot0[(c, j)] = len(slot0)
            elif a == '1':
                slot1[(c, j)] = len(slot1)
    return slot0, slot1


def forward_kernel(x_ref, w0w1_ref, w1u_ref, lnh_ref, c6_ref, w7pb_ref,
                   ln5_ref, ln6t_ref, avg_ref, w8s_ref, out_ref, *,
                   combination, tb, seq, hidden, out_dim):
    C = len(combination)
    slot0, slot1 = _op_slots(combination)

    # (TB, S, H) -> (TB*S, H); S == 8 keeps the sublane tiling intact.
    x = x_ref[...].reshape(tb * seq, hidden)

    ln1g, ln1b = lnh_ref[0:1, :], lnh_ref[1:2, :]
    ln2g, ln2b = lnh_ref[2:3, :], lnh_ref[3:4, :]
    ln3g, ln3b = lnh_ref[4:5, :], lnh_ref[5:6, :]
    v6row = lnh_ref[6:7, :]              # collapsed w6_2(w6_1(.)) weight vector
    c6 = c6_ref[0]                       # collapsed w6 bias (SMEM scalar)

    # --- per-combination op chains (static, unrolled at trace time) ---------
    s_list = []
    for c, combo in enumerate(combination):
        o = x
        for j, a in enumerate(combo):
            if a == '0':
                # w0[c,j] @ w1[c,j] is x-independent -> precomputed outside.
                s0 = slot0[(c, j)]
                o = _layernorm(o + w0w1_ref[s0:s0 + 1, :], ln1g, ln1b)
            elif a == '1':
                o = jnp.dot(o, w1u_ref[slot1[(c, j)]],
                            preferred_element_type=jnp.float32)
                o = _layernorm(o, ln2g, ln2b)
            elif a == '2':
                o = _layernorm(jnp.exp(o), ln3g, ln3b)
            elif a == '3':
                o = jnp.maximum(o, 0.0)
        # Collapsed w6_1/w6_2 (no nonlinearity between them in the reference):
        # a VPU multiply + lane reduce replaces the (H,4H) + (4H,1) matmuls.
        s_list.append(jnp.sum(o * v6row, axis=-1, keepdims=True) + c6)  # (TB*S, 1)

    # --- layernorm4 over the combination axis (static per-c list, no reshape)
    mu4 = sum(s_list) / C
    var4 = sum((s_c - mu4) ** 2 for s_c in s_list) / C
    inv4 = jax.lax.rsqrt(var4 + 1e-5)

    # ln4 affine hoisted into w7: rows 0..C-1 = g_c*w7_c, row C = sum_c b_c*w7_c.
    # TODO(synk): num_examples_seen / Fold pruning schedule is training-time
    # global state; with Fold=0 and an all-ones mask every branch reduces to
    # new_w = w7, which is what is used here.
    acc = None
    for c in range(C):
        contrib = ((s_list[c] - mu4) * inv4) * w7pb_ref[c:c + 1, :]     # (TB*S, out)
        acc = contrib if acc is None else acc + contrib
    res = acc + w7pb_ref[C:C + 1, :]

    res = _layernorm(res, ln5_ref[0:1, :], ln5_ref[1:2, :])
    if hidden == out_dim:
        res = res + x                                                   # residual

    # --- lane-dense tail: one w8 matmul covers all TB batches ---------------
    rhs = jnp.concatenate([res[b * seq:(b + 1) * seq, :] for b in range(tb)],
                          axis=1)                                       # (S, TB*out)
    ob = jnp.dot(w8s_ref[...], rhs,
                 preferred_element_type=jnp.float32)                   # (M_PAD, TB*out)

    # Group-wise layernorm6 (per out_dim-lane group) via block-diagonal
    # averaging matmuls; the store stays a single dense 256-lane slab.
    mu6 = jnp.dot(ob, avg_ref[...], preferred_element_type=jnp.float32)
    msq6 = jnp.dot(ob * ob, avg_ref[...], preferred_element_type=jnp.float32)
    y = (ob - mu6) * jax.lax.rsqrt(msq6 - mu6 * mu6 + 1e-5)
    out_ref[0] = y * ln6t_ref[0:1, :] + ln6t_ref[1:2, :]


def _xavier(key, shape):
    fan_in, fan_out = shape[-2], shape[-1]
    std = (2.0 / (fan_in + fan_out)) ** 0.5
    return jax.random.normal(key, shape, dtype=jnp.float32) * std


def init_params(key, combination, hidden, out_dim, view_depth):
    C = len(combination)
    H = hidden
    keys = jax.random.split(key, 8)
    p = {}
    p['w0'] = _xavier(keys[0], (C, view_depth, 1, H))
    p['w1'] = _xavier(keys[1], (C, view_depth, H, H))
    p['w61_w'] = _xavier(keys[2], (H, 4 * H))          # nn.Linear(H, 4H) weight (pre-transposed)
    p['w61_b'] = jax.random.normal(keys[3], (1, 4 * H), dtype=jnp.float32) * 0.01
    p['w62_w'] = _xavier(keys[4], (4 * H, 1))          # nn.Linear(4H, 1) weight (pre-transposed)
    p['w62_b'] = jax.random.normal(keys[5], (1, 1), dtype=jnp.float32) * 0.01
    p['w7'] = _xavier(keys[6], (C, out_dim))
    p['w8'] = _xavier(keys[7], (MAX_OUTPUT, out_dim))
    p['mask'] = jnp.ones((C, out_dim), dtype=jnp.float32)
    ones = lambda n: jnp.ones((1, n), jnp.float32)
    zeros = lambda n: jnp.zeros((1, n), jnp.float32)
    # layernorm1/2/3 ModuleLists share a single module each in the torch code.
    p['ln1_g'], p['ln1_b'] = ones(H), zeros(H)
    p['ln2_g'], p['ln2_b'] = ones(H), zeros(H)
    p['ln3_g'], p['ln3_b'] = ones(H), zeros(H)
    p['ln4_g'], p['ln4_b'] = ones(C), zeros(C)
    p['ln5_g'], p['ln5_b'] = ones(out_dim), zeros(out_dim)
    p['ln6_g'], p['ln6_b'] = ones(out_dim), zeros(out_dim)
    return p


def test_sublayer_forward(x, params, combination, hidden, out_dim):
    B, S, H = x.shape
    assert H == hidden
    C = len(combination)
    x = x.astype(jnp.float32)

    # --- batch fusion: TB batches per grid step, keep >= 2 steps when possible
    # (v7x has 2 TensorCores; a single-step grid would idle one of them).
    TB = min(16, max(1, B // 2)) if B >= 2 else 1
    B_pad = pl.cdiv(B, TB) * TB
    if B_pad != B:
        x = jnp.pad(x, ((0, B_pad - B), (0, 0), (0, 0)))
    nsteps = B_pad // TB

    # --- JAX-side, x-independent packing (hoisted off the TensorCore) -------
    slot0 = [(c, j) for c, combo in enumerate(combination)
             for j, a in enumerate(combo) if a == '0']
    slot1 = [(c, j) for c, combo in enumerate(combination)
             for j, a in enumerate(combo) if a == '1']
    # hoisted w0[c,j] @ w1[c,j] rows, only for the '0' ops actually present
    if slot0:
        w0w1 = jnp.concatenate(
            [params['w0'][c, j] @ params['w1'][c, j] for (c, j) in slot0], axis=0)
    else:
        w0w1 = jnp.zeros((1, H), jnp.float32)
    # only the w1 matrices consumed by '1' ops
    if slot1:
        w1u = jnp.stack([params['w1'][c, j] for (c, j) in slot1], axis=0)
    else:
        w1u = jnp.zeros((1, H, H), jnp.float32)

    # collapsed w6 MLP: (H,1) vector + scalar bias
    v6 = (params['w61_w'] @ params['w62_w']).reshape(1, H)
    c6 = (params['w61_b'] @ params['w62_w'] + params['w62_b']).reshape(1)

    lnh = jnp.concatenate([params['ln1_g'], params['ln1_b'],
                           params['ln2_g'], params['ln2_b'],
                           params['ln3_g'], params['ln3_b'], v6], axis=0)   # (7, H)

    # layernorm4 affine hoisted into w7
    w7p = params['ln4_g'].reshape(C, 1) * params['w7']                      # (C, out)
    b7 = jnp.sum(params['ln4_b'].reshape(C, 1) * params['w7'], axis=0,
                 keepdims=True)                                             # (1, out)
    w7pb = jnp.concatenate([w7p, b7], axis=0)                               # (C+1, out)

    ln5 = jnp.concatenate([params['ln5_g'], params['ln5_b']], axis=0)       # (2, out)
    # ln6 affine tiled across the TB lane groups of the fused output slab
    ln6t = jnp.concatenate([jnp.tile(params['ln6_g'], (1, TB)),
                            jnp.tile(params['ln6_b'], (1, TB))], axis=0)    # (2, TB*out)
    # block-diagonal per-group averaging matrix for the fused layernorm6
    avg_bd = jnp.kron(jnp.eye(TB, dtype=jnp.float32),
                      jnp.full((out_dim, out_dim), 1.0 / out_dim, jnp.float32))

    # torch: self.w8[:, :result.shape[1]]; pad 30 -> 32 rows for aligned stores
    w8s = jnp.pad(params['w8'][:, :S], ((0, M_PAD - MAX_OUTPUT), (0, 0)))   # (32, S)

    inputs = (x, w0w1, w1u, lnh, c6, w7pb, ln5, ln6t, avg_bd, w8s)

    def fixed(shape):
        zero_idx = (0,) * len(shape)
        return pl.BlockSpec(shape, lambda i, _z=zero_idx: _z)

    in_specs = [
        pl.BlockSpec((TB, S, H), lambda i: (i, 0, 0)),      # x: TB batches per step
        fixed(w0w1.shape),                                  # hoisted w0@w1 rows
        fixed(w1u.shape),                                   # used w1 matrices only
        fixed(lnh.shape),                                   # ln1/2/3 affines + w6 vector
        pl.BlockSpec(memory_space=pltpu.MemorySpace.SMEM),  # collapsed w6 bias scalar
        fixed(w7pb.shape),                                  # ln4-hoisted w7 + b7
        fixed(ln5.shape),                                   # ln5 affine
        fixed(ln6t.shape),                                  # ln6 affine (tiled)
        fixed(avg_bd.shape),                                # per-group averaging matrix
        fixed(w8s.shape),                                   # w8[:, :S] padded
    ]
    out_specs = pl.BlockSpec((1, M_PAD, TB * out_dim), lambda i: (i, 0, 0))

    kernel = functools.partial(forward_kernel, combination=combination,
                               tb=TB, seq=S, hidden=hidden, out_dim=out_dim)

    fused = pl.pallas_call(
        kernel,
        out_shape=jax.ShapeDtypeStruct((nsteps, M_PAD, TB * out_dim), jnp.float32),
        grid=(nsteps,),
        in_specs=in_specs,
        out_specs=out_specs,
        compiler_params=pltpu.CompilerParams(dimension_semantics=("parallel",)),
    )(*inputs)

    # un-interleave the lane-dense slab: (steps, M_PAD, TB, out) -> (B, M_PAD, out)
    result = fused.reshape(nsteps, M_PAD, TB, out_dim)
    result = jnp.transpose(result, (0, 2, 1, 3)).reshape(B_pad, M_PAD, out_dim)
    return result[:B, :MAX_OUTPUT, :], params['mask']


if __name__ == "__main__":
    hidden = 32
    out_dim = 32                         # == hidden -> residual branch exercised
    view_depth = 3
    combination = ("012", "130", "213")  # strings of ops, len == view_depth
    B, S = 16, 8                         # TB=8 -> grid of 2 parallel steps; S <= out (w8[:, :S])

    key = jax.random.PRNGKey(0)
    kx, kp = jax.random.split(key)
    params = init_params(kp, combination, hidden, out_dim, view_depth)
    x = jax.random.normal(kx, (B, S, hidden), dtype=jnp.float32)

    result, mask = test_sublayer_forward(x, params, combination, hidden, out_dim)
    jax.block_until_ready(result)
    assert result.shape == (B, MAX_OUTPUT, out_dim)
    assert mask.shape == (len(combination), out_dim)
    assert bool(jnp.all(jnp.isfinite(result)))
    print("KERNEL_OK")
</pallas_src>

<mosaic_0001>
module attributes {stable_mosaic.version = 11 : i64} {
  func.func @forward_kernel(%arg0: i32, %arg1: memref<8x8x32xf32, #tpu.memory_space<vmem>>, %arg2: memref<2x32xf32, #tpu.memory_space<vmem>>, %arg3: memref<3x32x32xf32, #tpu.memory_space<vmem>>, %arg4: memref<7x32xf32, #tpu.memory_space<vmem>>, %arg5: memref<1xf32, #tpu.memory_space<smem>>, %arg6: memref<4x32xf32, #tpu.memory_space<vmem>>, %arg7: memref<2x32xf32, #tpu.memory_space<vmem>>, %arg8: memref<2x256xf32, #tpu.memory_space<vmem>>, %arg9: memref<256x256xf32, #tpu.memory_space<vmem>>, %arg10: memref<32x8xf32, #tpu.memory_space<vmem>>, %arg11: memref<1x32x256xf32, #tpu.memory_space<vmem>>) attributes {dimension_semantics = [#tpu.dimension_semantics<parallel>], iteration_bounds = array<i64: 2>, scalar_prefetch = 0 : i64, scratch_operands = 0 : i64, tpu.core_type = #tpu.core_type<tc>, window_params = [{transform_indices = @transform_0, window_bounds = array<i64: 8, 8, 32>}, {pipeline_mode = #tpu.pipeline_mode<synchronous>, transform_indices = @transform_1, window_bounds = array<i64: 2, 32>}, {pipeline_mode = #tpu.pipeline_mode<synchronous>, transform_indices = @transform_2, window_bounds = array<i64: 3, 32, 32>}, {pipeline_mode = #tpu.pipeline_mode<synchronous>, transform_indices = @transform_3, window_bounds = array<i64: 7, 32>}, {transform_indices = @transform_4, window_bounds = array<i64: 1>}, {pipeline_mode = #tpu.pipeline_mode<synchronous>, transform_indices = @transform_5, window_bounds = array<i64: 4, 32>}, {pipeline_mode = #tpu.pipeline_mode<synchronous>, transform_indices = @transform_6, window_bounds = array<i64: 2, 32>}, {pipeline_mode = #tpu.pipeline_mode<synchronous>, transform_indices = @transform_7, window_bounds = array<i64: 2, 256>}, {pipeline_mode = #tpu.pipeline_mode<synchronous>, transform_indices = @transform_8, window_bounds = array<i64: 256, 256>}, {pipeline_mode = #tpu.pipeline_mode<synchronous>, transform_indices = @transform_9, window_bounds = array<i64: 32, 8>}, {transform_indices = @transform_10, window_bounds = array<i64: 1, 32, 256>}]} {
    %c0 = arith.constant 0 : index
    %c0_0 = arith.constant 0 : index
    %c0_1 = arith.constant 0 : index
    %0 = vector.load %arg1[%c0, %c0_0, %c0_1] : memref<8x8x32xf32, #tpu.memory_space<vmem>>, vector<8x8x32xf32>
    %1 = vector.shape_cast %0 : vector<8x8x32xf32> to vector<64x32xf32>
    %c0_2 = arith.constant 0 : index
    %c0_3 = arith.constant 0 : index
    %2 = vector.load %arg4[%c0_2, %c0_3] : memref<7x32xf32, #tpu.memory_space<vmem>>, vector<1x32xf32>
    %c1 = arith.constant 1 : index
    %c0_4 = arith.constant 0 : index
    %3 = vector.load %arg4[%c1, %c0_4] : memref<7x32xf32, #tpu.memory_space<vmem>>, vector<1x32xf32>
    %c2 = arith.constant 2 : index
    %c0_5 = arith.constant 0 : index
    %4 = vector.load %arg4[%c2, %c0_5] : memref<7x32xf32, #tpu.memory_space<vmem>>, vector<1x32xf32>
    %c3 = arith.constant 3 : index
    %c0_6 = arith.constant 0 : index
    %5 = vector.load %arg4[%c3, %c0_6] : memref<7x32xf32, #tpu.memory_space<vmem>>, vector<1x32xf32>
    %c4 = arith.constant 4 : index
    %c0_7 = arith.constant 0 : index
    %6 = vector.load %arg4[%c4, %c0_7] : memref<7x32xf32, #tpu.memory_space<vmem>>, vector<1x32xf32>
    %c5 = arith.constant 5 : index
    %c0_8 = arith.constant 0 : index
    %7 = vector.load %arg4[%c5, %c0_8] : memref<7x32xf32, #tpu.memory_space<vmem>>, vector<1x32xf32>
    %c6 = arith.constant 6 : index
    %c0_9 = arith.constant 0 : index
    %8 = vector.load %arg4[%c6, %c0_9] : memref<7x32xf32, #tpu.memory_space<vmem>>, vector<1x32xf32>
    %c0_10 = arith.constant 0 : index
    %9 = memref.load %arg5[%c0_10] : memref<1xf32, #tpu.memory_space<smem>>
    %c0_11 = arith.constant 0 : index
    %c0_12 = arith.constant 0 : index
    %10 = vector.load %arg2[%c0_11, %c0_12] : memref<2x32xf32, #tpu.memory_space<vmem>>, vector<1x32xf32>
    %11 = vector.broadcast %10 : vector<1x32xf32> to vector<64x32xf32>
    %12 = arith.addf %1, %11 : vector<64x32xf32>
    %cst = arith.constant dense<0.000000e+00> : vector<64xf32>
    %13 = vector.multi_reduction <add>, %12, %cst [1] : vector<64x32xf32> to vector<64xf32>
    %14 = vector.shape_cast %13 : vector<64xf32> to vector<64x1xf32>
    %cst_13 = arith.constant 3.200000e+01 : f32
    %15 = vector.broadcast %cst_13 : f32 to vector<64x1xf32>
    %16 = arith.divf %14, %15 : vector<64x1xf32>
    %17 = vector.broadcast %16 : vector<64x1xf32> to vector<64x32xf32>
    %18 = arith.subf %12, %17 : vector<64x32xf32>
    %19 = arith.mulf %18, %18 : vector<64x32xf32>
    %cst_14 = arith.constant dense<0.000000e+00> : vector<64xf32>
    %20 = vector.multi_reduction <add>, %19, %cst_14 [1] : vector<64x32xf32> to vector<64xf32>
    %21 = vector.shape_cast %20 : vector<64xf32> to vector<64x1xf32>
    %cst_15 = arith.constant 3.200000e+01 : f32
    %22 = vector.broadcast %cst_15 : f32 to vector<64x1xf32>
    %23 = arith.divf %21, %22 : vector<64x1xf32>
    %24 = vector.broadcast %16 : vector<64x1xf32> to vector<64x32xf32>
    %25 = arith.subf %12, %24 : vector<64x32xf32>
    %cst_16 = arith.constant 9.99999974E-6 : f32
    %26 = vector.broadcast %cst_16 : f32 to vector<64x1xf32>
    %27 = arith.addf %23, %26 : vector<64x1xf32>
    %28 = math.rsqrt %27 : vector<64x1xf32>
    %29 = vector.broadcast %28 : vector<64x1xf32> to vector<64x32xf32>
    %30 = arith.mulf %25, %29 : vector<64x32xf32>
    %31 = vector.broadcast %2 : vector<1x32xf32> to vector<64x32xf32>
    %32 = arith.mulf %30, %31 : vector<64x32xf32>
    %33 = vector.broadcast %3 : vector<1x32xf32> to vector<64x32xf32>
    %34 = arith.addf %32, %33 : vector<64x32xf32>
    %c0_17 = arith.constant 0 : index
    %c0_18 = arith.constant 0 : index
    %c0_19 = arith.constant 0 : index
    %35 = vector.load %arg3[%c0_17, %c0_18, %c0_19] : memref<3x32x32xf32, #tpu.memory_space<vmem>>, vector<1x32x32xf32>
    %36 = vector.shape_cast %35 : vector<1x32x32xf32> to vector<32x32xf32>
    %cst_20 = arith.constant dense<0.000000e+00> : vector<64x32xf32>
    %37 = tpu.matmul %34, %36, %cst_20 {dimension_numbers = #tpu.dot_dimension_numbers<[1], [0], [0], [1], [0, 0, 1, 1], [], []>} : vector<64x32xf32>, vector<32x32xf32>, vector<64x32xf32> -> vector<64x32xf32>
    %cst_21 = arith.constant dense<0.000000e+00> : vector<64xf32>
    %38 = vector.multi_reduction <add>, %37, %cst_21 [1] : vector<64x32xf32> to vector<64xf32>
    %39 = vector.shape_cast %38 : vector<64xf32> to vector<64x1xf32>
    %cst_22 = arith.constant 3.200000e+01 : f32
    %40 = vector.broadcast %cst_22 : f32 to vector<64x1xf32>
    %41 = arith.divf %39, %40 : vector<64x1xf32>
    %42 = vector.broadcast %41 : vector<64x1xf32> to vector<64x32xf32>
    %43 = arith.subf %37, %42 : vector<64x32xf32>
    %44 = arith.mulf %43, %43 : vector<64x32xf32>
    %cst_23 = arith.constant dense<0.000000e+00> : vector<64xf32>
    %45 = vector.multi_reduction <add>, %44, %cst_23 [1] : vector<64x32xf32> to vector<64xf32>
    %46 = vector.shape_cast %45 : vector<64xf32> to vector<64x1xf32>
    %cst_24 = arith.constant 3.200000e+01 : f32
    %47 = vector.broadcast %cst_24 : f32 to vector<64x1xf32>
    %48 = arith.divf %46, %47 : vector<64x1xf32>
    %49 = vector.broadcast %41 : vector<64x1xf32> to vector<64x32xf32>
    %50 = arith.subf %37, %49 : vector<64x32xf32>
    %cst_25 = arith.constant 9.99999974E-6 : f32
    %51 = vector.broadcast %cst_25 : f32 to vector<64x1xf32>
    %52 = arith.addf %48, %51 : vector<64x1xf32>
    %53 = math.rsqrt %52 : vector<64x1xf32>
    %54 = vector.broadcast %53 : vector<64x1xf32> to vector<64x32xf32>
    %55 = arith.mulf %50, %54 : vector<64x32xf32>
    %56 = vector.broadcast %4 : vector<1x32xf32> to vector<64x32xf32>
    %57 = arith.mulf %55, %56 : vector<64x32xf32>
    %58 = vector.broadcast %5 : vector<1x32xf32> to vector<64x32xf32>
    %59 = arith.addf %57, %58 : vector<64x32xf32>
    %60 = math.exp %59 : vector<64x32xf32>
    %cst_26 = arith.constant dense<0.000000e+00> : vector<64xf32>
    %61 = vector.multi_reduction <add>, %60, %cst_26 [1] : vector<64x32xf32> to vector<64xf32>
    %62 = vector.shape_cast %61 : vector<64xf32> to vector<64x1xf32>
    %cst_27 = arith.constant 3.200000e+01 : f32
    %63 = vector.broadcast %cst_27 : f32 to vector<64x1xf32>
    %64 = arith.divf %62, %63 : vector<64x1xf32>
    %65 = vector.broadcast %64 : vector<64x1xf32> to vector<64x32xf32>
    %66 = arith.subf %60, %65 : vector<64x32xf32>
    %67 = arith.mulf %66, %66 : vector<64x32xf32>
    %cst_28 = arith.constant dense<0.000000e+00> : vector<64xf32>
    %68 = vector.multi_reduction <add>, %67, %cst_28 [1] : vector<64x32xf32> to vector<64xf32>
    %69 = vector.shape_cast %68 : vector<64xf32> to vector<64x1xf32>
    %cst_29 = arith.constant 3.200000e+01 : f32
    %70 = vector.broadcast %cst_29 : f32 to vector<64x1xf32>
    %71 = arith.divf %69, %70 : vector<64x1xf32>
    %72 = vector.broadcast %64 : vector<64x1xf32> to vector<64x32xf32>
    %73 = arith.subf %60, %72 : vector<64x32xf32>
    %cst_30 = arith.constant 9.99999974E-6 : f32
    %74 = vector.broadcast %cst_30 : f32 to vector<64x1xf32>
    %75 = arith.addf %71, %74 : vector<64x1xf32>
    %76 = math.rsqrt %75 : vector<64x1xf32>
    %77 = vector.broadcast %76 : vector<64x1xf32> to vector<64x32xf32>
    %78 = arith.mulf %73, %77 : vector<64x32xf32>
    %79 = vector.broadcast %6 : vector<1x32xf32> to vector<64x32xf32>
    %80 = arith.mulf %78, %79 : vector<64x32xf32>
    %81 = vector.broadcast %7 : vector<1x32xf32> to vector<64x32xf32>
    %82 = arith.addf %80, %81 : vector<64x32xf32>
    %83 = vector.broadcast %8 : vector<1x32xf32> to vector<64x32xf32>
    %84 = arith.mulf %82, %83 : vector<64x32xf32>
    %cst_31 = arith.constant dense<0.000000e+00> : vector<64xf32>
    %85 = vector.multi_reduction <add>, %84, %cst_31 [1] : vector<64x32xf32> to vector<64xf32>
    %86 = vector.shape_cast %85 : vector<64xf32> to vector<64x1xf32>
    %87 = vector.broadcast %9 : f32 to vector<64x1xf32>
    %88 = arith.addf %86, %87 : vector<64x1xf32>
    %c1_32 = arith.constant 1 : index
    %c0_33 = arith.constant 0 : index
    %c0_34 = arith.constant 0 : index
    %89 = vector.load %arg3[%c1_32, %c0_33, %c0_34] : memref<3x32x32xf32, #tpu.memory_space<vmem>>, vector<1x32x32xf32>
    %90 = vector.shape_cast %89 : vector<1x32x32xf32> to vector<32x32xf32>
    %cst_35 = arith.constant dense<0.000000e+00> : vector<64x32xf32>
    %91 = tpu.matmul %1, %90, %cst_35 {dimension_numbers = #tpu.dot_dimension_numbers<[1], [0], [0], [1], [0, 0, 1, 1], [], []>} : vector<64x32xf32>, vector<32x32xf32>, vector<64x32xf32> -> vector<64x32xf32>
    %cst_36 = arith.constant dense<0.000000e+00> : vector<64xf32>
    %92 = vector.multi_reduction <add>, %91, %cst_36 [1] : vector<64x32xf32> to vector<64xf32>
    %93 = vector.shape_cast %92 : vector<64xf32> to vector<64x1xf32>
    %cst_37 = arith.constant 3.200000e+01 : f32
    %94 = vector.broadcast %cst_37 : f32 to vector<64x1xf32>
    %95 = arith.divf %93, %94 : vector<64x1xf32>
    %96 = vector.broadcast %95 : vector<64x1xf32> to vector<64x32xf32>
    %97 = arith.subf %91, %96 : vector<64x32xf32>
    %98 = arith.mulf %97, %97 : vector<64x32xf32>
    %cst_38 = arith.constant dense<0.000000e+00> : vector<64xf32>
    %99 = vector.multi_reduction <add>, %98, %cst_38 [1] : vector<64x32xf32> to vector<64xf32>
    %100 = vector.shape_cast %99 : vector<64xf32> to vector<64x1xf32>
    %cst_39 = arith.constant 3.200000e+01 : f32
    %101 = vector.broadcast %cst_39 : f32 to vector<64x1xf32>
    %102 = arith.divf %100, %101 : vector<64x1xf32>
    %103 = vector.broadcast %95 : vector<64x1xf32> to vector<64x32xf32>
    %104 = arith.subf %91, %103 : vector<64x32xf32>
    %cst_40 = arith.constant 9.99999974E-6 : f32
    %105 = vector.broadcast %cst_40 : f32 to vector<64x1xf32>
    %106 = arith.addf %102, %105 : vector<64x1xf32>
    %107 = math.rsqrt %106 : vector<64x1xf32>
    %108 = vector.broadcast %107 : vector<64x1xf32> to vector<64x32xf32>
    %109 = arith.mulf %104, %108 : vector<64x32xf32>
    %110 = vector.broadcast %4 : vector<1x32xf32> to vector<64x32xf32>
    %111 = arith.mulf %109, %110 : vector<64x32xf32>
    %112 = vector.broadcast %5 : vector<1x32xf32> to vector<64x32xf32>
    %113 = arith.addf %111, %112 : vector<64x32xf32>
    %cst_41 = arith.constant 0.000000e+00 : f32
    %114 = vector.broadcast %cst_41 : f32 to vector<64x32xf32>
    %115 = arith.maximumf %113, %114 : vector<64x32xf32>
    %c1_42 = arith.constant 1 : index
    %c0_43 = arith.constant 0 : index
    %116 = vector.load %arg2[%c1_42, %c0_43] : memref<2x32xf32, #tpu.memory_space<vmem>>, vector<1x32xf32>
    %117 = vector.broadcast %116 : vector<1x32xf32> to vector<64x32xf32>
    %118 = arith.addf %115, %117 : vector<64x32xf32>
    %cst_44 = arith.constant dense<0.000000e+00> : vector<64xf32>
    %119 = vector.multi_reduction <add>, %118, %cst_44 [1] : vector<64x32xf32> to vector<64xf32>
    %120 = vector.shape_cast %119 : vector<64xf32> to vector<64x1xf32>
    %cst_45 = arith.constant 3.200000e+01 : f32
    %121 = vector.broadcast %cst_45 : f32 to vector<64x1xf32>
    %122 = arith.divf %120, %121 : vector<64x1xf32>
    %123 = vector.broadcast %122 : vector<64x1xf32> to vector<64x32xf32>
    %124 = arith.subf %118, %123 : vector<64x32xf32>
    %125 = arith.mulf %124, %124 : vector<64x32xf32>
    %cst_46 = arith.constant dense<0.000000e+00> : vector<64xf32>
    %126 = vector.multi_reduction <add>, %125, %cst_46 [1] : vector<64x32xf32> to vector<64xf32>
    %127 = vector.shape_cast %126 : vector<64xf32> to vector<64x1xf32>
    %cst_47 = arith.constant 3.200000e+01 : f32
    %128 = vector.broadcast %cst_47 : f32 to vector<64x1xf32>
    %129 = arith.divf %127, %128 : vector<64x1xf32>
    %130 = vector.broadcast %122 : vector<64x1xf32> to vector<64x32xf32>
    %131 = arith.subf %118, %130 : vector<64x32xf32>
    %cst_48 = arith.constant 9.99999974E-6 : f32
    %132 = vector.broadcast %cst_48 : f32 to vector<64x1xf32>
    %133 = arith.addf %129, %132 : vector<64x1xf32>
    %134 = math.rsqrt %133 : vector<64x1xf32>
    %135 = vector.broadcast %134 : vector<64x1xf32> to vector<64x32xf32>
    %136 = arith.mulf %131, %135 : vector<64x32xf32>
    %137 = vector.broadcast %2 : vector<1x32xf32> to vector<64x32xf32>
    %138 = arith.mulf %136, %137 : vector<64x32xf32>
    %139 = vector.broadcast %3 : vector<1x32xf32> to vector<64x32xf32>
    %140 = arith.addf %138, %139 : vector<64x32xf32>
    %141 = vector.broadcast %8 : vector<1x32xf32> to vector<64x32xf32>
    %142 = arith.mulf %140, %141 : vector<64x32xf32>
    %cst_49 = arith.constant dense<0.000000e+00> : vector<64xf32>
    %143 = vector.multi_reduction <add>, %142, %cst_49 [1] : vector<64x32xf32> to vector<64xf32>
    %144 = vector.shape_cast %143 : vector<64xf32> to vector<64x1xf32>
    %145 = vector.broadcast %9 : f32 to vector<64x1xf32>
    %146 = arith.addf %144, %145 : vector<64x1xf32>
    %147 = math.exp %1 : vector<64x32xf32>
    %cst_50 = arith.constant dense<0.000000e+00> : vector<64xf32>
    %148 = vector.multi_reduction <add>, %147, %cst_50 [1] : vector<64x32xf32> to vector<64xf32>
    %149 = vector.shape_cast %148 : vector<64xf32> to vector<64x1xf32>
    %cst_51 = arith.constant 3.200000e+01 : f32
    %150 = vector.broadcast %cst_51 : f32 to vector<64x1xf32>
    %151 = arith.divf %149, %150 : vector<64x1xf32>
    %152 = vector.broadcast %151 : vector<64x1xf32> to vector<64x32xf32>
    %153 = arith.subf %147, %152 : vector<64x32xf32>
    %154 = arith.mulf %153, %153 : vector<64x32xf32>
    %cst_52 = arith.constant dense<0.000000e+00> : vector<64xf32>
    %155 = vector.multi_reduction <add>, %154, %cst_52 [1] : vector<64x32xf32> to vector<64xf32>
    %156 = vector.shape_cast %155 : vector<64xf32> to vector<64x1xf32>
    %cst_53 = arith.constant 3.200000e+01 : f32
    %157 = vector.broadcast %cst_53 : f32 to vector<64x1xf32>
    %158 = arith.divf %156, %157 : vector<64x1xf32>
    %159 = vector.broadcast %151 : vector<64x1xf32> to vector<64x32xf32>
    %160 = arith.subf %147, %159 : vector<64x32xf32>
    %cst_54 = arith.constant 9.99999974E-6 : f32
    %161 = vector.broadcast %cst_54 : f32 to vector<64x1xf32>
    %162 = arith.addf %158, %161 : vector<64x1xf32>
    %163 = math.rsqrt %162 : vector<64x1xf32>
    %164 = vector.broadcast %163 : vector<64x1xf32> to vector<64x32xf32>
    %165 = arith.mulf %160, %164 : vector<64x32xf32>
    %166 = vector.broadcast %6 : vector<1x32xf32> to vector<64x32xf32>
    %167 = arith.mulf %165, %166 : vector<64x32xf32>
    %168 = vector.broadcast %7 : vector<1x32xf32> to vector<64x32xf32>
    %169 = arith.addf %167, %168 : vector<64x32xf32>
    %c2_55 = arith.constant 2 : index
    %c0_56 = arith.constant 0 : index
    %c0_57 = arith.constant 0 : index
    %170 = vector.load %arg3[%c2_55, %c0_56, %c0_57] : memref<3x32x32xf32, #tpu.memory_space<vmem>>, vector<1x32x32xf32>
    %171 = vector.shape_cast %170 : vector<1x32x32xf32> to vector<32x32xf32>
    %cst_58 = arith.constant dense<0.000000e+00> : vector<64x32xf32>
    %172 = tpu.matmul %169, %171, %cst_58 {dimension_numbers = #tpu.dot_dimension_numbers<[1], [0], [0], [1], [0, 0, 1, 1], [], []>} : vector<64x32xf32>, vector<32x32xf32>, vector<64x32xf32> -> vector<64x32xf32>
    %cst_59 = arith.constant dense<0.000000e+00> : vector<64xf32>
    %173 = vector.multi_reduction <add>, %172, %cst_59 [1] : vector<64x32xf32> to vector<64xf32>
    %174 = vector.shape_cast %173 : vector<64xf32> to vector<64x1xf32>
    %cst_60 = arith.constant 3.200000e+01 : f32
    %175 = vector.broadcast %cst_60 : f32 to vector<64x1xf32>
    %176 = arith.divf %174, %175 : vector<64x1xf32>
    %177 = vector.broadcast %176 : vector<64x1xf32> to vector<64x32xf32>
    %178 = arith.subf %172, %177 : vector<64x32xf32>
    %179 = arith.mulf %178, %178 : vector<64x32xf32>
    %cst_61 = arith.constant dense<0.000000e+00> : vector<64xf32>
    %180 = vector.multi_reduction <add>, %179, %cst_61 [1] : vector<64x32xf32> to vector<64xf32>
    %181 = vector.shape_cast %180 : vector<64xf32> to vector<64x1xf32>
    %cst_62 = arith.constant 3.200000e+01 : f32
    %182 = vector.broadcast %cst_62 : f32 to vector<64x1xf32>
    %183 = arith.divf %181, %182 : vector<64x1xf32>
    %184 = vector.broadcast %176 : vector<64x1xf32> to vector<64x32xf32>
    %185 = arith.subf %172, %184 : vector<64x32xf32>
    %cst_63 = arith.constant 9.99999974E-6 : f32
    %186 = vector.broadcast %cst_63 : f32 to vector<64x1xf32>
    %187 = arith.addf %183, %186 : vector<64x1xf32>
    %188 = math.rsqrt %187 : vector<64x1xf32>
    %189 = vector.broadcast %188 : vector<64x1xf32> to vector<64x32xf32>
    %190 = arith.mulf %185, %189 : vector<64x32xf32>
    %191 = vector.broadcast %4 : vector<1x32xf32> to vector<64x32xf32>
    %192 = arith.mulf %190, %191 : vector<64x32xf32>
    %193 = vector.broadcast %5 : vector<1x32xf32> to vector<64x32xf32>
    %194 = arith.addf %192, %193 : vector<64x32xf32>
    %cst_64 = arith.constant 0.000000e+00 : f32
    %195 = vector.broadcast %cst_64 : f32 to vector<64x32xf32>
    %196 = arith.maximumf %194, %195 : vector<64x32xf32>
    %197 = vector.broadcast %8 : vector<1x32xf32> to vector<64x32xf32>
    %198 = arith.mulf %196, %197 : vector<64x32xf32>
    %cst_65 = arith.constant dense<0.000000e+00> : vector<64xf32>
    %199 = vector.multi_reduction <add>, %198, %cst_65 [1] : vector<64x32xf32> to vector<64xf32>
    %200 = vector.shape_cast %199 : vector<64xf32> to vector<64x1xf32>
    %201 = vector.broadcast %9 : f32 to vector<64x1xf32>
    %202 = arith.addf %200, %201 : vector<64x1xf32>
    %cst_66 = arith.constant 0.000000e+00 : f32
    %203 = vector.broadcast %cst_66 : f32 to vector<64x1xf32>
    %204 = arith.addf %203, %88 : vector<64x1xf32>
    %205 = arith.addf %204, %146 : vector<64x1xf32>
    %206 = arith.addf %205, %202 : vector<64x1xf32>
    %cst_67 = arith.constant 3.000000e+00 : f32
    %207 = vector.broadcast %cst_67 : f32 to vector<64x1xf32>
    %208 = arith.divf %206, %207 : vector<64x1xf32>
    %209 = arith.subf %88, %208 : vector<64x1xf32>
    %210 = arith.mulf %209, %209 : vector<64x1xf32>
    %cst_68 = arith.constant 0.000000e+00 : f32
    %211 = vector.broadcast %cst_68 : f32 to vector<64x1xf32>
    %212 = arith.addf %211, %210 : vector<64x1xf32>
    %213 = arith.subf %146, %208 : vector<64x1xf32>
    %214 = arith.mulf %213, %213 : vector<64x1xf32>
    %215 = arith.addf %212, %214 : vector<64x1xf32>
    %216 = arith.subf %202, %208 : vector<64x1xf32>
    %217 = arith.mulf %216, %216 : vector<64x1xf32>
    %218 = arith.addf %215, %217 : vector<64x1xf32>
    %cst_69 = arith.constant 3.000000e+00 : f32
    %219 = vector.broadcast %cst_69 : f32 to vector<64x1xf32>
    %220 = arith.divf %218, %219 : vector<64x1xf32>
    %cst_70 = arith.constant 9.99999974E-6 : f32
    %221 = vector.broadcast %cst_70 : f32 to vector<64x1xf32>
    %222 = arith.addf %220, %221 : vector<64x1xf32>
    %223 = math.rsqrt %222 : vector<64x1xf32>
    %224 = arith.subf %88, %208 : vector<64x1xf32>
    %225 = arith.mulf %224, %223 : vector<64x1xf32>
    %c0_71 = arith.constant 0 : index
    %c0_72 = arith.constant 0 : index
    %226 = vector.load %arg6[%c0_71, %c0_72] : memref<4x32xf32, #tpu.memory_space<vmem>>, vector<1x32xf32>
    %227 = vector.broadcast %225 : vector<64x1xf32> to vector<64x32xf32>
    %228 = vector.broadcast %226 : vector<1x32xf32> to vector<64x32xf32>
    %229 = arith.mulf %227, %228 : vector<64x32xf32>
    %230 = arith.subf %146, %208 : vector<64x1xf32>
    %231 = arith.mulf %230, %223 : vector<64x1xf32>
    %c1_73 = arith.constant 1 : index
    %c0_74 = arith.constant 0 : index
    %232 = vector.load %arg6[%c1_73, %c0_74] : memref<4x32xf32, #tpu.memory_space<vmem>>, vector<1x32xf32>
    %233 = vector.broadcast %231 : vector<64x1xf32> to vector<64x32xf32>
    %234 = vector.broadcast %232 : vector<1x32xf32> to vector<64x32xf32>
    %235 = arith.mulf %233, %234 : vector<64x32xf32>
    %236 = arith.addf %229, %235 : vector<64x32xf32>
    %237 = arith.subf %202, %208 : vector<64x1xf32>
    %238 = arith.mulf %237, %223 : vector<64x1xf32>
    %c2_75 = arith.constant 2 : index
    %c0_76 = arith.constant 0 : index
    %239 = vector.load %arg6[%c2_75, %c0_76] : memref<4x32xf32, #tpu.memory_space<vmem>>, vector<1x32xf32>
    %240 = vector.broadcast %238 : vector<64x1xf32> to vector<64x32xf32>
    %241 = vector.broadcast %239 : vector<1x32xf32> to vector<64x32xf32>
    %242 = arith.mulf %240, %241 : vector<64x32xf32>
    %243 = arith.addf %236, %242 : vector<64x32xf32>
    %c3_77 = arith.constant 3 : index
    %c0_78 = arith.constant 0 : index
    %244 = vector.load %arg6[%c3_77, %c0_78] : memref<4x32xf32, #tpu.memory_space<vmem>>, vector<1x32xf32>
    %245 = vector.broadcast %244 : vector<1x32xf32> to vector<64x32xf32>
    %246 = arith.addf %243, %245 : vector<64x32xf32>
    %c0_79 = arith.constant 0 : index
    %c0_80 = arith.constant 0 : index
    %247 = vector.load %arg7[%c0_79, %c0_80] : memref<2x32xf32, #tpu.memory_space<vmem>>, vector<1x32xf32>
    %c1_81 = arith.constant 1 : index
    %c0_82 = arith.constant 0 : index
    %248 = vector.load %arg7[%c1_81, %c0_82] : memref<2x32xf32, #tpu.memory_space<vmem>>, vector<1x32xf32>
    %cst_83 = arith.constant dense<0.000000e+00> : vector<64xf32>
    %249 = vector.multi_reduction <add>, %246, %cst_83 [1] : vector<64x32xf32> to vector<64xf32>
    %250 = vector.shape_cast %249 : vector<64xf32> to vector<64x1xf32>
    %cst_84 = arith.constant 3.200000e+01 : f32
    %251 = vector.broadcast %cst_84 : f32 to vector<64x1xf32>
    %252 = arith.divf %250, %251 : vector<64x1xf32>
    %253 = vector.broadcast %252 : vector<64x1xf32> to vector<64x32xf32>
    %254 = arith.subf %246, %253 : vector<64x32xf32>
    %255 = arith.mulf %254, %254 : vector<64x32xf32>
    %cst_85 = arith.constant dense<0.000000e+00> : vector<64xf32>
    %256 = vector.multi_reduction <add>, %255, %cst_85 [1] : vector<64x32xf32> to vector<64xf32>
    %257 = vector.shape_cast %256 : vector<64xf32> to vector<64x1xf32>
    %cst_86 = arith.constant 3.200000e+01 : f32
    %258 = vector.broadcast %cst_86 : f32 to vector<64x1xf32>
    %259 = arith.divf %257, %258 : vector<64x1xf32>
    %260 = vector.broadcast %252 : vector<64x1xf32> to vector<64x32xf32>
    %261 = arith.subf %246, %260 : vector<64x32xf32>
    %cst_87 = arith.constant 9.99999974E-6 : f32
    %262 = vector.broadcast %cst_87 : f32 to vector<64x1xf32>
    %263 = arith.addf %259, %262 : vector<64x1xf32>
    %264 = math.rsqrt %263 : vector<64x1xf32>
    %265 = vector.broadcast %264 : vector<64x1xf32> to vector<64x32xf32>
    %266 = arith.mulf %261, %265 : vector<64x32xf32>
    %267 = vector.broadcast %247 : vector<1x32xf32> to vector<64x32xf32>
    %268 = arith.mulf %266, %267 : vector<64x32xf32>
    %269 = vector.broadcast %248 : vector<1x32xf32> to vector<64x32xf32>
    %270 = arith.addf %268, %269 : vector<64x32xf32>
    %271 = arith.addf %270, %1 : vector<64x32xf32>
    %272 = vector.extract_strided_slice %271 {offsets = [0, 0], sizes = [8, 32], strides = [1, 1]} : vector<64x32xf32> to vector<8x32xf32>
    %273 = vector.extract_strided_slice %271 {offsets = [8, 0], sizes = [8, 32], strides = [1, 1]} : vector<64x32xf32> to vector<8x32xf32>
    %274 = vector.extract_strided_slice %271 {offsets = [16, 0], sizes = [8, 32], strides = [1, 1]} : vector<64x32xf32> to vector<8x32xf32>
    %275 = vector.extract_strided_slice %271 {offsets = [24, 0], sizes = [8, 32], strides = [1, 1]} : vector<64x32xf32> to vector<8x32xf32>
    %276 = vector.extract_strided_slice %271 {offsets = [32, 0], sizes = [8, 32], strides = [1, 1]} : vector<64x32xf32> to vector<8x32xf32>
    %277 = vector.extract_strided_slice %271 {offsets = [40, 0], sizes = [8, 32], strides = [1, 1]} : vector<64x32xf32> to vector<8x32xf32>
    %278 = vector.extract_strided_slice %271 {offsets = [48, 0], sizes = [8, 32], strides = [1, 1]} : vector<64x32xf32> to vector<8x32xf32>
    %279 = vector.extract_strided_slice %271 {offsets = [56, 0], sizes = [8, 32], strides = [1, 1]} : vector<64x32xf32> to vector<8x32xf32>
    %280 = tpu.concatenate %272, %273, %274, %275, %276, %277, %278, %279 in 1 : vector<8x32xf32>, vector<8x32xf32>, vector<8x32xf32>, vector<8x32xf32>, vector<8x32xf32>, vector<8x32xf32>, vector<8x32xf32>, vector<8x32xf32> -> vector<8x256xf32>
    %c0_88 = arith.constant 0 : index
    %c0_89 = arith.constant 0 : index
    %281 = vector.load %arg10[%c0_88, %c0_89] : memref<32x8xf32, #tpu.memory_space<vmem>>, vector<32x8xf32>
    %cst_90 = arith.constant dense<0.000000e+00> : vector<32x256xf32>
    %282 = tpu.matmul %281, %280, %cst_90 {dimension_numbers = #tpu.dot_dimension_numbers<[1], [0], [0], [1], [0, 0, 1, 1], [], []>} : vector<32x8xf32>, vector<8x256xf32>, vector<32x256xf32> -> vector<32x256xf32>
    %c0_91 = arith.constant 0 : index
    %c0_92 = arith.constant 0 : index
    %283 = vector.load %arg9[%c0_91, %c0_92] : memref<256x256xf32, #tpu.memory_space<vmem>>, vector<256x256xf32>
    %cst_93 = arith.constant dense<0.000000e+00> : vector<32x256xf32>
    %284 = tpu.matmul %282, %283, %cst_93 {dimension_numbers = #tpu.dot_dimension_numbers<[1], [0], [0], [1], [0, 0, 1, 1], [], []>} : vector<32x256xf32>, vector<256x256xf32>, vector<32x256xf32> -> vector<32x256xf32>
    %285 = arith.mulf %282, %282 : vector<32x256xf32>
    %c0_94 = arith.constant 0 : index
    %c0_95 = arith.constant 0 : index
    %286 = vector.load %arg9[%c0_94, %c0_95] : memref<256x256xf32, #tpu.memory_space<vmem>>, vector<256x256xf32>
    %cst_96 = arith.constant dense<0.000000e+00> : vector<32x256xf32>
    %287 = tpu.matmul %285, %286, %cst_96 {dimension_numbers = #tpu.dot_dimension_numbers<[1], [0], [0], [1], [0, 0, 1, 1], [], []>} : vector<32x256xf32>, vector<256x256xf32>, vector<32x256xf32> -> vector<32x256xf32>
    %288 = arith.subf %282, %284 : vector<32x256xf32>
    %289 = arith.mulf %284, %284 : vector<32x256xf32>
    %290 = arith.subf %287, %289 : vector<32x256xf32>
    %cst_97 = arith.constant 9.99999974E-6 : f32
    %291 = vector.broadcast %cst_97 : f32 to vector<32x256xf32>
    %292 = arith.addf %290, %291 : vector<32x256xf32>
    %293 = math.rsqrt %292 : vector<32x256xf32>
    %294 = arith.mulf %288, %293 : vector<32x256xf32>
    %c0_98 = arith.constant 0 : index
    %c0_99 = arith.constant 0 : index
    %295 = vector.load %arg8[%c0_98, %c0_99] : memref<2x256xf32, #tpu.memory_space<vmem>>, vector<1x256xf32>
    %296 = vector.broadcast %295 : vector<1x256xf32> to vector<32x256xf32>
    %297 = arith.mulf %294, %296 : vector<32x256xf32>
    %c1_100 = arith.constant 1 : index
    %c0_101 = arith.constant 0 : index
    %298 = vector.load %arg8[%c1_100, %c0_101] : memref<2x256xf32, #tpu.memory_space<vmem>>, vector<1x256xf32>
    %299 = vector.broadcast %298 : vector<1x256xf32> to vector<32x256xf32>
    %300 = arith.addf %297, %299 : vector<32x256xf32>
    %c0_102 = arith.constant 0 : index
    %c0_103 = arith.constant 0 : index
    %c0_104 = arith.constant 0 : index
    %301 = vector.load %arg11[%c0_102, %c0_103, %c0_104] : memref<1x32x256xf32, #tpu.memory_space<vmem>>, vector<1x32x256xf32>
    %302 = vector.shape_cast %301 : vector<1x32x256xf32> to vector<32x256xf32>
    %303 = vector.shape_cast %300 : vector<32x256xf32> to vector<1x32x256xf32>
    tpu.vector_store %arg11[%c0_102, %c0_103, %c0_104], %303 {strides = array<i32>} : memref<1x32x256xf32, #tpu.memory_space<vmem>>, vector<1x32x256xf32>,
    return
  }
  func.func @transform_0(%arg0: i32) -> (i32, i32, i32) {
    %c0_i32 = arith.constant 0 : i32
    %c0_i32_0 = arith.constant 0 : i32
    %c0_i32_1 = arith.constant 0 : i32
    return %arg0, %c0_i32, %c0_i32_0 : i32, i32, i32
  }
  func.func @transform_1(%arg0: i32) -> (i32, i32) {
    %c0_i32 = arith.constant 0 : i32
    %c0_i32_0 = arith.constant 0 : i32
    %c0_i32_1 = arith.constant 0 : i32
    return %c0_i32, %c0_i32_0 : i32, i32
  }
  func.func @transform_2(%arg0: i32) -> (i32, i32, i32) {
    %c0_i32 = arith.constant 0 : i32
    %c0_i32_0 = arith.constant 0 : i32
    %c0_i32_1 = arith.constant 0 : i32
    %c0_i32_2 = arith.constant 0 : i32
    return %c0_i32, %c0_i32_0, %c0_i32_1 : i32, i32, i32
  }
  func.func @transform_3(%arg0: i32) -> (i32, i32) {
    %c0_i32 = arith.constant 0 : i32
    %c0_i32_0 = arith.constant 0 : i32
    %c0_i32_1 = arith.constant 0 : i32
    return %c0_i32, %c0_i32_0 : i32, i32
  }
  func.func @transform_4(%arg0: i32) -> i32 {
    %c0_i32 = arith.constant 0 : i32
    %c0_i32_0 = arith.constant 0 : i32
    return %c0_i32 : i32
  }
  func.func @transform_5(%arg0: i32) -> (i32, i32) {
    %c0_i32 = arith.constant 0 : i32
    %c0_i32_0 = arith.constant 0 : i32
    %c0_i32_1 = arith.constant 0 : i32
    return %c0_i32, %c0_i32_0 : i32, i32
  }
  func.func @transform_6(%arg0: i32) -> (i32, i32) {
    %c0_i32 = arith.constant 0 : i32
    %c0_i32_0 = arith.constant 0 : i32
    %c0_i32_1 = arith.constant 0 : i32
    return %c0_i32, %c0_i32_0 : i32, i32
  }
  func.func @transform_7(%arg0: i32) -> (i32, i32) {
    %c0_i32 = arith.constant 0 : i32
    %c0_i32_0 = arith.constant 0 : i32
    %c0_i32_1 = arith.constant 0 : i32
    return %c0_i32, %c0_i32_0 : i32, i32
  }
  func.func @transform_8(%arg0: i32) -> (i32, i32) {
    %c0_i32 = arith.constant 0 : i32
    %c0_i32_0 = arith.constant 0 : i32
    %c0_i32_1 = arith.constant 0 : i32
    return %c0_i32, %c0_i32_0 : i32, i32
  }
  func.func @transform_9(%arg0: i32) -> (i32, i32) {
    %c0_i32 = arith.constant 0 : i32
    %c0_i32_0 = arith.constant 0 : i32
    %c0_i32_1 = arith.constant 0 : i32
    return %c0_i32, %c0_i32_0 : i32, i32
  }
  func.func @transform_10(%arg0: i32) -> (i32, i32, i32) {
    %c0_i32 = arith.constant 0 : i32
    %c0_i32_0 = arith.constant 0 : i32
    %c0_i32_1 = arith.constant 0 : i32
    return %arg0, %c0_i32, %c0_i32_0 : i32, i32, i32
  }
}

</mosaic_0001>

<bundles_post_ra>
// kernel: tpu_custom_call.1
= control target key start
LH: loop header
LB: loop body
LE: loop exit
PB: predicated region body
PF: predicated region fallthrough
CT: control target
= control target key end

     0   :  { %s5209_s0 = inlined_call_operand.hbm [shape: f32[16,8,32], index: 0, kind: input, shape index: {}]   ;;  %s5210_s1 = inlined_call_operand.vmem [shape: f32[2,32], index: 1, kind: input, shape index: {}]   ;;  %s5211_s2 = inlined_call_operand.hbm [shape: f32[3,32,32], index: 2, kind: input, shape index: {}]   ;;  %s5212_s3 = inlined_call_operand.vmem [shape: f32[7,32], index: 3, kind: input, shape index: {}]   ;;  %s5213_s4 = inlined_call_operand.<no memory space> [shape: f32[1], index: 4, kind: input, shape index: {}]   ;;  %s5214_s5 = inlined_call_operand.vmem [shape: f32[4,32], index: 5, kind: input, shape index: {}]   ;;  %s5215_s6 = inlined_call_operand.vmem [shape: f32[2,32], index: 6, kind: input, shape index: {}]   ;;  %s5216_s7 = inlined_call_operand.vmem [shape: f32[2,256], index: 7, kind: input, shape index: {}]   ;;  %s5217_s8 = inlined_call_operand.hbm [shape: f32[256,256], index: 8, kind: input, shape index: {}]   ;;  %s5218_s9 = inlined_call_operand.vmem [shape: f32[32,8], index: 9, kind: input, shape index: {}]   ;;  %s5219_s10 = inlined_call_operand.hbm [shape: f32[2,32,256], index: 10, kind: output, shape index: {}]  }
   0x1   :  { %5243 = sst [smem:[#allocation29_spill]] %s5211_s2 }
   0x2   :  { %5244 = sst [smem:[#allocation30_spill]] %s5217_s8 }
   0x3   :  { %15 = sst [smem:[#allocation2]] %s5213_s4 }
   0x4   :  { %16 = vsyncpa [#allocation4], 0 }
   0x5   :  { %18 = vsyncpa [#allocation4 + $0x1], 0 }
   0x6   :  { %19 = vsyncpa [#allocation7], 0 }
   0x7   :  { %20 = vsyncpa [#allocation5], 0 }
   0x8   :  { %22 = vsyncpa [#allocation5 + $0x1], 0  ;;  %s3506_s15 = smov 0   ;;  %s3508_s16 = smov 0  }
   0x9   :  { %s3510_s17 = smov 0   ;;  %s3512_s18 = smov 0  }
   0xa LB: > { %s3527_s4 = sadd.s32 4294967295, %s3432_s18   ;;  %s2841_s19 = sadd.s32 4294967294, %s3432_s18   ;;  %s3432_s18 = sphi %s3512_s18, %s5298_s18   ;;  %s3428_s17 = sphi %s3510_s17, %s5297_s17   ;;  %s3424_s16 = sphi %s3508_s16, %s5296_s16   ;;  %s3420_s15 = sphi %s3506_s15, %s5295_s15  }
   0xb   : > { %p48_p0 = scmp.ne.s32.totalorder %s3424_s16, %s3420_s15  ;;  %p5222_p1 = scmp.eq.s32.totalorder %s3527_s4, 0 }
   0xc   : > { %p261_p2 = scmp.eq.s32.totalorder %s3527_s4, 1  ;;  %p267_p3 = scmp.eq.s32.totalorder %s2841_s19, 1 }
   0xd   : > { %p3536_p4 = por %p5222_p1, %p48_p0  ;;  %p2842_p5 = scmp.ge.s32.totalorder %s3432_s18, 1 }
   0xe   : > { %p3541_p6 = por %p267_p3, %p48_p0  ;;  %p274_p7 = scmp.lt.s32.totalorder %s3432_s18, 3 }
   0xf   : > { %s5245_s20 = scalar_select %p3536_p4, 1, 0 }
  0x10   : > { %s5246_s21 = scalar_select %p3541_p6, 1, 0 }
  0x11   : > { %p3546_p8 = pnand %p2842_p5, %p274_p7  ;;  %s3434_s23 = smov [#allocation6]  }
  0x12   : > { %s289_s24 = sshll.u32 %s3434_s23, 4  ;;  %s3435_s26 = smov [#allocation8]   ;;  %s290_s24 = int_to_ptr.vmem [resolvable:$true] %s289_s24 }
  0x13   : > { %s5247_s22 = scalar_select %p3546_p8, 1, 0 }
  0x14   : > { %p3013_p9 = pneg %p3546_p8  ;;  %s317_s27 = sshll.u32 %s3435_s26, 4  ;;  %s318_s27 = int_to_ptr.vmem [resolvable:$true] %s317_s27 }
  0x15   : > { %s3295_s28 = scalar_lea.vmem %s290_s24, 1536  ;;  %p3303_p5 = scmp.lt.s32.totalorder %s290_s24, %s290_s24 }
  0x16   : > { %p3555_p11 = pnand %p3013_p9, %p5222_p1  ;;  %p3296_p13 = scmp.ne.s32.totalorder %s290_s24, %s3295_s28 }
  0x17   : > { %p3304_p7 = scmp.lt.s32.totalorder %s3295_s28, %s3295_s28 }
  0x18   : > { %p3286_p12 = pneg %p3555_p11 }
  0x19   : > { %p3305_p10 = por %p3304_p7, %p3303_p5 }
  0x1a   : > { %p3298_p0 = pnand %p3296_p13, %p3286_p12 }
  0x1c   : > { %p3299_p3 = pneg %p3298_p0 }
  0x1e   : > { %p3306_p9 = pnand %p3305_p10, %p3299_p3 }
  0x20   : > { %3309 = shalt.err (!%p3306_p9)
}
  0x21   : > { %s5220_s29 = smov 128   ;;  %s5221_s30 = smov 8  }
  0x22   : > { %s5249_s2 = sld [smem:[#allocation29_spill]]  ;;  %s3321_s13 = scalar_lea.vmem %s318_s27, 8192 }
  0x23   : > { %p3322_p13 = scmp.ne.s32.totalorder %s318_s27, %s3321_s13  ;;  %p3329_p10 = scmp.lt.s32.totalorder %s318_s27, %s318_s27 }
  0x24   : > { %p3330_p3 = scmp.lt.s32.totalorder %s3321_s13, %s3321_s13 }
  0x25   : > { %p3324_p0 = pnand %p3322_p13, %p3286_p12 }
  0x26   : > { %p3331_p7 = por %p3330_p3, %p3329_p10 }
  0x27   : > { %p3325_p5 = pneg %p3324_p0 }
  0x28   : > { %3016 = dma.hbm_to_vmem [thread:$0]  (!%p3555_p11), %s5249_s2, 1536, %s290_s24, [#allocation7], %s5220_s29, %s5220_s29, %s5221_s30  }
  0x29   : > { %p3332_p9 = pnand %p3331_p7, %p3325_p5 }
  0x2b   : > { %3335 = shalt.err (!%p3332_p9)
}
  0x2c   : > { %s3438_s14 = smov 256   ;;  %s3439_s19 = smov 16  }
  0x2d   : > { %s5250_s8 = sld [smem:[#allocation30_spill]]  ;;  %s3581_s26 = sadd.s32 1, %s3432_s18  }
  0x2e   : > { %s32_s28 = ssub.s32 %s3432_s18, %s3581_s26  ;;  %s35_s11 = sadd.s32 1, %s3428_s17 }
  0x2f   : > { %p33_p12 = scmp.eq.s32.totalorder %s32_s28, 0  ;;  %p42_p13 = scmp.ne.s32.totalorder %s3428_s17, %s3424_s16 }
  0x30   : > { %p43_p0 = scmp.eq.s32.totalorder %s3432_s18, 0  ;;  %p3030_p3 = scmp.lt.s32.totalorder %s3432_s18, 2 }
  0x31   : > { %s3590_s12 = scalar_select %p33_p12, %s3428_s17, %s35_s11  }
  0x32   : > { %p44_p5 = por %p43_p0, %p42_p13  ;;  %p3594_p10 = por %p261_p2, %p42_p13 }
  0x33   : > { %3019 = dma.hbm_to_vmem [thread:$0]  (!%p3555_p11), %s5250_s8, 8192, %s318_s27, [#allocation7], %s3438_s14, %s3438_s14, %s3439_s19  }
  0x34   : > { %5251 = sst [smem:[#allocation13_spill]] %s3590_s12  ;;  %s334_s25 = sand.u32 1, %s3428_s17  }
  0x35   : > { %s5252_s13 = scalar_select %p3594_p10, 1, 0 }
  0x36   : > { %s2846_s23 = sshll.u32 %s334_s25, 6  ;;  %s2903_s27 = sshll.u32 %s3432_s18, 10 }
  0x37   : > { %s3604_s24 = scalar_lea.hbm %s5209_s0, %s2903_s27  ;;  %s338_s28 = scalar_lea.vmem [#allocation3], %s2846_s23 }
  0x38   : > { %s345_s11 = sshll.u32 %s338_s28, 4  ;;  %p3608_p2 = pnand %p3030_p3, %p44_p5  ;;  %s3606_s11 = int_to_ptr.vmem [resolvable:$true] %s345_s11 }
  0x39   : > { %s3612_s30 = scalar_lea.sflag [#allocation4], %s334_s25  ;;  %s3336_s2 = scalar_lea.hbm %s3604_s24, 1024 }
  0x3a   : > { %p3337_p11 = scmp.ne.s32.totalorder %s3604_s24, %s3336_s2  ;;  %p3338_p7 = pneg %p3608_p2 }
  0x3b   : > { %s3341_s23 = scalar_lea.hbm %s5209_s0, 2048  ;;  %p3342_p13 = scmp.lt.s32.totalorder %s3604_s24, %s5209_s0 }
  0x3c   : > { %p3339_p9 = pnand %p3338_p7, %p3337_p11  ;;  %p3343_p0 = scmp.lt.s32.totalorder %s3341_s23, %s3336_s2 }
  0x3e   : > { %p3340_p12 = pneg %p3339_p9  ;;  %p3344_p5 = por %p3343_p0, %p3342_p13 }
  0x40   : > { %p3345_p3 = pnand %p3344_p5, %p3340_p12 }
  0x42   : > { %3348 = shalt.err (!%p3345_p3)
}
  0x43   : > { %s3349_s25 = scalar_lea.vmem %s3606_s11, 1024  ;;  %s3440_s8 = smov [#allocation3]  }
  0x44   : > { %p3350_p1 = scmp.ne.s32.totalorder %s3606_s11, %s3349_s25  ;;  %s3354_s12 = sshll.u32 %s3440_s8, 4  ;;  %s3355_s12 = int_to_ptr.vmem [resolvable:$false] %s3354_s12 }
  0x45   : > { %s3356_s27 = scalar_lea.vmem %s3355_s12, 2048  ;;  %p3357_p9 = scmp.lt.s32.totalorder %s3606_s11, %s3355_s12 }
  0x46   : > { %p3352_p6 = pnand %p3350_p1, %p3338_p7  ;;  %p3358_p10 = scmp.lt.s32.totalorder %s3356_s27, %s3349_s25 }
  0x48   : > { %p3353_p11 = pneg %p3352_p6  ;;  %p3359_p4 = por %p3358_p10, %p3357_p9 }
  0x4a   : > { %p3360_p8 = pnand %p3359_p4, %p3353_p11 }
  0x4c   : > { %3363 = shalt.err (!%p3360_p8)
}
  0x4d   : > { %s5254_s2 = smov 8   ;;  %s5255_s14 = smov 128  }
  0x4e   : > { %3023 = dma.hbm_to_vmem [thread:$0]  (!%p3608_p2), %s3604_s24, 1024, %s3606_s11, %s3612_s30, %s5255_s14, %s5255_s14, %s5254_s2  }
  0x4f   : > { %p5256_p1 = scmp.ne.s32.totalorder %s5247_s22, 0 }
  0x51   : > { %357 = sbr.rel (%p5256_p1) target bundleno = 2359 (0x937), region = 60 }
  0x56   : > { %s3639_s8 = sand.u32 1, %s3424_s16   ;;  %p5257_p4 = scmp.ne.s32.totalorder %s5245_s20, 0 }
  0x57   : > { %s2850_s12 = sshll.u32 %s3639_s8, 6  ;;  %s360_s23 = scalar_lea.sflag [#allocation4], %s3639_s8 }
  0x58   : > { %s3645_s29 = scalar_lea.vmem [#allocation3], %s2850_s12 }
  0x59   : > { %3407 = dma.done.wait (%p5257_p4), %s360_s23, 1024  }
  0x5a   : > { %3409 = vsyncadd (%p5257_p4), %s360_s23, 4294966272  ;;  %p5258_p6 = scmp.eq.s32.totalorder %s3527_s4, 0 }
  0x5c   : > { %3411 = dma.done.wait (%p5258_p6), [#allocation7], 9728   ;;  %p5259_p8 = pmov %p5258_p6 }
  0x5d   : > { %v409_v0 = vld [vmem:[%s3645_s29] sm:$0xff]  ;;  %vm438_vm0 = vcmask 261120   ;;  %v3660_v2 = vld [vmem:[%s3645_s29 + $0x10] sm:$0xff]  ;;  %v3664_v5 = vld [vmem:[%s3645_s29 + $0x8] sm:$0xff]  ;;  %s424_s28 = sld [smem:[#allocation2]]  ;;  %s3441_s25 = smov 32  }
  0x5e   : > { %3413 = vsyncadd (%p5259_p8), [#allocation7], 4294957568  ;;  %v2854_v1 = vld [vmem:[%s5210_s1] ss:$0 sm:$0xff]  ;;  %v3667_v6 = vld [vmem:[%s3645_s29 + $0x18] sm:$0xff]  ;;  %2969 = vmatprep.mubr.msk.f32.mxu1 %vm438_vm0, %v409_v0  ;;  %s3442_s27 = smov 64  }
  0x5f   : > { %v430_v3 = vadd.f32 %v2854_v1, %v409_v0  ;;  %v432_v4 = vadd.f32 %v2854_v1, %v3660_v2  ;;  %v431_v7 = vadd.f32 %v2854_v1, %v3664_v5  ;;  %v433_v8 = vadd.f32 %v2854_v1, %v3667_v6  ;;  %v3673_v9 = vld [vmem:[%s3645_s29 + $0x20] sm:$0xff]  ;;  %v3676_v10 = vld [vmem:[%s3645_s29 + $0x28] sm:$0xff]  ;;  %v3685_v17 = vld [vmem:[%s3645_s29 + $0x30] sm:$0xff]  ;;  %s3444_s2 = smov 96   ;;  %s2736_s30 = scalar_lea.sflag [#allocation5], %s3639_s8 }
  0x60   : > { %v434_v15 = vadd.f32 %v2854_v1, %v3673_v9  ;;  %v435_v16 = vadd.f32 %v2854_v1, %v3676_v10  ;;  %v3688_v18 = vld [vmem:[%s3645_s29 + $0x38] sm:$0xff]  ;;  %v436_v21 = vadd.f32 %v2854_v1, %v3685_v17  ;;  %v1453_v25 = vmul.f32 1.442695, %v409_v0  ;;  %p5291_p2 = scmp.ne.s32.totalorder %s5252_s13, 0  ;;  %s3445_s20 = smov [#allocation9]  }
  0x61   : > { %v439_v11 = vsel %vm438_vm0, %v430_v3, 0.0  ;;  %v445_v12 = vsel %vm438_vm0, %v432_v4, 0.0  ;;  %v442_v13 = vsel %vm438_vm0, %v431_v7, 0.0  ;;  %v448_v14 = vsel %vm438_vm0, %v433_v8, 0.0  ;;  %s3368_s24 = sshll.u32 %s3445_s20, 4  ;;  %s3369_s24 = int_to_ptr.vmem [resolvable:$false] %s3368_s24 }
  0x62   : > { %440 = vadd.xlane.f32.xlu0 %v439_v11  ;;  %446 = vadd.xlane.f32.xlu1 %v445_v12  ;;  %v451_v19 = vsel %vm438_vm0, %v434_v15, 0.0  ;;  %v454_v20 = vsel %vm438_vm0, %v435_v16, 0.0  ;;  %v437_v22 = vadd.f32 %v2854_v1, %v3688_v18  ;;  %v457_v23 = vsel %vm438_vm0, %v436_v21, 0.0  ;;  %s3370_s11 = scalar_lea.vmem %s3369_s24, 2048 }
  0x63   : > { %v1457_v30 = vmul.f32 1.442695, %v3660_v2  ;;  %3078 = vpow2.f32 %v1453_v25  ;;  %v1455_v33 = vmul.f32 1.442695, %v3664_v5  ;;  %v1459_v40 = vmul.f32 1.442695, %v3667_v6 }
  0x64   : > { %v460_v24 = vsel %vm438_vm0, %v437_v22, 0.0  ;;  %v1461_v44 = vmul.f32 1.442695, %v3673_v9  ;;  %v1463_v55 = vmul.f32 1.442695, %v3676_v10  ;;  %vm2275_vm1 = vcmask 523264  }
  0x65   : > { %3080 = vpow2.f32 %v1457_v30  ;;  %v1465_v56 = vmul.f32 1.442695, %v3685_v17  ;;  %vm2277_vm2 = vcmask 785408   ;;  %vm2286_vm3 = vcmask 64512  }
  0x66   : > { %443 = vadd.xlane.f32.xlu0 %v442_v13  ;;  %449 = vadd.xlane.f32.xlu1 %v448_v14  ;;  %3082 = vpow2.f32 %v1455_v33 }
  0x67   : > { %3084 = vpow2.f32 %v1459_v40  ;;  %v1020_v40 = vld [vmem:[#allocation6 + $0x28] sm:$0xff] }
  0x68   : > { %3086 = vpow2.f32 %v1461_v44 }
  0x69   : > { %3088 = vpow2.f32 %v1463_v55 }
  0x6a   : > { %452 = vadd.xlane.f32.xlu0 %v451_v19  ;;  %455 = vadd.xlane.f32.xlu1 %v454_v20  ;;  %3090 = vpow2.f32 %v1465_v56 }
  0x6e   : > { %458 = vadd.xlane.f32.xlu0 %v457_v23  ;;  %461 = vadd.xlane.f32.xlu1 %v460_v24 }
  0xeb   : > { %v441_v26 = vpop.xlane.xlu0 %440  ;;  %v447_v27 = vpop.xlane.xlu1 %446 }
  0xec   : > { %v464_v28 = vmul.f32 0.03125, %v441_v26  ;;  %v466_v29 = vmul.f32 0.03125, %v447_v27 }
  0xee   : > { %v3697_v31 = vsub.f32 %v430_v3, %v464_v28  ;;  %v3699_v32 = vsub.f32 %v432_v4, %v466_v29  ;;  %v1467_v4 = vmul.f32 1.442695, %v3688_v18 }
  0xef   : > { %v444_v34 = vpop.xlane.xlu0 %443  ;;  %v450_v35 = vpop.xlane.xlu1 %449 }
  0xf0   : > { %v465_v36 = vmul.f32 0.03125, %v444_v34  ;;  %v467_v37 = vmul.f32 0.03125, %v450_v35  ;;  %v480_v38 = vmul.f32 %v3697_v31, %v3697_v31  ;;  %v482_v39 = vmul.f32 %v3699_v32, %v3699_v32  ;;  %v571_v34 = vld [vmem:[#allocation6 + $0x18] sm:$0xff]  ;;  %v570_v35 = vld [vmem:[#allocation6 + $0x10] sm:$0xff] }
  0xf1   : > { %3092 = vpow2.f32 %v1467_v4  ;;  %2941 = vmatprep.subr.mxu0 %v571_v34  ;;  %v3792_v4 = vld [vmem:[%s5212_s3] ss:$0 sm:$0xff] }
  0xf2   : > { %v3707_v41 = vsub.f32 %v431_v7, %v465_v36  ;;  %v3709_v42 = vsub.f32 %v433_v8, %v467_v37  ;;  %v488_v43 = vsel %vm438_vm0, %v480_v38, 0.0  ;;  %v494_v47 = vsel %vm438_vm0, %v482_v39, 0.0  ;;  %v3736_v7 = vpop.eup %3078  ;;  %2942 = vmatpush3.msra.mxu0 %v571_v34  ;;  %v569_v36 = vld [vmem:[#allocation6 + $0x8] sm:$0xff]  ;;  %v568_v37 = vld [vmem:[#allocation6] sm:$0xff]  ;;  %v1022_v38 = vld [vmem:[#allocation6 + $0x38] sm:$0xff] }
  0xf3   : > { %489 = vadd.xlane.f32.xlu0 %v488_v43  ;;  %v453_v45 = vpop.xlane.xlu0 %452  ;;  %v456_v46 = vpop.xlane.xlu1 %455  ;;  %v1469_v19 = vsel %vm438_vm0, %v3736_v7, 0.0  ;;  %2943 = vmatprep.subr.mxu0 %v570_v35  ;;  %v1021_v39 = vld [vmem:[#allocation6 + $0x30] sm:$0xff]  ;;  %v1019_v43 = vld [vmem:[#allocation6 + $0x20] sm:$0xff] }
  0xf4   : > { %v468_v48 = vmul.f32 0.03125, %v453_v45  ;;  %v469_v49 = vmul.f32 0.03125, %v456_v46  ;;  %v481_v50 = vmul.f32 %v3707_v41, %v3707_v41  ;;  %v483_v51 = vmul.f32 %v3709_v42, %v3709_v42  ;;  %v3744_v14 = vpop.eup %3080  ;;  %2944 = vmatpush3.msra.mxu0 %v570_v35  ;;  %2961 = vmatprep.subr.mxu1 %v1022_v38 }
  0xf5   : > { %v1475_v23 = vsel %vm438_vm0, %v3744_v14, 0.0  ;;  %2945 = vmatprep.subr.mxu0 %v569_v36  ;;  %2962 = vmatpush3.msra.mxu1 %v1022_v38 }
  0xf6   : > { %v3718_v52 = vsub.f32 %v434_v15, %v468_v48  ;;  %v3720_v53 = vsub.f32 %v435_v16, %v469_v49  ;;  %v491_v54 = vsel %vm438_vm0, %v481_v50, 0.0  ;;  %v497_v59 = vsel %vm438_vm0, %v483_v51, 0.0  ;;  %v3746_v15 = vpop.eup %3082  ;;  %2946 = vmatpush3.msra.mxu0 %v569_v36  ;;  %2963 = vmatprep.subr.mxu1 %v1021_v39 }
  0xf7   : > { %495 = vadd.xlane.f32.xlu0 %v494_v47  ;;  %492 = vadd.xlane.f32.xlu1 %v491_v54  ;;  %v459_v57 = vpop.xlane.xlu0 %458  ;;  %v462_v58 = vpop.xlane.xlu1 %461 }
  0xf8   : > { %v470_v60 = vmul.f32 0.03125, %v459_v57  ;;  %v471_v61 = vmul.f32 0.03125, %v462_v58  ;;  %v484_v62 = vmul.f32 %v3718_v52, %v3718_v52  ;;  %v485_v63 = vmul.f32 %v3720_v53, %v3720_v53  ;;  %v3751_v20 = vpop.eup %3084  ;;  %2947 = vmatprep.subr.mxu0 %v568_v37  ;;  %2964 = vmatpush3.msra.mxu1 %v1021_v39 }
  0xf9   : > { %v1478_v25 = vsel %vm438_vm0, %v3751_v20, 0.0  ;;  %2948 = vmatpush3.msra.mxu0 %v568_v37  ;;  %2965 = vmatprep.subr.mxu1 %v1020_v40 }
  0xfa   : > { %v3730_v0 = vsub.f32 %v436_v21, %v470_v60  ;;  %v3732_v1 = vsub.f32 %v437_v22, %v471_v61  ;;  %v500_v3 = vsel %vm438_vm0, %v484_v62, 0.0  ;;  %v503_v8 = vsel %vm438_vm0, %v485_v63, 0.0  ;;  %v3753_v21 = vpop.eup %3086  ;;  %2966 = vmatpush3.msra.mxu1 %v1020_v40 }
  0xfb   : > { %498 = vadd.xlane.f32.xlu1 %v497_v59  ;;  %501 = vadd.xlane.f32.xlu0 %v500_v3  ;;  %v1472_v22 = vsel %vm438_vm0, %v3746_v15, 0.0  ;;  %v3759_v24 = vpop.eup %3088  ;;  %v1481_v26 = vsel %vm438_vm0, %v3753_v21, 0.0 }
  0xfc   : > { %v486_v11 = vmul.f32 %v3730_v0, %v3730_v0  ;;  %v487_v12 = vmul.f32 %v3732_v1, %v3732_v1  ;;  %v3765_v27 = vpop.eup %3090  ;;  %v1484_v28 = vsel %vm438_vm0, %v3759_v24, 0.0  ;;  %2967 = vmatprep.subr.mxu1 %v1019_v43 }
  0xfd   : > { %v1487_v29 = vsel %vm438_vm0, %v3765_v27, 0.0  ;;  %2968 = vmatpush3.msra.mxu1 %v1019_v43 }
  0xfe   : > { %v506_v13 = vsel %vm438_vm0, %v486_v11, 0.0  ;;  %v509_v16 = vsel %vm438_vm0, %v487_v12, 0.0  ;;  %v3771_v30 = vpop.eup %3092  ;;  %2970 = vmatmul.mubr.msk.f32.vlgmr.msra.gmra.mxu1 %vm438_vm0, %v3664_v5 }
  0xff   : > { %504 = vadd.xlane.f32.xlu1 %v503_v8  ;;  %507 = vadd.xlane.f32.xlu0 %v506_v13  ;;  %v1490_v33 = vsel %vm438_vm0, %v3771_v30, 0.0 }
 0x100   : > { %2972 = vmatprep.mubr.msk.f32.mxu1 %vm438_vm0, %v3660_v2 }
 0x102   : > { %2973 = vmatmul.mubr.msk.f32.gmra.mxu1 %vm438_vm0, %v3667_v6 }
 0x103   : > { %510 = vadd.xlane.f32.xlu1 %v509_v16  ;;  %1470 = vadd.xlane.f32.xlu0 %v1469_v19  ;;  %v3801_v16 = vld [vmem:[%s5212_s3 + $0x1] ss:$0 sm:$0xff] }
 0x104   : > { %2975 = vmatprep.mubr.msk.f32.mxu1 %vm438_vm0, %v3673_v9 }
 0x106   : > { %2976 = vmatmul.mubr.msk.f32.gmra.mxu1 %vm438_vm0, %v3676_v10 }
 0x107   : > { %1473 = vadd.xlane.f32.xlu1 %v1472_v22  ;;  %1476 = vadd.xlane.f32.xlu0 %v1475_v23 }
 0x108   : > { %2978 = vmatprep.mubr.msk.f32.mxu1 %vm438_vm0, %v3685_v17 }
 0x10a   : > { %2979 = vmatmul.mubr.msk.f32.gmra.mxu1 %vm438_vm0, %v3688_v18 }
 0x10b   : > { %1479 = vadd.xlane.f32.xlu1 %v1478_v25  ;;  %1482 = vadd.xlane.f32.xlu0 %v1481_v26 }
 0x10f   : > { %1485 = vadd.xlane.f32.xlu1 %v1484_v28  ;;  %1488 = vadd.xlane.f32.xlu0 %v1487_v29 }
 0x113   : > { %1491 = vadd.xlane.f32.xlu1 %v1490_v33 }
 0x17c   : > { %v490_v44 = vpop.xlane.xlu0 %489 }
 0x17d   : > { %v512_v5 = vmul.f32 0.03125, %v490_v44 }
 0x17f   : > { %v520_v45 = vadd.f32 1e-05, %v512_v5 }
 0x180   : > { %v493_v46 = vpop.xlane.xlu1 %492  ;;  %v496_v2 = vpop.xlane.xlu0 %495 }
 0x181   : > { %3094 = vrsqrt.f32 %v520_v45  ;;  %v513_v47 = vmul.f32 0.03125, %v493_v46  ;;  %v514_v6 = vmul.f32 0.03125, %v496_v2 }
 0x183   : > { %v521_v48 = vadd.f32 1e-05, %v513_v47  ;;  %v522_v49 = vadd.f32 1e-05, %v514_v6 }
 0x184   : > { %v499_v9 = vpop.xlane.xlu1 %498  ;;  %v502_v50 = vpop.xlane.xlu0 %501 }
 0x185   : > { %3096 = vrsqrt.f32 %v521_v48  ;;  %v515_v10 = vmul.f32 0.03125, %v499_v9  ;;  %v516_v51 = vmul.f32 0.03125, %v502_v50 }
 0x186   : > { %3098 = vrsqrt.f32 %v522_v49 }
 0x187   : > { %v523_v17 = vadd.f32 1e-05, %v515_v10  ;;  %v524_v54 = vadd.f32 1e-05, %v516_v51 }
 0x188   : > { %v505_v55 = vpop.xlane.xlu1 %504  ;;  %v508_v18 = vpop.xlane.xlu0 %507 }
 0x189   : > { %3100 = vrsqrt.f32 %v523_v17  ;;  %v517_v56 = vmul.f32 0.03125, %v505_v55  ;;  %v518_v57 = vmul.f32 0.03125, %v508_v18 }
 0x18a   : > { %3102 = vrsqrt.f32 %v524_v54 }
 0x18b   : > { %v525_v58 = vadd.f32 1e-05, %v517_v56  ;;  %v526_v59 = vadd.f32 1e-05, %v518_v57 }
 0x18c   : > { %v511_v60 = vpop.xlane.xlu1 %510  ;;  %v1471_v61 = vpop.xlane.xlu0 %1470 }
 0x18d   : > { %3104 = vrsqrt.f32 %v525_v58  ;;  %v519_v62 = vmul.f32 0.03125, %v511_v60  ;;  %v1493_v63 = vmul.f32 0.03125, %v1471_v61 }
 0x18e   : > { %v3095_v3 = vpop.eup %3094  ;;  %3106 = vrsqrt.f32 %v526_v59 }
 0x18f   : > { %v527_v8 = vadd.f32 1e-05, %v519_v62  ;;  %v3795_v11 = vsub.f32 %v3736_v7, %v1493_v63  ;;  %v536_v12 = vmul.f32 %v3095_v3, %v3697_v31 }
 0x190   : > { %v1474_v13 = vpop.xlane.xlu1 %1473  ;;  %v1477_v19 = vpop.xlane.xlu0 %1476 }
 0x191   : > { %3108 = vrsqrt.f32 %v527_v8  ;;  %v1494_v22 = vmul.f32 0.03125, %v1474_v13  ;;  %v548_v23 = vmul.f32 %v3792_v4, %v536_v12  ;;  %v1495_v25 = vmul.f32 0.03125, %v1477_v19 }
 0x192   : > { %v3097_v26 = vpop.eup %3096  ;;  %v1509_v28 = vmul.f32 %v3795_v11, %v3795_v11 }
 0x193   : > { %v3099_v7 = vpop.eup %3098  ;;  %v3807_v29 = vsub.f32 %v3746_v15, %v1494_v22  ;;  %v560_v31 = vadd.f32 %v3801_v16, %v548_v23  ;;  %v3811_v33 = vsub.f32 %v3744_v14, %v1495_v25  ;;  %v537_v34 = vmul.f32 %v3097_v26, %v3707_v41 }
 0x194   : > { %v1480_v35 = vpop.xlane.xlu1 %1479  ;;  %v538_v36 = vmul.f32 %v3099_v7, %v3699_v32  ;;  %v1517_v37 = vsel %vm438_vm0, %v1509_v28, 0.0  ;;  %v1483_v38 = vpop.xlane.xlu0 %1482  ;;  %v1592_v7 = vld [vmem:[#allocation6 + $0x50] sm:$0xff] }
 0x195   : > { %2949 = vmatprep.mubr.msk.f32.mxu0 %vm438_vm0, %v560_v31  ;;  %v1496_v39 = vmul.f32 0.03125, %v1480_v35  ;;  %v549_v40 = vmul.f32 %v3792_v4, %v537_v34  ;;  %1518 = vadd.xlane.f32.xlu0 %v1517_v37  ;;  %v1497_v15 = vmul.f32 0.03125, %v1483_v38  ;;  %v1510_v43 = vmul.f32 %v3807_v29, %v3807_v29  ;;  %v1590_v31 = vld [vmem:[#allocation6 + $0x40] sm:$0xff] }
 0x196   : > { %v3101_v14 = vpop.eup %3100  ;;  %v550_v44 = vmul.f32 %v3792_v4, %v538_v36  ;;  %v1511_v41 = vmul.f32 %v3811_v33, %v3811_v33 }
 0x197   : > { %v3103_v32 = vpop.eup %3102  ;;  %v3824_v5 = vsub.f32 %v3751_v20, %v1496_v39  ;;  %v561_v45 = vadd.f32 %v3801_v16, %v549_v40  ;;  %v3828_v46 = vsub.f32 %v3753_v21, %v1497_v15  ;;  %v1520_v2 = vsel %vm438_vm0, %v1510_v43, 0.0 }
 0x198   : > { %v562_v47 = vadd.f32 %v3801_v16, %v550_v44  ;;  %1521 = vadd.xlane.f32.xlu1 %v1520_v2  ;;  %v1486_v6 = vpop.xlane.xlu1 %1485  ;;  %v539_v48 = vmul.f32 %v3101_v14, %v3709_v42  ;;  %v540_v49 = vmul.f32 %v3103_v32, %v3718_v52  ;;  %v1523_v9 = vsel %vm438_vm0, %v1511_v41, 0.0  ;;  %v1489_v50 = vpop.xlane.xlu0 %1488 }
 0x199   : > { %2950 = vmatmul.mubr.msk.f32.vlgmr.msra.gmra.mxu0 %vm438_vm0, %v561_v45  ;;  %v1498_v20 = vmul.f32 0.03125, %v1486_v6  ;;  %1524 = vadd.xlane.f32.xlu0 %v1523_v9  ;;  %v1512_v21 = vmul.f32 %v3824_v5, %v3824_v5  ;;  %v1499_v10 = vmul.f32 0.03125, %v1489_v50  ;;  %v1513_v51 = vmul.f32 %v3828_v46, %v3828_v46 }
 0x19a   : > { %v3105_v17 = vpop.eup %3104  ;;  %2952 = vmatprep.mubr.msk.f32.mxu0 %vm438_vm0, %v562_v47  ;;  %v551_v42 = vmul.f32 %v3792_v4, %v539_v48  ;;  %v552_v52 = vmul.f32 %v3792_v4, %v540_v49 }
 0x19b   : > { %v3107_v54 = vpop.eup %3106  ;;  %v3844_v55 = vsub.f32 %v3759_v24, %v1498_v20  ;;  %v1526_v18 = vsel %vm438_vm0, %v1512_v21, 0.0  ;;  %v541_v56 = vmul.f32 %v3105_v17, %v3720_v53  ;;  %v3849_v57 = vsub.f32 %v3765_v27, %v1499_v10  ;;  %v2867_v10 = vld [vmem:[%s5212_s3 + $0x4] ss:$0 sm:$0xff] }
 0x19c   : > { %v563_v58 = vadd.f32 %v3801_v16, %v551_v42  ;;  %v564_v59 = vadd.f32 %v3801_v16, %v552_v52  ;;  %1527 = vadd.xlane.f32.xlu1 %v1526_v18  ;;  %v1492_v60 = vpop.xlane.xlu1 %1491  ;;  %v542_v61 = vmul.f32 %v3107_v54, %v3730_v0  ;;  %v1529_v62 = vsel %vm438_vm0, %v1513_v51, 0.0  ;;  %v2868_v42 = vld [vmem:[%s5212_s3 + $0x5] ss:$0 sm:$0xff] }
 0x19d   : > { %v553_v24 = vmul.f32 %v3792_v4, %v541_v56  ;;  %v1500_v63 = vmul.f32 0.03125, %v1492_v60  ;;  %1530 = vadd.xlane.f32.xlu0 %v1529_v62  ;;  %v1514_v53 = vmul.f32 %v3844_v55, %v3844_v55  ;;  %v1515_v27 = vmul.f32 %v3849_v57, %v3849_v57 }
 0x19e   : > { %v3109_v3 = vpop.eup %3108  ;;  %2953 = vmatmul.mubr.msk.f32.gmra.mxu0 %vm438_vm0, %v563_v58  ;;  %v554_v8 = vmul.f32 %v3792_v4, %v542_v61 }
 0x19f   : > { %2955 = vmatprep.mubr.msk.f32.mxu0 %vm438_vm0, %v564_v59  ;;  %v565_v0 = vadd.f32 %v3801_v16, %v553_v24  ;;  %v3865_v12 = vsub.f32 %v3771_v30, %v1500_v63  ;;  %v1532_v13 = vsel %vm438_vm0, %v1514_v53, 0.0  ;;  %v543_v19 = vmul.f32 %v3109_v3, %v3732_v1  ;;  %v1593_v1 = vld [vmem:[#allocation6 + $0x58] sm:$0xff] }
 0x1a0   : > { %v566_v22 = vadd.f32 %v3801_v16, %v554_v8  ;;  %1533 = vadd.xlane.f32.xlu1 %v1532_v13  ;;  %v1535_v23 = vsel %vm438_vm0, %v1515_v27, 0.0  ;;  %2981 = vmatprep.subr.mxu0 %v1593_v1 }
 0x1a1   : > { %v555_v25 = vmul.f32 %v3792_v4, %v543_v19  ;;  %1536 = vadd.xlane.f32.xlu0 %v1535_v23  ;;  %v1516_v26 = vmul.f32 %v3865_v12, %v3865_v12  ;;  %2982 = vmatpush3.msra.mxu0 %v1593_v1  ;;  %v1591_v4 = vld [vmem:[#allocation6 + $0x48] sm:$0xff] }
 0x1a2   : > { %2956 = vmatmul.mubr.msk.f32.gmra.mxu0 %vm438_vm0, %v565_v0  ;;  %2983 = vmatprep.subr.mxu0 %v1592_v7 }
 0x1a3   : > { %2958 = vmatprep.mubr.msk.f32.mxu0 %vm438_vm0, %v566_v22  ;;  %v567_v30 = vadd.f32 %v3801_v16, %v555_v25  ;;  %v1538_v28 = vsel %vm438_vm0, %v1516_v26, 0.0  ;;  %2984 = vmatpush3.msra.mxu0 %v1592_v7 }
 0x1a4   : > { %1539 = vadd.xlane.f32.xlu1 %v1538_v28  ;;  %2985 = vmatprep.subr.mxu0 %v1591_v4 }
 0x1a5   : > { %2986 = vmatpush3.msra.mxu0 %v1591_v4 }
 0x1a6   : > { %2959 = vmatmul.mubr.msk.f32.gmra.mxu0 %vm438_vm0, %v567_v30  ;;  %2987 = vmatprep.subr.mxu0 %v1590_v31 }
 0x1a7   : > { %2988 = vmatpush3.msra.mxu0 %v1590_v31 }
 0x21e   : > { %v1519_v34 = vpop.xlane.xlu0 %1518 }
 0x21f   : > { %v1541_v35 = vmul.f32 0.03125, %v1519_v34 }
 0x221   : > { %v1549_v16 = vadd.f32 1e-05, %v1541_v35  ;;  %v1522_v36 = vpop.xlane.xlu1 %1521 }
 0x222   : > { %v1542_v37 = vmul.f32 0.03125, %v1522_v36  ;;  %v1525_v38 = vpop.xlane.xlu0 %1524 }
 0x223   : > { %3110 = vrsqrt.f32 %v1549_v16  ;;  %v1543_v39 = vmul.f32 0.03125, %v1525_v38 }
 0x224   : > { %v1550_v40 = vadd.f32 1e-05, %v1542_v37 }
 0x225   : > { %v1551_v15 = vadd.f32 1e-05, %v1543_v39  ;;  %v1528_v43 = vpop.xlane.xlu1 %1527 }
 0x226   : > { %3112 = vrsqrt.f32 %v1550_v40  ;;  %v1544_v14 = vmul.f32 0.03125, %v1528_v43  ;;  %v1531_v44 = vpop.xlane.xlu0 %1530 }
 0x227   : > { %3114 = vrsqrt.f32 %v1551_v15  ;;  %v1545_v41 = vmul.f32 0.03125, %v1531_v44 }
 0x228   : > { %v1552_v32 = vadd.f32 1e-05, %v1544_v14 }
 0x229   : > { %v1553_v45 = vadd.f32 1e-05, %v1545_v41  ;;  %v1534_v2 = vpop.xlane.xlu1 %1533 }
 0x22a   : > { %3116 = vrsqrt.f32 %v1552_v32  ;;  %v1546_v47 = vmul.f32 0.03125, %v1534_v2  ;;  %v1537_v6 = vpop.xlane.xlu0 %1536 }
 0x22b   : > { %3118 = vrsqrt.f32 %v1553_v45  ;;  %v1547_v48 = vmul.f32 0.03125, %v1537_v6 }
 0x22c   : > { %v1554_v49 = vadd.f32 1e-05, %v1546_v47 }
 0x22d   : > { %v1555_v9 = vadd.f32 1e-05, %v1547_v48  ;;  %v1540_v50 = vpop.xlane.xlu1 %1539 }
 0x22e   : > { %3120 = vrsqrt.f32 %v1554_v49  ;;  %v1548_v20 = vmul.f32 0.03125, %v1540_v50 }
 0x22f   : > { %3122 = vrsqrt.f32 %v1555_v9 }
 0x230   : > { %v3111_v21 = vpop.eup %3110  ;;  %v1556_v51 = vadd.f32 1e-05, %v1548_v20 }
 0x231   : > { %v1565_v17 = vmul.f32 %v3111_v21, %v3795_v11 }
 0x232   : > { %3124 = vrsqrt.f32 %v1556_v51 }
 0x233   : > { %v3113_v52 = vpop.eup %3112  ;;  %v1573_v54 = vmul.f32 %v2867_v10, %v1565_v17 }
 0x234   : > { %v3115_v18 = vpop.eup %3114  ;;  %v1566_v56 = vmul.f32 %v3113_v52, %v3807_v29 }
 0x235   : > { %v1581_v58 = vadd.f32 %v2868_v42, %v1573_v54  ;;  %v1567_v59 = vmul.f32 %v3115_v18, %v3811_v33 }
 0x236   : > { %v1574_v60 = vmul.f32 %v2867_v10, %v1566_v56 }
 0x237   : > { %v3117_v61 = vpop.eup %3116  ;;  %2989 = vmatprep.mubr.msk.f32.mxu0 %vm438_vm0, %v1581_v58  ;;  %v1575_v62 = vmul.f32 %v2867_v10, %v1567_v59 }
 0x238   : > { %v3119_v24 = vpop.eup %3118  ;;  %v1582_v11 = vadd.f32 %v2868_v42, %v1574_v60  ;;  %v1568_v63 = vmul.f32 %v3117_v61, %v3824_v5 }
 0x239   : > { %v1583_v53 = vadd.f32 %v2868_v42, %v1575_v62  ;;  %v1569_v27 = vmul.f32 %v3119_v24, %v3828_v46 }
 0x23a   : > { %2990 = vmatmul.mubr.msk.f32.vlgmr.msra.gmra.mxu0 %vm438_vm0, %v1582_v11  ;;  %v1576_v3 = vmul.f32 %v2867_v10, %v1568_v63 }
 0x23b   : > { %v3121_v8 = vpop.eup %3120  ;;  %2992 = vmatprep.mubr.msk.f32.mxu0 %vm438_vm0, %v1583_v53  ;;  %v1577_v29 = vmul.f32 %v2867_v10, %v1569_v27 }
 0x23c   : > { %v3123_v33 = vpop.eup %3122  ;;  %v1584_v0 = vadd.f32 %v2868_v42, %v1576_v3  ;;  %v1570_v13 = vmul.f32 %v3121_v8, %v3844_v55 }
 0x23d   : > { %v1585_v19 = vadd.f32 %v2868_v42, %v1577_v29  ;;  %v1571_v22 = vmul.f32 %v3123_v33, %v3849_v57  ;;  %v3901_v57 = vpop.f32.mrf.mxu1 }
 0x23e   : > { %2993 = vmatmul.mubr.msk.f32.gmra.mxu0 %vm438_vm0, %v1584_v0  ;;  %v1578_v5 = vmul.f32 %v2867_v10, %v1570_v13  ;;  %v1155_v44 = vsel %vm438_vm0, %v3901_v57, 0.0 }
 0x23f   : > { %v3125_v23 = vpop.eup %3124  ;;  %2995 = vmatprep.mubr.msk.f32.mxu0 %vm438_vm0, %v1585_v19  ;;  %v1579_v46 = vmul.f32 %v2867_v10, %v1571_v22  ;;  %v3904_v4 = vpop.f32.mrf.mxu1 }
 0x240   : > { %v1586_v25 = vadd.f32 %v2868_v42, %v1578_v5  ;;  %v1572_v26 = vmul.f32 %v3125_v23, %v3865_v12  ;;  %v1152_v20 = vsel %vm438_vm0, %v3904_v4, 0.0 }
 0x241   : > { %v1587_v30 = vadd.f32 %v2868_v42, %v1579_v46  ;;  %v3908_v34 = vpop.f32.mrf.mxu1 }
 0x242   : > { %2996 = vmatmul.mubr.msk.f32.gmra.mxu0 %vm438_vm0, %v1586_v25  ;;  %v1580_v28 = vmul.f32 %v2867_v10, %v1572_v26  ;;  %v1161_v6 = vsel %vm438_vm0, %v3908_v34, 0.0 }
 0x243   : > { %2998 = vmatprep.mubr.msk.f32.mxu0 %vm438_vm0, %v1587_v30  ;;  %v3911_v37 = vpop.f32.mrf.mxu1 }
 0x244   : > { %v1588_v55 = vadd.f32 %v2868_v42, %v1580_v28  ;;  %v1158_v45 = vsel %vm438_vm0, %v3911_v37, 0.0 }
 0x245   : > { %v3919_v43 = vpop.f32.mrf.mxu1 }
 0x246   : > { %2999 = vmatmul.mubr.msk.f32.gmra.mxu0 %vm438_vm0, %v1588_v55  ;;  %v1167_v48 = vsel %vm438_vm0, %v3919_v43, 0.0 }
 0x247   : > { %v3924_v32 = vpop.f32.mrf.mxu1 }
 0x248   : > { %v1164_v51 = vsel %vm438_vm0, %v3924_v32, 0.0 }
 0x249   : > { %v3930_v47 = vpop.f32.mrf.mxu1 }
 0x24a   : > { %v1173_v21 = vsel %vm438_vm0, %v3930_v47, 0.0 }
 0x24b   : > { %v3936_v49 = vpop.f32.mrf.mxu1 }
 0x24c   : > { %v1170_v50 = vsel %vm438_vm0, %v3936_v49, 0.0 }
 0x259   : > { %v2951_v1 = vpop.f32.mrf.mxu0 }
 0x25a   : > { %v704_v7 = vsel %vm438_vm0, %v2951_v1, 0.0 }
 0x25b   : > { %705 = vadd.xlane.f32.xlu1 %v704_v7  ;;  %v3906_v31 = vpop.f32.mrf.mxu0 }
 0x25c   : > { %v701_v9 = vsel %vm438_vm0, %v3906_v31, 0.0 }
 0x25e   : > { %v2954_v12 = vpop.f32.mrf.mxu0 }
 0x25f   : > { %v710_v40 = vsel %vm438_vm0, %v2954_v12, 0.0 }
 0x260   : > { %v672_v35 = vpop.f32.mrf.mxu0 }
 0x261   : > { %v707_v16 = vsel %vm438_vm0, %v672_v35, 0.0 }
 0x262   : > { %708 = vadd.xlane.f32.xlu1 %v707_v16  ;;  %v2957_v36 = vpop.f32.mrf.mxu0 }
 0x263   : > { %v716_v38 = vsel %vm438_vm0, %v2957_v36, 0.0 }
 0x264   : > { %v3914_v39 = vpop.f32.mrf.mxu0  ;;  %717 = vadd.xlane.f32.xlu0 %v716_v38 }
 0x265   : > { %v713_v10 = vsel %vm438_vm0, %v3914_v39, 0.0 }
 0x266   : > { %711 = vadd.xlane.f32.xlu1 %v710_v40  ;;  %v3917_v15 = vpop.f32.mrf.mxu0 }
 0x267   : > { %v722_v2 = vsel %vm438_vm0, %v3917_v15, 0.0 }
 0x268   : > { %v692_v14 = vpop.f32.mrf.mxu0 }
 0x269   : > { %v719_v41 = vsel %vm438_vm0, %v692_v14, 0.0 }
 0x26a   : > { %1156 = vadd.xlane.f32.xlu1 %v1155_v44  ;;  %720 = vadd.xlane.f32.xlu0 %v719_v41 }
 0x26e   : > { %1159 = vadd.xlane.f32.xlu1 %v1158_v45  ;;  %723 = vadd.xlane.f32.xlu0 %v722_v2 }
 0x272   : > { %1162 = vadd.xlane.f32.xlu1 %v1161_v6  ;;  %1168 = vadd.xlane.f32.xlu0 %v1167_v48 }
 0x276   : > { %702 = vadd.xlane.f32.xlu1 %v701_v9  ;;  %1171 = vadd.xlane.f32.xlu0 %v1170_v50 }
 0x27a   : > { %1153 = vadd.xlane.f32.xlu1 %v1152_v20  ;;  %1174 = vadd.xlane.f32.xlu0 %v1173_v21 }
 0x27e   : > { %714 = vadd.xlane.f32.xlu0 %v713_v10 }
 0x282   : > { %1165 = vadd.xlane.f32.xlu0 %v1164_v51 }
 0x2e4   : > { %v706_v17 = vpop.xlane.xlu1 %705 }
 0x2e5   : > { %v726_v42 = vmul.f32 0.03125, %v706_v17 }
 0x2e7   : > { %v3950_v52 = vsub.f32 %v2951_v1, %v726_v42 }
 0x2e9   : > { %v742_v54 = vmul.f32 %v3950_v52, %v3950_v52 }
 0x2eb   : > { %v709_v18 = vpop.xlane.xlu1 %708  ;;  %v752_v56 = vsel %vm438_vm0, %v742_v54, 0.0 }
 0x2ec   : > { %v727_v58 = vmul.f32 0.03125, %v709_v18  ;;  %753 = vadd.xlane.f32.xlu1 %v752_v56 }
 0x2ed   : > { %v718_v59 = vpop.xlane.xlu0 %717 }
 0x2ee   : > { %v3955_v60 = vsub.f32 %v672_v35, %v727_v58  ;;  %v730_v61 = vmul.f32 0.03125, %v718_v59 }
 0x2ef   : > { %v712_v62 = vpop.xlane.xlu1 %711 }
 0x2f0   : > { %v3957_v24 = vsub.f32 %v2957_v36, %v730_v61  ;;  %v728_v11 = vmul.f32 0.03125, %v712_v62  ;;  %v743_v63 = vmul.f32 %v3955_v60, %v3955_v60 }
 0x2f2   : > { %v3961_v53 = vsub.f32 %v2954_v12, %v728_v11  ;;  %v755_v27 = vsel %vm438_vm0, %v743_v63, 0.0  ;;  %v746_v3 = vmul.f32 %v3957_v24, %v3957_v24 }
 0x2f3   : > { %756 = vadd.xlane.f32.xlu1 %v755_v27  ;;  %v1157_v8 = vpop.xlane.xlu1 %1156  ;;  %v721_v29 = vpop.xlane.xlu0 %720 }
 0x2f4   : > { %v1177_v33 = vmul.f32 0.03125, %v1157_v8  ;;  %v731_v0 = vmul.f32 0.03125, %v721_v29  ;;  %v764_v13 = vsel %vm438_vm0, %v746_v3, 0.0  ;;  %v744_v19 = vmul.f32 %v3961_v53, %v3961_v53 }
 0x2f5   : > { %765 = vadd.xlane.f32.xlu0 %v764_v13 }
 0x2f6   : > { %v3970_v22 = vsub.f32 %v3901_v57, %v1177_v33  ;;  %v3972_v5 = vsub.f32 %v692_v14, %v731_v0  ;;  %v758_v23 = vsel %vm438_vm0, %v744_v19, 0.0 }
 0x2f7   : > { %759 = vadd.xlane.f32.xlu1 %v758_v23  ;;  %v1160_v46 = vpop.xlane.xlu1 %1159  ;;  %v724_v25 = vpop.xlane.xlu0 %723 }
 0x2f8   : > { %v1178_v26 = vmul.f32 0.03125, %v1160_v46  ;;  %v732_v30 = vmul.f32 0.03125, %v724_v25  ;;  %v1193_v28 = vmul.f32 %v3970_v22, %v3970_v22  ;;  %v747_v55 = vmul.f32 %v3972_v5, %v3972_v5 }
 0x2fa   : > { %v3980_v1 = vsub.f32 %v3911_v37, %v1178_v26  ;;  %v3983_v57 = vsub.f32 %v3917_v15, %v732_v30  ;;  %v1203_v7 = vsel %vm438_vm0, %v1193_v28, 0.0  ;;  %v767_v12 = vsel %vm438_vm0, %v747_v55, 0.0  ;;  %v4015_v18 = vpop.f32.mrf.mxu0 }
 0x2fb   : > { %1204 = vadd.xlane.f32.xlu1 %v1203_v7  ;;  %v1163_v35 = vpop.xlane.xlu1 %1162  ;;  %768 = vadd.xlane.f32.xlu0 %v767_v12  ;;  %v1169_v16 = vpop.xlane.xlu0 %1168 }
 0x2fc   : > { %v1179_v36 = vmul.f32 0.03125, %v1163_v35  ;;  %v1181_v38 = vmul.f32 0.03125, %v1169_v16  ;;  %v1194_v40 = vmul.f32 %v3980_v1, %v3980_v1  ;;  %v748_v37 = vmul.f32 %v3983_v57, %v3983_v57  ;;  %v4029_v27 = vpop.f32.mrf.mxu0 }
 0x2fe   : > { %v3992_v14 = vsub.f32 %v3908_v34, %v1179_v36  ;;  %v3995_v15 = vsub.f32 %v3919_v43, %v1181_v38  ;;  %v1206_v44 = vsel %vm438_vm0, %v1194_v40, 0.0  ;;  %v770_v41 = vsel %vm438_vm0, %v748_v37, 0.0  ;;  %v4038_v0 = vpop.f32.mrf.mxu0 }
 0x2ff   : > { %1207 = vadd.xlane.f32.xlu1 %v1206_v44  ;;  %v703_v45 = vpop.xlane.xlu1 %702  ;;  %771 = vadd.xlane.f32.xlu0 %v770_v41  ;;  %v1172_v2 = vpop.xlane.xlu0 %1171 }
 0x300   : > { %v725_v6 = vmul.f32 0.03125, %v703_v45  ;;  %v1182_v48 = vmul.f32 0.03125, %v1172_v2  ;;  %v1195_v9 = vmul.f32 %v3992_v14, %v3992_v14  ;;  %v1197_v34 = vmul.f32 %v3995_v15, %v3995_v15  ;;  %v4046_v23 = vpop.f32.mrf.mxu0 }
 0x302   : > { %v4004_v50 = vsub.f32 %v3906_v31, %v725_v6  ;;  %v4007_v43 = vsub.f32 %v3936_v49, %v1182_v48  ;;  %v1209_v20 = vsel %vm438_vm0, %v1195_v9, 0.0  ;;  %v1215_v21 = vsel %vm438_vm0, %v1197_v34, 0.0  ;;  %v4049_v25 = vpop.f32.mrf.mxu0 }
 0x303   : > { %1210 = vadd.xlane.f32.xlu1 %v1209_v20  ;;  %v1154_v10 = vpop.xlane.xlu1 %1153  ;;  %1216 = vadd.xlane.f32.xlu0 %v1215_v21  ;;  %v1175_v51 = vpop.xlane.xlu0 %1174  ;;  %v1738_v26 = vsel %vm438_vm0, %v4049_v25, 0.0 }
 0x304   : > { %v1176_v17 = vmul.f32 0.03125, %v1154_v10  ;;  %v1183_v42 = vmul.f32 0.03125, %v1175_v51  ;;  %v741_v54 = vmul.f32 %v4004_v50, %v4004_v50  ;;  %v1198_v31 = vmul.f32 %v4007_v43, %v4007_v43 }
 0x306   : > { %v4018_v49 = vsub.f32 %v3904_v4, %v1176_v17  ;;  %v4021_v56 = vsub.f32 %v3930_v47, %v1183_v42  ;;  %v749_v58 = vsel %vm438_vm0, %v741_v54, 0.0  ;;  %v1218_v59 = vsel %vm438_vm0, %v1198_v31, 0.0 }
 0x307   : > { %750 = vadd.xlane.f32.xlu1 %v749_v58  ;;  %1219 = vadd.xlane.f32.xlu0 %v1218_v59  ;;  %v715_v61 = vpop.xlane.xlu0 %714 }
 0x308   : > { %v729_v62 = vmul.f32 0.03125, %v715_v61  ;;  %v1192_v11 = vmul.f32 %v4018_v49, %v4018_v49  ;;  %v1199_v63 = vmul.f32 %v4021_v56, %v4021_v56 }
 0x30a   : > { %v4032_v4 = vsub.f32 %v3914_v39, %v729_v62  ;;  %v1200_v47 = vsel %vm438_vm0, %v1192_v11, 0.0  ;;  %v1221_v3 = vsel %vm438_vm0, %v1199_v63, 0.0 }
 0x30b   : > { %1201 = vadd.xlane.f32.xlu1 %v1200_v47  ;;  %1222 = vadd.xlane.f32.xlu0 %v1221_v3  ;;  %v1166_v8 = vpop.xlane.xlu0 %1165 }
 0x30c   : > { %v1180_v29 = vmul.f32 0.03125, %v1166_v8  ;;  %v745_v33 = vmul.f32 %v4032_v4, %v4032_v4 }
 0x30e   : > { %v4041_v13 = vsub.f32 %v3924_v32, %v1180_v29  ;;  %v761_v19 = vsel %vm438_vm0, %v745_v33, 0.0 }
 0x30f   : > { %762 = vadd.xlane.f32.xlu0 %v761_v19 }
 0x310   : > { %v1196_v39 = vmul.f32 %v4041_v13, %v4041_v13 }
 0x312   : > { %v1212_v46 = vsel %vm438_vm0, %v1196_v39, 0.0 }
 0x313   : > { %1213 = vadd.xlane.f32.xlu0 %v1212_v46 }
 0x317   : > { %1739 = vadd.xlane.f32.xlu0 %v1738_v26 }
 0x375   : > { %v754_v30 = vpop.xlane.xlu1 %753 }
 0x376   : > { %v774_v7 = vmul.f32 0.03125, %v754_v30 }
 0x378   : > { %v782_v38 = vadd.f32 1e-05, %v774_v7  ;;  %v4059_v7 = vld [vmem:[%s5212_s3 + $0x2] ss:$0 sm:$0xff] }
 0x37c   : > { %v757_v32 = vpop.xlane.xlu1 %756 }
 0x37d   : > { %v775_v48 = vmul.f32 0.03125, %v757_v32 }
 0x37e   : > { %v766_v28 = vpop.xlane.xlu0 %765 }
 0x37f   : > { %v778_v12 = vmul.f32 0.03125, %v766_v28  ;;  %v783_v17 = vadd.f32 1e-05, %v775_v48 }
 0x380   : > { %v760_v55 = vpop.xlane.xlu1 %759 }
 0x381   : > { %v786_v40 = vadd.f32 1e-05, %v778_v12  ;;  %v776_v37 = vmul.f32 0.03125, %v760_v55 }
 0x383   : > { %v784_v9 = vadd.f32 1e-05, %v776_v37 }
 0x384   : > { %v1205_v35 = vpop.xlane.xlu1 %1204  ;;  %v769_v16 = vpop.xlane.xlu0 %768 }
 0x385   : > { %v1225_v36 = vmul.f32 0.03125, %v1205_v35  ;;  %v779_v21 = vmul.f32 0.03125, %v769_v16 }
 0x387   : > { %v1233_v44 = vadd.f32 1e-05, %v1225_v36  ;;  %v787_v58 = vadd.f32 1e-05, %v779_v21 }
 0x388   : > { %v1208_v41 = vpop.xlane.xlu1 %1207  ;;  %v772_v45 = vpop.xlane.xlu0 %771 }
 0x389   : > { %3126 = vrsqrt.f32 %v1233_v44  ;;  %v1226_v2 = vmul.f32 0.03125, %v1208_v41  ;;  %v780_v6 = vmul.f32 0.03125, %v772_v45  ;;  %v4068_v41 = vld [vmem:[%s5212_s3 + $0x3] ss:$0 sm:$0xff] }
 0x38a   : > { %3128 = vrsqrt.f32 %v782_v38 }
 0x38b   : > { %3130 = vrsqrt.f32 %v786_v40  ;;  %v1234_v34 = vadd.f32 1e-05, %v1226_v2  ;;  %v788_v10 = vadd.f32 1e-05, %v780_v6 }
 0x38c   : > { %v1217_v20 = vpop.xlane.xlu0 %1216  ;;  %3132 = vrsqrt.f32 %v784_v9  ;;  %v1211_v54 = vpop.xlane.xlu1 %1210 }
 0x38d   : > { %v1229_v51 = vmul.f32 0.03125, %v1217_v20  ;;  %3134 = vrsqrt.f32 %v1234_v34  ;;  %v1227_v55 = vmul.f32 0.03125, %v1211_v54 }
 0x38e   : > { %3136 = vrsqrt.f32 %v788_v10 }
 0x38f   : > { %v1237_v42 = vadd.f32 1e-05, %v1229_v51  ;;  %v1235_v44 = vadd.f32 1e-05, %v1227_v55 }
 0x390   : > { %v1220_v31 = vpop.xlane.xlu0 %1219  ;;  %v751_v47 = vpop.xlane.xlu1 %750 }
 0x391   : > { %v1230_v59 = vmul.f32 0.03125, %v1220_v31  ;;  %3138 = vrsqrt.f32 %v1237_v42  ;;  %v773_v19 = vmul.f32 0.03125, %v751_v47 }
 0x392   : > { %3140 = vrsqrt.f32 %v783_v17 }
 0x393   : > { %v1238_v61 = vadd.f32 1e-05, %v1230_v59  ;;  %3142 = vrsqrt.f32 %v787_v58  ;;  %v781_v35 = vadd.f32 1e-05, %v773_v19 }
 0x394   : > { %v1223_v62 = vpop.xlane.xlu0 %1222 }
 0x395   : > { %v1231_v11 = vmul.f32 0.03125, %v1223_v62  ;;  %3144 = vrsqrt.f32 %v1238_v61  ;;  %v4087_v61 = vld [vmem:[%s5210_s1 + $0x1] ss:$0 sm:$0xff] }
 0x396   : > { %v3127_v63 = vpop.eup %3126 }
 0x397   : > { %v3129_v3 = vpop.eup %3128  ;;  %v1239_v8 = vadd.f32 1e-05, %v1231_v11  ;;  %v1249_v46 = vmul.f32 %v3127_v63, %v3970_v22 }
 0x398   : > { %v3131_v29 = vpop.eup %3130  ;;  %v763_v33 = vpop.xlane.xlu0 %762  ;;  %v798_v26 = vmul.f32 %v3129_v3, %v3950_v52 }
 0x399   : > { %v777_v39 = vmul.f32 0.03125, %v763_v33  ;;  %3146 = vrsqrt.f32 %v1239_v8  ;;  %v802_v30 = vmul.f32 %v3131_v29, %v3957_v24  ;;  %v3133_v28 = vpop.eup %3132  ;;  %v1257_v16 = vmul.f32 %v4059_v7, %v1249_v46  ;;  %v4091_v3 = vpop.f32.mrf.mxu0 }
 0x39a   : > { %v3135_v12 = vpop.eup %3134  ;;  %v810_v52 = vmul.f32 %v4059_v7, %v798_v26  ;;  %v800_v37 = vmul.f32 %v3133_v28, %v3961_v53 }
 0x39b   : > { %v785_v32 = vadd.f32 1e-05, %v777_v39  ;;  %v3137_v36 = vpop.eup %3136  ;;  %v814_v24 = vmul.f32 %v4059_v7, %v802_v30  ;;  %v1265_v6 = vadd.f32 %v4068_v41, %v1257_v16  ;;  %v1250_v48 = vmul.f32 %v3135_v12, %v3980_v1 }
 0x39c   : > { %v1214_v38 = vpop.xlane.xlu0 %1213  ;;  %v804_v2 = vmul.f32 %v3137_v36, %v3983_v57  ;;  %v822_v10 = vadd.f32 %v4068_v41, %v810_v52  ;;  %v812_v42 = vmul.f32 %v4059_v7, %v800_v37 }
 0x39d   : > { %3148 = vrsqrt.f32 %v785_v32  ;;  %v1228_v34 = vmul.f32 0.03125, %v1214_v38  ;;  %v826_v51 = vadd.f32 %v4068_v41, %v814_v24  ;;  %v1273_v54 = vmax.f32 %v1265_v6, 0.0  ;;  %v4105_v32 = vpop.f32.mrf.mxu0 }
 0x39e   : > { %v3139_v22 = vpop.eup %3138  ;;  %3150 = vrsqrt.f32 %v781_v35  ;;  %v1258_v31 = vmul.f32 %v4059_v7, %v1250_v48  ;;  %v816_v58 = vmul.f32 %v4059_v7, %v804_v2  ;;  %v831_v63 = vmul.f32 1.442695, %v822_v10 }
 0x39f   : > { %v3141_v40 = vpop.eup %3140  ;;  %v1253_v45 = vmul.f32 %v3139_v22, %v3995_v15  ;;  %3152 = vrsqrt.f32 %v1235_v44  ;;  %v1202_v15 = vpop.xlane.xlu1 %1201  ;;  %v839_v47 = vmul.f32 1.442695, %v826_v51  ;;  %v824_v19 = vadd.f32 %v4068_v41, %v812_v42 }
 0x3a0   : > { %v3143_v9 = vpop.eup %3142  ;;  %v799_v21 = vmul.f32 %v3141_v40, %v3955_v60  ;;  %v1236_v60 = vadd.f32 1e-05, %v1228_v34  ;;  %v4100_v39 = vadd.f32 %v4087_v61, %v1273_v54  ;;  %v1266_v46 = vadd.f32 %v4068_v41, %v1258_v31  ;;  %v4118_v44 = vpop.f32.mrf.mxu0 }
 0x3a1   : > { %v1261_v20 = vmul.f32 %v4059_v7, %v1253_v45  ;;  %v803_v1 = vmul.f32 %v3143_v9, %v3972_v5  ;;  %v828_v26 = vadd.f32 %v4068_v41, %v816_v58  ;;  %v835_v38 = vmul.f32 1.442695, %v824_v19 }
 0x3a2   : > { %v3145_v53 = vpop.eup %3144  ;;  %v811_v5 = vmul.f32 %v4059_v7, %v799_v21  ;;  %3154 = vrsqrt.f32 %v1236_v60  ;;  %v1296_v52 = vsel %vm438_vm0, %v4100_v39, 0.0  ;;  %v1274_v24 = vmax.f32 %v1266_v46, 0.0 }
 0x3a3   : > { %v1269_v57 = vadd.f32 %v4068_v41, %v1261_v20  ;;  %v1254_v17 = vmul.f32 %v3145_v53, %v4007_v43  ;;  %v1224_v43 = vmul.f32 0.03125, %v1202_v15  ;;  %v815_v30 = vmul.f32 %v4059_v7, %v803_v1 }
 0x3a4   : > { %3156 = vpow2.f32 %v831_v63  ;;  %v823_v35 = vadd.f32 %v4068_v41, %v811_v5  ;;  %v843_v48 = vmul.f32 1.442695, %v828_v26  ;;  %v1726_v9 = vsel %vm438_vm0, %v4015_v18, 0.0 }
 0x3a5   : > { %v1277_v59 = vmax.f32 %v1269_v57, 0.0  ;;  %v1262_v62 = vmul.f32 %v4059_v7, %v1254_v17  ;;  %v1232_v16 = vadd.f32 1e-05, %v1224_v43  ;;  %3158 = vpow2.f32 %v839_v47 }
 0x3a6   : > { %v3147_v11 = vpop.eup %3146  ;;  %v827_v40 = vadd.f32 %v4068_v41, %v815_v30  ;;  %v833_v34 = vmul.f32 1.442695, %v823_v35  ;;  %v1741_v21 = vsel %vm438_vm0, %v4118_v44, 0.0  ;;  %v4129_v10 = vadd.f32 %v4087_v61, %v1274_v24 }
 0x3a7   : > { %v4094_v8 = vadd.f32 %v4087_v61, %v1277_v59  ;;  %v1270_v29 = vadd.f32 %v4068_v41, %v1262_v62  ;;  %v1255_v33 = vmul.f32 %v3147_v11, %v4021_v56  ;;  %3160 = vrsqrt.f32 %v1232_v16 }
 0x3a8   : > { %3162 = vpow2.f32 %v835_v38  ;;  %v1299_v57 = vsel %vm438_vm0, %v4129_v10, 0.0  ;;  %v1729_v58 = vsel %vm438_vm0, %v4046_v23, 0.0  ;;  %v1744_v59 = vsel %vm438_vm0, %v4105_v32, 0.0 }
 0x3a9   : > { %v1308_v28 = vsel %vm438_vm0, %v4094_v8, 0.0  ;;  %v1278_v55 = vmax.f32 %v1270_v29, 0.0  ;;  %v1263_v56 = vmul.f32 %v4059_v7, %v1255_v33  ;;  %3164 = vpow2.f32 %v843_v48 }
 0x3aa   : > { %v3149_v12 = vpop.eup %3148  ;;  %1309 = vadd.xlane.f32.xlu1 %v1308_v28  ;;  %3166 = vpow2.f32 %v833_v34  ;;  %v1732_v24 = vsel %vm438_vm0, %v4038_v0, 0.0 }
 0x3ab   : > { %v4112_v36 = vadd.f32 %v4087_v61, %v1278_v55  ;;  %v1271_v22 = vadd.f32 %v4068_v41, %v1263_v56  ;;  %v3151_v37 = vpop.eup %3150  ;;  %v801_v45 = vmul.f32 %v3149_v12, %v4032_v4  ;;  %v841_v4 = vmul.f32 1.442695, %v827_v40 }
 0x3ac   : > { %v3153_v20 = vpop.eup %3152  ;;  %v797_v53 = vmul.f32 %v3151_v37, %v4004_v50 }
 0x3ad   : > { %v1311_v2 = vsel %vm438_vm0, %v4112_v36, 0.0  ;;  %v1279_v6 = vmax.f32 %v1271_v22, 0.0  ;;  %v813_v15 = vmul.f32 %v4059_v7, %v801_v45  ;;  %3168 = vpow2.f32 %v841_v4 }
 0x3ae   : > { %1297 = vadd.xlane.f32.xlu1 %v1296_v52  ;;  %1312 = vadd.xlane.f32.xlu0 %v1311_v2  ;;  %v1251_v50 = vmul.f32 %v3153_v20, %v3992_v14  ;;  %v809_v1 = vmul.f32 %v4059_v7, %v797_v53  ;;  %v1735_v4 = vsel %vm438_vm0, %v4091_v3, 0.0 }
 0x3af   : > { %v4132_v51 = vadd.f32 %v4087_v61, %v1279_v6  ;;  %v825_v42 = vadd.f32 %v4068_v41, %v813_v15  ;;  %v3155_v54 = vpop.eup %3154  ;;  %v1740_v6 = vpop.xlane.xlu0 %1739 }
 0x3b0   : > { %v1259_v14 = vmul.f32 %v4059_v7, %v1251_v50  ;;  %v1252_v11 = vmul.f32 %v3155_v54, %v4041_v13  ;;  %v821_v43 = vadd.f32 %v4068_v41, %v809_v1  ;;  %v1752_v48 = vmul.f32 0.03125, %v1740_v6 }
 0x3b1   : > { %v1314_v17 = vsel %vm438_vm0, %v4132_v51, 0.0  ;;  %v4142_v31 = vpop.eup %3156  ;;  %v837_v62 = vmul.f32 1.442695, %v825_v42 }
 0x3b2   : > { %1727 = vadd.xlane.f32.xlu1 %v1726_v9  ;;  %1742 = vadd.xlane.f32.xlu0 %v1741_v21  ;;  %v4147_v60 = vpop.eup %3158  ;;  %v848_v47 = vsel %vm438_vm0, %v4142_v31, 0.0  ;;  %v1267_v5 = vadd.f32 %v4068_v41, %v1259_v14  ;;  %v1260_v19 = vmul.f32 %v4059_v7, %v1252_v11  ;;  %v829_v46 = vmul.f32 1.442695, %v821_v43 }
 0x3b3   : > { %v860_v33 = vsel %vm438_vm0, %v4147_v60, 0.0  ;;  %3170 = vpow2.f32 %v837_v62  ;;  %v4198_v21 = vsub.f32 %v4049_v25, %v1752_v48 }
 0x3b4   : > { %v3161_v63 = vpop.eup %3160  ;;  %v1275_v30 = vmax.f32 %v1267_v5, 0.0  ;;  %v1268_v35 = vadd.f32 %v4068_v41, %v1260_v19  ;;  %3172 = vpow2.f32 %v829_v46 }
 0x3b5   : > { %v4156_v29 = vpop.eup %3162  ;;  %v1248_v28 = vmul.f32 %v3161_v63, %v4018_v49  ;;  %v1768_v25 = vmul.f32 %v4198_v21, %v4198_v21 }
 0x3b6   : > { %1300 = vadd.xlane.f32.xlu1 %v1299_v57  ;;  %1315 = vadd.xlane.f32.xlu0 %v1314_v17  ;;  %v4161_v13 = vpop.eup %3164  ;;  %v854_v56 = vsel %vm438_vm0, %v4156_v29, 0.0  ;;  %v4178_v49 = vadd.f32 %v4087_v61, %v1275_v30  ;;  %v1276_v38 = vmax.f32 %v1268_v35, 0.0  ;;  %v1723_v17 = vsel %vm438_vm0, %v4029_v27, 0.0 }
 0x3b7   : > { %v4163_v26 = vpop.eup %3166  ;;  %v866_v12 = vsel %vm438_vm0, %v4161_v13, 0.0  ;;  %v1256_v52 = vmul.f32 %v4059_v7, %v1248_v28  ;;  %v1786_v42 = vsel %vm438_vm0, %v1768_v25, 0.0 }
 0x3b8   : > { %v851_v16 = vsel %vm438_vm0, %v4163_v26, 0.0  ;;  %v1302_v40 = vsel %vm438_vm0, %v4178_v49, 0.0  ;;  %v4186_v37 = vadd.f32 %v4087_v61, %v1276_v38 }
 0x3b9   : > { %v1264_v45 = vadd.f32 %v4068_v41, %v1256_v52 }
 0x3ba   : > { %1730 = vadd.xlane.f32.xlu1 %v1729_v58  ;;  %1745 = vadd.xlane.f32.xlu0 %v1744_v59  ;;  %v4166_v55 = vpop.eup %3168  ;;  %v1305_v34 = vsel %vm438_vm0, %v4186_v37, 0.0 }
 0x3bb   : > { %v863_v22 = vsel %vm438_vm0, %v4166_v55, 0.0  ;;  %v1272_v20 = vmax.f32 %v1264_v45, 0.0 }
 0x3bd   : > { %v4205_v50 = vadd.f32 %v4087_v61, %v1272_v20 }
 0x3be   : > { %849 = vadd.xlane.f32.xlu1 %v848_v47  ;;  %861 = vadd.xlane.f32.xlu0 %v860_v33 }
 0x3bf   : > { %v1293_v57 = vsel %vm438_vm0, %v4205_v50, 0.0 }
 0x3c0   : > { %v4189_v2 = vpop.eup %3170 }
 0x3c1   : > { %v857_v9 = vsel %vm438_vm0, %v4189_v2, 0.0  ;;  %v4195_v53 = vpop.eup %3172 }
 0x3c2   : > { %855 = vadd.xlane.f32.xlu1 %v854_v56  ;;  %867 = vadd.xlane.f32.xlu0 %v866_v12  ;;  %v845_v15 = vsel %vm438_vm0, %v4195_v53, 0.0 }
 0x3c6   : > { %852 = vadd.xlane.f32.xlu1 %v851_v16  ;;  %864 = vadd.xlane.f32.xlu0 %v863_v22 }
 0x3ca   : > { %1733 = vadd.xlane.f32.xlu1 %v1732_v24  ;;  %1303 = vadd.xlane.f32.xlu0 %v1302_v40 }
 0x3ce   : > { %858 = vadd.xlane.f32.xlu0 %v857_v9  ;;  %1306 = vadd.xlane.f32.xlu1 %v1305_v34 }
 0x3d2   : > { %1736 = vadd.xlane.f32.xlu0 %v1735_v4  ;;  %846 = vadd.xlane.f32.xlu1 %v845_v15 }
 0x3d6   : > { %1294 = vadd.xlane.f32.xlu0 %v1293_v57  ;;  %1724 = vadd.xlane.f32.xlu1 %v1723_v17 }
 0x3da   : > { %1787 = vadd.xlane.f32.xlu0 %v1786_v42 }
 0x433   : > { %v1310_v1 = vpop.xlane.xlu1 %1309 }
 0x434   : > { %v1322_v54 = vmul.f32 0.03125, %v1310_v1 }
 0x436   : > { %v4215_v61 = vsub.f32 %v4094_v8, %v1322_v54 }
 0x437   : > { %v1298_v58 = vpop.xlane.xlu1 %1297  ;;  %v1313_v14 = vpop.xlane.xlu0 %1312 }
 0x438   : > { %v1318_v59 = vmul.f32 0.03125, %v1298_v58  ;;  %v1323_v62 = vmul.f32 0.03125, %v1313_v14  ;;  %v1338_v11 = vmul.f32 %v4215_v61, %v4215_v61 }
 0x43a   : > { %v4220_v43 = vsub.f32 %v4100_v39, %v1318_v59  ;;  %v4223_v63 = vsub.f32 %v4112_v36, %v1323_v62  ;;  %v1356_v47 = vsel %vm438_vm0, %v1338_v11, 0.0 }
 0x43b   : > { %v1728_v5 = vpop.xlane.xlu1 %1727  ;;  %1357 = vadd.xlane.f32.xlu1 %v1356_v47  ;;  %v1743_v33 = vpop.xlane.xlu0 %1742 }
 0x43c   : > { %v1748_v8 = vmul.f32 0.03125, %v1728_v5  ;;  %v1753_v19 = vmul.f32 0.03125, %v1743_v33  ;;  %v1334_v46 = vmul.f32 %v4220_v43, %v4220_v43  ;;  %v1339_v30 = vmul.f32 %v4223_v63, %v4223_v63 }
 0x43e   : > { %v4231_v28 = vsub.f32 %v4015_v18, %v1748_v8  ;;  %v4234_v39 = vsub.f32 %v4118_v44, %v1753_v19  ;;  %v1344_v36 = vsel %vm438_vm0, %v1334_v46, 0.0  ;;  %v1359_v56 = vsel %vm438_vm0, %v1339_v30, 0.0 }
 0x43f   : > { %v1301_v12 = vpop.xlane.xlu1 %1300  ;;  %1345 = vadd.xlane.f32.xlu1 %v1344_v36  ;;  %1360 = vadd.xlane.f32.xlu0 %v1359_v56  ;;  %v1316_v35 = vpop.xlane.xlu0 %1315 }
 0x440   : > { %v1319_v16 = vmul.f32 0.03125, %v1301_v12  ;;  %v1324_v22 = vmul.f32 0.03125, %v1316_v35  ;;  %v1764_v38 = vmul.f32 %v4231_v28, %v4231_v28  ;;  %v1769_v18 = vmul.f32 %v4234_v39, %v4234_v39 }
 0x442   : > { %v4243_v52 = vsub.f32 %v4129_v10, %v1319_v16  ;;  %v4246_v44 = vsub.f32 %v4132_v51, %v1324_v22  ;;  %v1774_v24 = vsel %vm438_vm0, %v1764_v38, 0.0  ;;  %v1789_v40 = vsel %vm438_vm0, %v1769_v18, 0.0 }
 0x443   : > { %v1731_v45 = vpop.xlane.xlu1 %1730  ;;  %1775 = vadd.xlane.f32.xlu1 %v1774_v24  ;;  %1790 = vadd.xlane.f32.xlu0 %v1789_v40  ;;  %v1746_v6 = vpop.xlane.xlu0 %1745 }
 0x444   : > { %v1749_v48 = vmul.f32 0.03125, %v1731_v45  ;;  %v1754_v9 = vmul.f32 0.03125, %v1746_v6  ;;  %v1335_v34 = vmul.f32 %v4243_v52, %v4243_v52  ;;  %v1340_v10 = vmul.f32 %v4246_v44, %v4246_v44 }
 0x446   : > { %v4255_v20 = vsub.f32 %v4046_v23, %v1749_v48  ;;  %v4258_v51 = vsub.f32 %v4105_v32, %v1754_v9  ;;  %v1347_v4 = vsel %vm438_vm0, %v1335_v34, 0.0  ;;  %v1362_v15 = vsel %vm438_vm0, %v1340_v10, 0.0 }
 0x447   : > { %v850_v57 = vpop.xlane.xlu1 %849  ;;  %1348 = vadd.xlane.f32.xlu1 %v1347_v4  ;;  %1363 = vadd.xlane.f32.xlu0 %v1362_v15  ;;  %v862_v17 = vpop.xlane.xlu0 %861 }
 0x448   : > { %v870_v25 = vmul.f32 0.03125, %v850_v57  ;;  %v874_v42 = vmul.f32 0.03125, %v862_v17  ;;  %v1765_v1 = vmul.f32 %v4255_v20, %v4255_v20  ;;  %v1770_v23 = vmul.f32 %v4258_v51, %v4258_v51 }
 0x44a   : > { %v4267_v54 = vsub.f32 %v4142_v31, %v870_v25  ;;  %v4270_v32 = vsub.f32 %v4147_v60, %v874_v42  ;;  %v1777_v58 = vsel %vm438_vm0, %v1765_v1, 0.0  ;;  %v1792_v14 = vsel %vm438_vm0, %v1770_v23, 0.0 }
 0x44b   : > { %v856_v59 = vpop.xlane.xlu1 %855  ;;  %1778 = vadd.xlane.f32.xlu1 %v1777_v58  ;;  %1793 = vadd.xlane.f32.xlu0 %v1792_v14  ;;  %v868_v62 = vpop.xlane.xlu0 %867 }
 0x44c   : > { %v872_v11 = vmul.f32 0.03125, %v856_v59  ;;  %v876_v47 = vmul.f32 0.03125, %v868_v62  ;;  %v886_v5 = vmul.f32 %v4267_v54, %v4267_v54  ;;  %v890_v31 = vmul.f32 %v4270_v32, %v4270_v32 }
 0x44e   : > { %v4279_v33 = vsub.f32 %v4156_v29, %v872_v11  ;;  %v4282_v60 = vsub.f32 %v4161_v13, %v876_v47  ;;  %v896_v8 = vsel %vm438_vm0, %v886_v5, 0.0  ;;  %v908_v19 = vsel %vm438_vm0, %v890_v31, 0.0 }
 0x44f   : > { %v853_v46 = vpop.xlane.xlu1 %852  ;;  %897 = vadd.xlane.f32.xlu1 %v896_v8  ;;  %909 = vadd.xlane.f32.xlu0 %v908_v19  ;;  %v865_v30 = vpop.xlane.xlu0 %864 }
 0x450   : > { %v871_v36 = vmul.f32 0.03125, %v853_v46  ;;  %v875_v56 = vmul.f32 0.03125, %v865_v30  ;;  %v888_v12 = vmul.f32 %v4279_v33, %v4279_v33  ;;  %v892_v29 = vmul.f32 %v4282_v60, %v4282_v60 }
 0x452   : > { %v4291_v35 = vsub.f32 %v4163_v26, %v871_v36  ;;  %v4294_v13 = vsub.f32 %v4166_v55, %v875_v56  ;;  %v902_v16 = vsel %vm438_vm0, %v888_v12, 0.0  ;;  %v914_v22 = vsel %vm438_vm0, %v892_v29, 0.0 }
 0x453   : > { %v1734_v38 = vpop.xlane.xlu1 %1733  ;;  %903 = vadd.xlane.f32.xlu1 %v902_v16  ;;  %915 = vadd.xlane.f32.xlu0 %v914_v22  ;;  %v1304_v18 = vpop.xlane.xlu0 %1303 }
 0x454   : > { %v1750_v24 = vmul.f32 0.03125, %v1734_v38  ;;  %v1320_v40 = vmul.f32 0.03125, %v1304_v18  ;;  %v887_v45 = vmul.f32 %v4291_v35, %v4291_v35  ;;  %v891_v26 = vmul.f32 %v4294_v13, %v4294_v13 }
 0x456   : > { %v4303_v6 = vsub.f32 %v4038_v0, %v1750_v24  ;;  %v4306_v55 = vsub.f32 %v4178_v49, %v1320_v40  ;;  %v899_v48 = vsel %vm438_vm0, %v887_v45, 0.0  ;;  %v911_v9 = vsel %vm438_vm0, %v891_v26, 0.0 }
 0x457   : > { %900 = vadd.xlane.f32.xlu1 %v899_v48  ;;  %v1307_v34 = vpop.xlane.xlu1 %1306  ;;  %912 = vadd.xlane.f32.xlu0 %v911_v9  ;;  %v859_v10 = vpop.xlane.xlu0 %858 }
 0x458   : > { %v1321_v4 = vmul.f32 0.03125, %v1307_v34  ;;  %v873_v15 = vmul.f32 0.03125, %v859_v10  ;;  %v1766_v57 = vmul.f32 %v4303_v6, %v4303_v6  ;;  %v1336_v0 = vmul.f32 %v4306_v55, %v4306_v55 }
 0x45a   : > { %v4315_v17 = vsub.f32 %v4186_v37, %v1321_v4  ;;  %v4318_v49 = vsub.f32 %v4189_v2, %v873_v15  ;;  %v1780_v25 = vsel %vm438_vm0, %v1766_v57, 0.0  ;;  %v1350_v42 = vsel %vm438_vm0, %v1336_v0, 0.0 }
 0x45b   : > { %1781 = vadd.xlane.f32.xlu1 %v1780_v25  ;;  %v847_v1 = vpop.xlane.xlu1 %846  ;;  %1351 = vadd.xlane.f32.xlu0 %v1350_v42  ;;  %v1737_v23 = vpop.xlane.xlu0 %1736 }
 0x45c   : > { %v869_v58 = vmul.f32 0.03125, %v847_v1  ;;  %v1751_v14 = vmul.f32 0.03125, %v1737_v23  ;;  %v1337_v59 = vmul.f32 %v4315_v17, %v4315_v17  ;;  %v889_v37 = vmul.f32 %v4318_v49, %v4318_v49 }
 0x45e   : > { %v4327_v62 = vsub.f32 %v4195_v53, %v869_v58  ;;  %v4330_v2 = vsub.f32 %v4091_v3, %v1751_v14  ;;  %v1353_v11 = vsel %vm438_vm0, %v1337_v59, 0.0  ;;  %v905_v47 = vsel %vm438_vm0, %v889_v37, 0.0 }
 0x45f   : > { %1354 = vadd.xlane.f32.xlu1 %v1353_v11  ;;  %v1725_v5 = vpop.xlane.xlu1 %1724  ;;  %906 = vadd.xlane.f32.xlu0 %v905_v47  ;;  %v1295_v31 = vpop.xlane.xlu0 %1294 }
 0x460   : > { %v1747_v8 = vmul.f32 0.03125, %v1725_v5  ;;  %v1317_v19 = vmul.f32 0.03125, %v1295_v31  ;;  %v885_v46 = vmul.f32 %v4327_v62, %v4327_v62  ;;  %v1767_v53 = vmul.f32 %v4330_v2, %v4330_v2 }
 0x462   : > { %v4339_v30 = vsub.f32 %v4029_v27, %v1747_v8  ;;  %v4342_v3 = vsub.f32 %v4205_v50, %v1317_v19  ;;  %v893_v36 = vsel %vm438_vm0, %v885_v46, 0.0  ;;  %v1783_v56 = vsel %vm438_vm0, %v1767_v53, 0.0 }
 0x463   : > { %894 = vadd.xlane.f32.xlu1 %v893_v36  ;;  %1784 = vadd.xlane.f32.xlu0 %v1783_v56  ;;  %v1788_v50 = vpop.xlane.xlu0 %1787  ;;  %v4357_v56 = vld [vmem:[%s5212_s3] ss:$0 sm:$0xff] }
 0x464   : > { %v1763_v12 = vmul.f32 %v4339_v30, %v4339_v30  ;;  %v1333_v29 = vmul.f32 %v4342_v3, %v4342_v3  ;;  %v1800_v22 = vmul.f32 0.03125, %v1788_v50 }
 0x466   : > { %v1771_v16 = vsel %vm438_vm0, %v1763_v12, 0.0  ;;  %v1341_v27 = vsel %vm438_vm0, %v1333_v29, 0.0  ;;  %v1808_v38 = vadd.f32 1e-05, %v1800_v22 }
 0x467   : > { %1772 = vadd.xlane.f32.xlu1 %v1771_v16  ;;  %1342 = vadd.xlane.f32.xlu0 %v1341_v27 }
 0x468   : > { %3174 = vrsqrt.f32 %v1808_v38 }
 0x475   : > { %v3175_v58 = vpop.eup %3174 }
 0x476   : > { %v1824_v8 = vmul.f32 %v3175_v58, %v4198_v21  ;;  %v4364_v21 = vld [vmem:[%s5212_s3 + $0x1] ss:$0 sm:$0xff] }
 0x478   : > { %v1832_v27 = vmul.f32 %v4059_v7, %v1824_v8 }
 0x4c4   : > { %v1358_v18 = vpop.xlane.xlu1 %1357 }
 0x4c5   : > { %v1370_v24 = vmul.f32 0.03125, %v1358_v18 }
 0x4c7   : > { %v1378_v40 = vadd.f32 1e-05, %v1370_v24  ;;  %v4371_v24 = vld [vmem:[%s5212_s3 + $0x6] ss:$0 sm:$0xff] }
 0x4c8   : > { %v1346_v45 = vpop.xlane.xlu1 %1345  ;;  %v1361_v26 = vpop.xlane.xlu0 %1360 }
 0x4c9   : > { %3176 = vrsqrt.f32 %v1378_v40  ;;  %v1366_v48 = vmul.f32 0.03125, %v1346_v45  ;;  %v1371_v9 = vmul.f32 0.03125, %v1361_v26 }
 0x4cb   : > { %v1374_v34 = vadd.f32 1e-05, %v1366_v48  ;;  %v1379_v10 = vadd.f32 1e-05, %v1371_v9 }
 0x4cc   : > { %v1776_v4 = vpop.xlane.xlu1 %1775  ;;  %v1791_v15 = vpop.xlane.xlu0 %1790 }
 0x4cd   : > { %3178 = vrsqrt.f32 %v1374_v34  ;;  %v1796_v57 = vmul.f32 0.03125, %v1776_v4  ;;  %v1801_v31 = vmul.f32 0.03125, %v1791_v15  ;;  %v1840_v4 = vadd.f32 %v4068_v41, %v1832_v27 }
 0x4ce   : > { %3180 = vrsqrt.f32 %v1379_v10 }
 0x4cf   : > { %v1804_v0 = vadd.f32 1e-05, %v1796_v57  ;;  %v1809_v16 = vadd.f32 1e-05, %v1801_v31 }
 0x4d0   : > { %v1349_v25 = vpop.xlane.xlu1 %1348  ;;  %v1364_v42 = vpop.xlane.xlu0 %1363 }
 0x4d1   : > { %3182 = vrsqrt.f32 %v1804_v0  ;;  %v1367_v1 = vmul.f32 0.03125, %v1349_v25  ;;  %v1372_v23 = vmul.f32 0.03125, %v1364_v42 }
 0x4d3   : > { %v1375_v14 = vadd.f32 1e-05, %v1367_v1  ;;  %v1380_v59 = vadd.f32 1e-05, %v1372_v23 }
 0x4d4   : > { %v1779_v37 = vpop.xlane.xlu1 %1778  ;;  %v1794_v11 = vpop.xlane.xlu0 %1793 }
 0x4d5   : > { %3184 = vrsqrt.f32 %v1375_v14  ;;  %v1797_v47 = vmul.f32 0.03125, %v1779_v37  ;;  %v1802_v8 = vmul.f32 0.03125, %v1794_v11 }
 0x4d6   : > { %v3177_v5 = vpop.eup %3176  ;;  %3186 = vrsqrt.f32 %v1380_v59 }
 0x4d7   : > { %v1805_v19 = vadd.f32 1e-05, %v1797_v47  ;;  %v1394_v46 = vmul.f32 %v3177_v5, %v4215_v61 }
 0x4d8   : > { %v898_v53 = vpop.xlane.xlu1 %897  ;;  %v910_v36 = vpop.xlane.xlu0 %909 }
 0x4d9   : > { %3188 = vrsqrt.f32 %v1805_v19  ;;  %v1402_v12 = vmul.f32 %v4357_v56, %v1394_v46  ;;  %v918_v45 = vmul.f32 0.03125, %v898_v53  ;;  %v1848_v53 = vmax.f32 %v1840_v4, 0.0 }
 0x4da   : > { %v3179_v29 = vpop.eup %3178  ;;  %3190 = vrsqrt.f32 %v1809_v16 }
 0x4db   : > { %v3181_v50 = vpop.eup %3180  ;;  %v1410_v61 = vadd.f32 %v4364_v21, %v1402_v12  ;;  %v1390_v22 = vmul.f32 %v3179_v29, %v4220_v43  ;;  %v926_v58 = vadd.f32 1e-05, %v918_v45 }
 0x4dc   : > { %v904_v38 = vpop.xlane.xlu1 %903  ;;  %v916_v18 = vpop.xlane.xlu0 %915  ;;  %v1395_v40 = vmul.f32 %v3181_v50, %v4223_v63 }
 0x4dd   : > { %v920_v26 = vmul.f32 0.03125, %v904_v38  ;;  %v924_v48 = vmul.f32 0.03125, %v916_v18  ;;  %v1418_v9 = vmul.f32 %v4371_v24, %v1410_v61  ;;  %v1398_v10 = vmul.f32 %v4357_v56, %v1390_v22 }
 0x4de   : > { %v3183_v34 = vpop.eup %3182  ;;  %v1403_v43 = vmul.f32 %v4357_v56, %v1395_v40 }
 0x4df   : > { %v928_v15 = vadd.f32 1e-05, %v920_v26  ;;  %v932_v57 = vadd.f32 1e-05, %v924_v48  ;;  %v1436_v0 = vsel %vm438_vm0, %v1418_v9, 0.0  ;;  %v1820_v25 = vmul.f32 %v3183_v34, %v4231_v28 }
 0x4e0   : > { %1437 = vadd.xlane.f32.xlu1 %v1436_v0  ;;  %v901_v63 = vpop.xlane.xlu1 %900  ;;  %v913_v42 = vpop.xlane.xlu0 %912  ;;  %v1406_v1 = vadd.f32 %v4364_v21, %v1398_v10  ;;  %v1411_v23 = vadd.f32 %v4364_v21, %v1403_v43  ;;  %v1810_v0 = vadd.f32 1e-05, %v1802_v8 }
 0x4e1   : > { %3192 = vrsqrt.f32 %v928_v15  ;;  %v923_v14 = vmul.f32 0.03125, %v913_v42  ;;  %v1828_v59 = vmul.f32 %v4059_v7, %v1820_v25  ;;  %v919_v47 = vmul.f32 0.03125, %v901_v63 }
 0x4e2   : > { %v3185_v37 = vpop.eup %3184  ;;  %3194 = vrsqrt.f32 %v932_v57  ;;  %v1414_v5 = vmul.f32 %v4371_v24, %v1406_v1  ;;  %v1419_v31 = vmul.f32 %v4371_v24, %v1411_v23 }
 0x4e3   : > { %v3187_v28 = vpop.eup %3186  ;;  %v931_v19 = vadd.f32 1e-05, %v923_v14  ;;  %v1391_v46 = vmul.f32 %v3185_v37, %v4243_v52  ;;  %v1836_v61 = vadd.f32 %v4068_v41, %v1828_v59  ;;  %3196 = vrsqrt.f32 %v926_v58 }
 0x4e4   : > { %v1782_v12 = vpop.xlane.xlu1 %1781  ;;  %v1424_v29 = vsel %vm438_vm0, %v1414_v5, 0.0  ;;  %v1439_v16 = vsel %vm438_vm0, %v1419_v31, 0.0  ;;  %v1352_v27 = vpop.xlane.xlu0 %1351  ;;  %v1396_v50 = vmul.f32 %v3187_v28, %v4246_v44  ;;  %v922_v52 = vmul.f32 0.03125, %v910_v36 }
 0x4e5   : > { %v1798_v22 = vmul.f32 0.03125, %v1782_v12  ;;  %1425 = vadd.xlane.f32.xlu0 %v1424_v29  ;;  %1440 = vadd.xlane.f32.xlu1 %v1439_v16  ;;  %v1368_v38 = vmul.f32 0.03125, %v1352_v27  ;;  %v1399_v11 = vmul.f32 %v4357_v56, %v1391_v46  ;;  %v927_v40 = vadd.f32 1e-05, %v919_v47 }
 0x4e6   : > { %v3189_v18 = vpop.eup %3188  ;;  %3198 = vrsqrt.f32 %v931_v19  ;;  %v1404_v45 = vmul.f32 %v4357_v56, %v1396_v50  ;;  %v1844_v4 = vmax.f32 %v1836_v61, 0.0  ;;  %v1856_v36 = vmul.f32 %v4371_v24, %v1848_v53 }
 0x4e7   : > { %v1806_v26 = vadd.f32 1e-05, %v1798_v22  ;;  %v1376_v48 = vadd.f32 1e-05, %v1368_v38  ;;  %v1407_v9 = vadd.f32 %v4364_v21, %v1399_v11  ;;  %v1821_v44 = vmul.f32 %v3189_v18, %v4255_v20  ;;  %v3191_v42 = vpop.eup %3190 }
 0x4e8   : > { %v1355_v34 = vpop.xlane.xlu1 %1354  ;;  %v907_v10 = vpop.xlane.xlu0 %906  ;;  %v1412_v43 = vadd.f32 %v4364_v21, %v1404_v45  ;;  %v930_v1 = vadd.f32 1e-05, %v922_v52  ;;  %v1852_v37 = vmul.f32 %v4371_v24, %v1844_v4  ;;  %v1825_v8 = vmul.f32 %v3191_v42, %v4234_v39  ;;  %v4412_v39 = vld [vmem:[%s5212_s3 + $0x4] ss:$0 sm:$0xff] }
 0x4e9   : > { %3200 = vrsqrt.f32 %v1806_v26  ;;  %v1369_v15 = vmul.f32 0.03125, %v1355_v34  ;;  %v1415_v57 = vmul.f32 %v4371_v24, %v1407_v9  ;;  %v1829_v63 = vmul.f32 %v4059_v7, %v1821_v44 }
 0x4ea   : > { %3202 = vrsqrt.f32 %v1376_v48  ;;  %v1420_v25 = vmul.f32 %v4371_v24, %v1412_v43  ;;  %v921_v31 = vmul.f32 0.03125, %v907_v10  ;;  %v1874_v46 = vsel %vm438_vm0, %v1856_v36, 0.0  ;;  %v4420_v48 = vld [vmem:[%s5212_s3 + $0x5] ss:$0 sm:$0xff] }
 0x4eb   : > { %3204 = vrsqrt.f32 %v927_v40  ;;  %v1377_v20 = vadd.f32 1e-05, %v1369_v15  ;;  %v1427_v23 = vsel %vm438_vm0, %v1415_v57, 0.0  ;;  %v1837_v47 = vadd.f32 %v4068_v41, %v1829_v63 }
 0x4ec   : > { %v895_v58 = vpop.xlane.xlu1 %894  ;;  %1428 = vadd.xlane.f32.xlu0 %v1427_v23  ;;  %v1442_v14 = vsel %vm438_vm0, %v1420_v25, 0.0  ;;  %v1785_v59 = vpop.xlane.xlu0 %1784  ;;  %v1862_v29 = vsel %vm438_vm0, %v1852_v37, 0.0  ;;  %v929_v11 = vadd.f32 1e-05, %v921_v31  ;;  %v1833_v52 = vmul.f32 %v4059_v7, %v1825_v8 }
 0x4ed   : > { %3206 = vrsqrt.f32 %v1377_v20  ;;  %1443 = vadd.xlane.f32.xlu1 %v1442_v14  ;;  %v1845_v28 = vmax.f32 %v1837_v47, 0.0  ;;  %v917_v45 = vmul.f32 0.03125, %v895_v58  ;;  %v1799_v44 = vmul.f32 0.03125, %v1785_v59 }
 0x4ee   : > { %v3193_v5 = vpop.eup %3192  ;;  %3208 = vrsqrt.f32 %v1810_v0  ;;  %v1841_v36 = vadd.f32 %v4068_v41, %v1833_v52 }
 0x4ef   : > { %v3195_v19 = vpop.eup %3194  ;;  %3210 = vrsqrt.f32 %v930_v1  ;;  %v944_v53 = vmul.f32 %v3193_v5, %v4279_v33  ;;  %v1853_v27 = vmul.f32 %v4371_v24, %v1845_v28  ;;  %v925_v63 = vadd.f32 1e-05, %v917_v45 }
 0x4f0   : > { %v1773_v12 = vpop.xlane.xlu1 %1772  ;;  %1875 = vadd.xlane.f32.xlu0 %v1874_v46  ;;  %v1343_v16 = vpop.xlane.xlu0 %1342  ;;  %v948_v50 = vmul.f32 %v3195_v19, %v4282_v60  ;;  %v1807_v20 = vadd.f32 1e-05, %v1799_v44  ;;  %v1849_v47 = vmax.f32 %v1841_v36, 0.0 }
 0x4f1   : > { %v1795_v61 = vmul.f32 0.03125, %v1773_v12  ;;  %1863 = vadd.xlane.f32.xlu1 %v1862_v29  ;;  %v1365_v22 = vmul.f32 0.03125, %v1343_v16  ;;  %v956_v38 = vmul.f32 %v4412_v39, %v944_v53  ;;  %v3197_v33 = vpop.eup %3196  ;;  %v1865_v34 = vsel %vm438_vm0, %v1853_v27, 0.0 }
 0x4f2   : > { %v960_v18 = vmul.f32 %v4412_v39, %v948_v50  ;;  %v942_v0 = vmul.f32 %v3197_v33, %v4267_v54 }
 0x4f3   : > { %v3199_v40 = vpop.eup %3198  ;;  %v1803_v26 = vadd.f32 1e-05, %v1795_v61  ;;  %v1373_v60 = vadd.f32 1e-05, %v1365_v22  ;;  %v968_v9 = vadd.f32 %v4420_v48, %v956_v38 }
 0x4f4   : > { %v972_v10 = vadd.f32 %v4420_v48, %v960_v18  ;;  %v947_v43 = vmul.f32 %v3199_v40, %v4294_v13  ;;  %v954_v5 = vmul.f32 %v4412_v39, %v942_v0 }
 0x4f5   : > { %3212 = vrsqrt.f32 %v1803_v26  ;;  %1866 = vadd.xlane.f32.xlu1 %v1865_v34  ;;  %v980_v4 = vmul.f32 %v4371_v24, %v968_v9 }
 0x4f6   : > { %v3201_v15 = vpop.eup %3200  ;;  %3214 = vrsqrt.f32 %v1373_v60  ;;  %v959_v57 = vmul.f32 %v4412_v39, %v947_v43  ;;  %v984_v23 = vmul.f32 %v4371_v24, %v972_v10 }
 0x4f7   : > { %v3203_v25 = vpop.eup %3202  ;;  %3216 = vrsqrt.f32 %v929_v11  ;;  %v994_v42 = vsel %vm438_vm0, %v980_v4, 0.0  ;;  %v1822_v1 = vmul.f32 %v3201_v15, %v4303_v6  ;;  %v3275_v4 = vld [vmem:[%s5212_s3 + $0x3] ss:$0 sm:$0xff] }
 0x4f8   : > { %v3205_v13 = vpop.eup %3204  ;;  %v971_v58 = vadd.f32 %v4420_v48, %v959_v57  ;;  %v1392_v14 = vmul.f32 %v3203_v25, %v4306_v55  ;;  %3218 = vrsqrt.f32 %v925_v63  ;;  %v1006_v55 = vsel %vm438_vm0, %v984_v23, 0.0 }
 0x4f9   : > { %995 = vadd.xlane.f32.xlu1 %v994_v42  ;;  %v1830_v59 = vmul.f32 %v4059_v7, %v1822_v1  ;;  %v943_v8 = vmul.f32 %v3205_v13, %v4291_v35  ;;  %3220 = vrsqrt.f32 %v1807_v20  ;;  %v966_v35 = vadd.f32 %v4420_v48, %v954_v5 }
 0x4fa   : > { %v3207_v37 = vpop.eup %3206  ;;  %v1400_v54 = vmul.f32 %v4357_v56, %v1392_v14  ;;  %v983_v7 = vmul.f32 %v4371_v24, %v971_v58 }
 0x4fb   : > { %v3209_v31 = vpop.eup %3208  ;;  %v1838_v6 = vadd.f32 %v4068_v41, %v1830_v59  ;;  %v1393_v28 = vmul.f32 %v3207_v37, %v4315_v17  ;;  %v1857_v17 = vmul.f32 %v4371_v24, %v1849_v47  ;;  %v955_v16 = vmul.f32 %v4412_v39, %v943_v8 }
 0x4fc   : > { %v3211_v19 = vpop.eup %3210  ;;  %v1408_v46 = vadd.f32 %v4364_v21, %v1400_v54  ;;  %v1826_v41 = vmul.f32 %v3209_v31, %v4258_v51  ;;  %v1003_v50 = vsel %vm438_vm0, %v983_v7, 0.0  ;;  %v3274_v51 = vld [vmem:[%s5212_s3 + $0x2] ss:$0 sm:$0xff]  ;;  %v978_v44 = vmul.f32 %v4371_v24, %v966_v35 }
 0x4fd   : > { %1007 = vadd.xlane.f32.xlu1 %v1006_v55  ;;  %v1846_v53 = vmax.f32 %v1838_v6, 0.0  ;;  %v1401_v12 = vmul.f32 %v4357_v56, %v1393_v28  ;;  %v946_v27 = vmul.f32 %v3211_v19, %v4270_v32  ;;  %v1877_v52 = vsel %vm438_vm0, %v1857_v17, 0.0 }
 0x4fe   : > { %v1416_v29 = vmul.f32 %v4371_v24, %v1408_v46  ;;  %v1834_v11 = vmul.f32 %v3274_v51, %v1826_v41  ;;  %v967_v32 = vadd.f32 %v4420_v48, %v955_v16  ;;  %v988_v63 = vsel %vm438_vm0, %v978_v44, 0.0 }
 0x4ff   : > { %v1854_v22 = vmul.f32 %v4371_v24, %v1846_v53  ;;  %v1409_v38 = vadd.f32 %v4364_v21, %v1401_v12  ;;  %v958_v40 = vmul.f32 %v4412_v39, %v946_v27 }
 0x500   : > { %v1430_v61 = vsel %vm438_vm0, %v1416_v29, 0.0  ;;  %v1842_v15 = vadd.f32 %v3275_v4, %v1834_v11 }
 0x501   : > { %1004 = vadd.xlane.f32.xlu1 %v1003_v50  ;;  %1431 = vadd.xlane.f32.xlu0 %v1430_v61  ;;  %v1868_v60 = vsel %vm438_vm0, %v1854_v22, 0.0  ;;  %v1417_v9 = vmul.f32 %v4371_v24, %v1409_v38  ;;  %v970_v57 = vadd.f32 %v4420_v48, %v958_v40  ;;  %v4499_v38 = vstv %s424_s28 }
 0x502   : > { %v3213_v33 = vpop.eup %3212  ;;  %v1850_v58 = vmax.f32 %v1842_v15, 0.0 }
 0x503   : > { %v3215_v18 = vpop.eup %3214  ;;  %v1819_v45 = vmul.f32 %v3213_v33, %v4339_v30  ;;  %v979_v30 = vmul.f32 %v4371_v24, %v967_v32  ;;  %v982_v23 = vmul.f32 %v4371_v24, %v970_v57 }
 0x504   : > { %v3217_v26 = vpop.eup %3216  ;;  %v1389_v34 = vmul.f32 %v3215_v18, %v4342_v3  ;;  %v1433_v3 = vsel %vm438_vm0, %v1417_v9, 0.0  ;;  %v1858_v47 = vmul.f32 %v4371_v24, %v1850_v58 }
 0x505   : > { %1869 = vadd.xlane.f32.xlu1 %v1868_v60  ;;  %1878 = vadd.xlane.f32.xlu0 %v1877_v52  ;;  %v1827_v10 = vmul.f32 %v3274_v51, %v1819_v45  ;;  %v945_v0 = vmul.f32 %v3217_v26, %v4318_v49  ;;  %v3219_v25 = vpop.eup %3218  ;;  %v991_v20 = vsel %vm438_vm0, %v979_v30, 0.0  ;;  %v1000_v54 = vsel %vm438_vm0, %v982_v23, 0.0 }
 0x506   : > { %v1397_v43 = vmul.f32 %v4357_v56, %v1389_v34  ;;  %v3221_v56 = vpop.eup %3220  ;;  %v941_v37 = vmul.f32 %v3219_v25, %v4327_v62  ;;  %v1880_v8 = vsel %vm438_vm0, %v1858_v47, 0.0 }
 0x507   : > { %v1835_v36 = vadd.f32 %v3275_v4, %v1827_v10  ;;  %v957_v49 = vmul.f32 %v4412_v39, %v945_v0 }
 0x508   : > { %v1405_v42 = vadd.f32 %v4364_v21, %v1397_v43  ;;  %v1823_v21 = vmul.f32 %v3221_v56, %v4330_v2  ;;  %v953_v6 = vmul.f32 %v4412_v39, %v941_v37 }
 0x509   : > { %1434 = vadd.xlane.f32.xlu1 %v1433_v3  ;;  %989 = vadd.xlane.f32.xlu0 %v988_v63  ;;  %v1843_v1 = vmax.f32 %v1835_v36, 0.0  ;;  %v969_v31 = vadd.f32 %v4420_v48, %v957_v49 }
 0x50a   : > { %v1413_v13 = vmul.f32 %v4371_v24, %v1405_v42  ;;  %v1831_v28 = vmul.f32 %v3274_v51, %v1823_v21  ;;  %v965_v2 = vadd.f32 %v4420_v48, %v953_v6 }
 0x50b   : > { %v1851_v59 = vmul.f32 %v4371_v24, %v1843_v1  ;;  %v981_v62 = vmul.f32 %v4371_v24, %v969_v31 }
 0x50c   : > { %v1421_v14 = vsel %vm438_vm0, %v1413_v13, 0.0  ;;  %v1839_v19 = vadd.f32 %v3275_v4, %v1831_v28  ;;  %v977_v7 = vmul.f32 %v4371_v24, %v965_v2 }
 0x50d   : > { %992 = vadd.xlane.f32.xlu0 %v991_v20  ;;  %1422 = vadd.xlane.f32.xlu1 %v1421_v14  ;;  %v1859_v5 = vsel %vm438_vm0, %v1851_v59, 0.0  ;;  %v997_v55 = vsel %vm438_vm0, %v981_v62, 0.0 }
 0x50e   : > { %v1847_v46 = vmax.f32 %v1839_v19, 0.0  ;;  %v985_v53 = vsel %vm438_vm0, %v977_v7, 0.0 }
 0x510   : > { %v1855_v39 = vmul.f32 %v4371_v24, %v1847_v46 }
 0x511   : > { %1001 = vadd.xlane.f32.xlu0 %v1000_v54  ;;  %1860 = vadd.xlane.f32.xlu1 %v1859_v5 }
 0x512   : > { %v1871_v12 = vsel %vm438_vm0, %v1855_v39, 0.0 }
 0x515   : > { %1881 = vadd.xlane.f32.xlu0 %v1880_v8 }
 0x519   : > { %998 = vadd.xlane.f32.xlu0 %v997_v55 }
 0x51d   : > { %986 = vadd.xlane.f32.xlu0 %v985_v53 }
 0x521   : > { %1872 = vadd.xlane.f32.xlu0 %v1871_v12 }
 0x569   : > { %v1438_v29 = vpop.xlane.xlu1 %1437 }
 0x56a   : > { %v1450_v58 = vadd.f32 %v1438_v29, %v4499_v38 }
 0x56e   : > { %v1441_v41 = vpop.xlane.xlu1 %1440  ;;  %v1426_v35 = vpop.xlane.xlu0 %1425 }
 0x56f   : > { %v1451_v18 = vadd.f32 %v1441_v41, %v4499_v38  ;;  %v1446_v30 = vadd.f32 %v1426_v35, %v4499_v38 }
 0x575   : > { %v1429_v27 = vpop.xlane.xlu0 %1428 }
 0x576   : > { %v4497_v17 = vpop.xlane.xlu1 %1443  ;;  %v1447_v59 = vadd.f32 %v1429_v27, %v4499_v38 }
 0x577   : > { %v1452_v35 = vadd.f32 %v4497_v17, %v4499_v38 }
 0x579   : > { %v1876_v61 = vpop.xlane.xlu0 %1875 }
 0x57a   : > { %v1864_v48 = vpop.xlane.xlu1 %1863  ;;  %v1888_v12 = vadd.f32 %v1876_v61, %v4499_v38 }
 0x57b   : > { %v1884_v3 = vadd.f32 %v1864_v48, %v4499_v38 }
 0x57e   : > { %v1867_v16 = vpop.xlane.xlu1 %1866 }
 0x57f   : > { %v1885_v47 = vadd.f32 %v1867_v16, %v4499_v38 }
 0x582   : > { %v996_v50 = vpop.xlane.xlu1 %995 }
 0x583   : > { %v1013_v52 = vadd.f32 %v4499_v38, %v996_v50 }
 0x586   : > { %v1008_v22 = vpop.xlane.xlu1 %1007 }
 0x587   : > { %v1017_v62 = vadd.f32 %v4499_v38, %v1008_v22 }
 0x589   : > { %v1906_v61 = vadd.f32 %v1452_v35, %v1017_v62 }
 0x58a   : > { %v1005_v33 = vpop.xlane.xlu1 %1004  ;;  %v1432_v24 = vpop.xlane.xlu0 %1431 }
 0x58b   : > { %v1016_v51 = vadd.f32 %v4499_v38, %v1005_v33  ;;  %v1448_v11 = vadd.f32 %v1432_v24, %v4499_v38 }
 0x58d   : > { %v1905_v45 = vadd.f32 %v1451_v18, %v1016_v51  ;;  %v1902_v26 = vadd.f32 %v1448_v11, %v1013_v52 }
 0x58e   : > { %v1870_v32 = vpop.xlane.xlu1 %1869  ;;  %v1879_v40 = vpop.xlane.xlu0 %1878 }
 0x58f   : > { %v1886_v60 = vadd.f32 %v1870_v32, %v4499_v38  ;;  %v1889_v9 = vadd.f32 %v1879_v40, %v4499_v38 }
 0x591   : > { %v1910_v44 = vadd.f32 %v1902_v26, %v1886_v60  ;;  %v1913_v34 = vadd.f32 %v1905_v45, %v1889_v9 }
 0x592   : > { %v990_v10 = vpop.xlane.xlu0 %989  ;;  %v4538_v6 = vpop.xlane.xlu1 %1434 }
 0x593   : > { %v1919_v43 = vmul.f32 0.33333334, %v1910_v44  ;;  %v1922_v4 = vmul.f32 0.33333334, %v1913_v34  ;;  %v1011_v15 = vadd.f32 %v4499_v38, %v990_v10 }
 0x595   : > { %v4509_v57 = vsub.f32 %v1013_v52, %v1919_v43  ;;  %v4511_v36 = vsub.f32 %v1448_v11, %v1919_v43  ;;  %v4513_v0 = vsub.f32 %v1886_v60, %v1919_v43  ;;  %v4515_v25 = vsub.f32 %v1016_v51, %v1922_v4 }
 0x596   : > { %v4518_v63 = vsub.f32 %v1451_v18, %v1922_v4  ;;  %v4520_v42 = vsub.f32 %v1889_v9, %v1922_v4  ;;  %v1900_v56 = vadd.f32 %v1446_v30, %v1011_v15  ;;  %v993_v1 = vpop.xlane.xlu0 %992  ;;  %v1423_v32 = vpop.xlane.xlu1 %1422 }
 0x597   : > { %v1935_v13 = vmul.f32 %v4509_v57, %v4509_v57  ;;  %v1959_v20 = vmul.f32 %v4511_v36, %v4511_v36  ;;  %v1938_v23 = vmul.f32 %v4515_v25, %v4515_v25  ;;  %v1983_v21 = vmul.f32 %v4513_v0, %v4513_v0 }
 0x598   : > { %v1962_v49 = vmul.f32 %v4518_v63, %v4518_v63  ;;  %v1908_v14 = vadd.f32 %v1900_v56, %v1884_v3  ;;  %v1012_v54 = vadd.f32 %v4499_v38, %v993_v1  ;;  %v1986_v31 = vmul.f32 %v4520_v42, %v4520_v42 }
 0x599   : > { %v1967_v37 = vadd.f32 %v1959_v20, %v1935_v13  ;;  %v1445_v10 = vadd.f32 %v1423_v32, %v4499_v38 }
 0x59a   : > { %v1970_v5 = vadd.f32 %v1962_v49, %v1938_v23  ;;  %v1917_v28 = vmul.f32 0.33333334, %v1908_v14  ;;  %v1002_v8 = vpop.xlane.xlu0 %1001  ;;  %v1901_v19 = vadd.f32 %v1447_v59, %v1012_v54 }
 0x59b   : > { %v1991_v2 = vadd.f32 %v1983_v21, %v1967_v37  ;;  %v1015_v55 = vadd.f32 %v4499_v38, %v1002_v8  ;;  %v1861_v21 = vpop.xlane.xlu1 %1860 }
 0x59c   : > { %v1994_v7 = vadd.f32 %v1986_v31, %v1970_v5  ;;  %v4542_v46 = vsub.f32 %v1011_v15, %v1917_v28  ;;  %v4544_v53 = vsub.f32 %v1446_v30, %v1917_v28  ;;  %v4546_v39 = vsub.f32 %v1884_v3, %v1917_v28 }
 0x59d   : > { %v1999_v29 = vmul.f32 0.33333334, %v1991_v2  ;;  %v1909_v41 = vadd.f32 %v1901_v19, %v1885_v47  ;;  %v1904_v48 = vadd.f32 %v1450_v58, %v1015_v55 }
 0x59e   : > { %v2002_v16 = vmul.f32 0.33333334, %v1994_v7  ;;  %v1933_v27 = vmul.f32 %v4542_v46, %v4542_v46  ;;  %v1957_v50 = vmul.f32 %v4544_v53, %v4544_v53  ;;  %v1882_v22 = vpop.xlane.xlu0 %1881  ;;  %v1981_v52 = vmul.f32 %v4546_v39, %v4546_v39 }
 0x59f   : > { %v2007_v33 = vadd.f32 1e-05, %v1999_v29  ;;  %v1918_v24 = vmul.f32 0.33333334, %v1909_v41  ;;  %v1912_v51 = vadd.f32 %v1904_v48, %v1888_v12  ;;  %v1890_v11 = vadd.f32 %v1882_v22, %v4499_v38 }
 0x5a0   : > { %v1965_v18 = vadd.f32 %v1957_v50, %v1933_v27  ;;  %v2010_v17 = vadd.f32 1e-05, %v2002_v16  ;;  %v1883_v7 = vadd.f32 %v1861_v21, %v4499_v38 }
 0x5a1   : > { %v4558_v40 = vsub.f32 %v1012_v54, %v1918_v24  ;;  %v4560_v45 = vsub.f32 %v1447_v59, %v1918_v24  ;;  %v4562_v26 = vsub.f32 %v1885_v47, %v1918_v24  ;;  %v1921_v9 = vmul.f32 0.33333334, %v1912_v51 }
 0x5a2   : > { %v1989_v60 = vadd.f32 %v1981_v52, %v1965_v18  ;;  %v1914_v44 = vadd.f32 %v1906_v61, %v1890_v11  ;;  %v999_v34 = vpop.xlane.xlu0 %998  ;;  %3222 = vrsqrt.f32 %v2007_v33 }
 0x5a3   : > { %v1934_v43 = vmul.f32 %v4558_v40, %v4558_v40  ;;  %v1958_v4 = vmul.f32 %v4560_v45, %v4560_v45  ;;  %v4569_v30 = vsub.f32 %v1015_v55, %v1921_v9  ;;  %v4571_v3 = vsub.f32 %v1450_v58, %v1921_v9 }
 0x5a4   : > { %v1997_v15 = vmul.f32 0.33333334, %v1989_v60  ;;  %v4573_v56 = vsub.f32 %v1888_v12, %v1921_v9  ;;  %3224 = vrsqrt.f32 %v2010_v17  ;;  %v1982_v13 = vmul.f32 %v4562_v26, %v4562_v26 }
 0x5a5   : > { %v1966_v1 = vadd.f32 %v1958_v4, %v1934_v43  ;;  %v1923_v20 = vmul.f32 0.33333334, %v1914_v44  ;;  %v1937_v49 = vmul.f32 %v4569_v30, %v4569_v30  ;;  %v1961_v14 = vmul.f32 %v4571_v3, %v4571_v3 }
 0x5a6   : > { %v2005_v23 = vadd.f32 1e-05, %v1997_v15  ;;  %v1014_v59 = vadd.f32 %v4499_v38, %v999_v34  ;;  %v987_v37 = vpop.xlane.xlu0 %986  ;;  %v1985_v28 = vmul.f32 %v4573_v56, %v4573_v56 }
 0x5a7   : > { %v1990_v58 = vadd.f32 %v1982_v13, %v1966_v1  ;;  %v4582_v54 = vsub.f32 %v1017_v62, %v1923_v20  ;;  %v4584_v47 = vsub.f32 %v1452_v35, %v1923_v20  ;;  %v4586_v5 = vsub.f32 %v1890_v11, %v1923_v20 }
 0x5a8   : > { %3226 = vrsqrt.f32 %v2005_v23  ;;  %v1969_v31 = vadd.f32 %v1961_v14, %v1937_v49  ;;  %v1010_v8 = vadd.f32 %v4499_v38, %v987_v37  ;;  %v1449_v62 = vadd.f32 %v4538_v6, %v4499_v38  ;;  %v4626_v14 = vld [vmem:[%s5214_s5] ss:$0 sm:$0xff] }
 0x5a9   : > { %v1998_v2 = vmul.f32 0.33333334, %v1990_v58  ;;  %v1939_v19 = vmul.f32 %v4582_v54, %v4582_v54  ;;  %v1963_v55 = vmul.f32 %v4584_v47, %v4584_v47  ;;  %v1987_v16 = vmul.f32 %v4586_v5, %v4586_v5 }
 0x5aa   : > { %v1993_v12 = vadd.f32 %v1985_v28, %v1969_v31  ;;  %v1899_v29 = vadd.f32 %v1445_v10, %v1010_v8  ;;  %v1873_v41 = vpop.xlane.xlu0 %1872  ;;  %v1903_v22 = vadd.f32 %v1449_v62, %v1014_v59 }
 0x5ab   : > { %v2006_v48 = vadd.f32 1e-05, %v1998_v2  ;;  %v1971_v35 = vadd.f32 %v1963_v55, %v1939_v19  ;;  %v1887_v27 = vadd.f32 %v1873_v41, %v4499_v38  ;;  %v4648_v2 = vld [vmem:[%s5214_s5 + $0x2] ss:$0 sm:$0xff] }
 0x5ac   : > { %v2001_v50 = vmul.f32 0.33333334, %v1993_v12  ;;  %v1907_v33 = vadd.f32 %v1899_v29, %v1883_v7 }
 0x5ad   : > { %3228 = vrsqrt.f32 %v2006_v48  ;;  %v1995_v24 = vadd.f32 %v1987_v16, %v1971_v35  ;;  %v1911_v6 = vadd.f32 %v1903_v22, %v1887_v27 }
 0x5ae   : > { %v2009_v51 = vadd.f32 1e-05, %v2001_v50  ;;  %v1916_v11 = vmul.f32 0.33333334, %v1907_v33 }
 0x5af   : > { %v2003_v61 = vmul.f32 0.33333334, %v1995_v24  ;;  %v3223_v18 = vpop.eup %3222  ;;  %v1920_v38 = vmul.f32 0.33333334, %v1911_v6  ;;  %v4664_v6 = vld [vmem:[%s5214_s5 + $0x3] ss:$0 sm:$0xff] }
 0x5b0   : > { %3230 = vrsqrt.f32 %v2009_v51  ;;  %v4601_v32 = vsub.f32 %v1010_v8, %v1916_v11  ;;  %v4603_v17 = vsub.f32 %v1445_v10, %v1916_v11  ;;  %v4605_v9 = vsub.f32 %v1883_v7, %v1916_v11 }
 0x5b1   : > { %v2011_v52 = vadd.f32 1e-05, %v2003_v61  ;;  %v3225_v60 = vpop.eup %3224  ;;  %v2023_v44 = vmul.f32 %v3223_v18, %v4509_v57  ;;  %v2044_v4 = vmul.f32 %v3223_v18, %v4511_v36  ;;  %v4613_v15 = vsub.f32 %v1014_v59, %v1920_v38 }
 0x5b2   : > { %v1932_v34 = vmul.f32 %v4601_v32, %v4601_v32  ;;  %v1956_v43 = vmul.f32 %v4603_v17, %v4603_v17  ;;  %v4615_v1 = vsub.f32 %v1449_v62, %v1920_v38  ;;  %v4617_v10 = vsub.f32 %v1887_v27, %v1920_v38 }
 0x5b3   : > { %3232 = vrsqrt.f32 %v2011_v52  ;;  %v2026_v20 = vmul.f32 %v3225_v60, %v4515_v25  ;;  %v2047_v57 = vmul.f32 %v3225_v60, %v4518_v63  ;;  %v1980_v49 = vmul.f32 %v4605_v9, %v4605_v9  ;;  %v4637_v63 = vld [vmem:[%s5214_s5 + $0x1] ss:$0 sm:$0xff] }
 0x5b4   : > { %v1964_v23 = vadd.f32 %v1956_v43, %v1932_v34  ;;  %v1936_v37 = vmul.f32 %v4613_v15, %v4613_v15  ;;  %v1960_v25 = vmul.f32 %v4615_v1, %v4615_v1  ;;  %v2073_v58 = vmul.f32 %v3223_v18, %v4513_v0 }
 0x5b5   : > { %v3227_v13 = vpop.eup %3226  ;;  %v2036_v55 = vmul.f32 %v4626_v14, %v2023_v44  ;;  %v2057_v0 = vmul.f32 %v4637_v63, %v2044_v4  ;;  %v2060_v41 = vmul.f32 %v4637_v63, %v2047_v57  ;;  %v2076_v22 = vmul.f32 %v3225_v60, %v4520_v42 }
 0x5b6   : > { %v2021_v36 = vmul.f32 %v3227_v13, %v4542_v46  ;;  %v2042_v59 = vmul.f32 %v3227_v13, %v4544_v53  ;;  %v1988_v21 = vadd.f32 %v1980_v49, %v1964_v23  ;;  %v2071_v31 = vmul.f32 %v3227_v13, %v4546_v39 }
 0x5b7   : > { %v1968_v28 = vadd.f32 %v1960_v25, %v1936_v37  ;;  %v1984_v53 = vmul.f32 %v4617_v10, %v4617_v10  ;;  %v2039_v39 = vmul.f32 %v4626_v14, %v2026_v20  ;;  %v2086_v50 = vmul.f32 %v4648_v2, %v2073_v58 }
 0x5b8   : > { %v2034_v46 = vmul.f32 %v4626_v14, %v2021_v36  ;;  %v2055_v8 = vmul.f32 %v4637_v63, %v2042_v59  ;;  %v1996_v19 = vmul.f32 0.33333334, %v1988_v21  ;;  %v2084_v29 = vmul.f32 %v4648_v2, %v2071_v31 }
 0x5b9   : > { %v1992_v7 = vadd.f32 %v1984_v53, %v1968_v28  ;;  %v2068_v44 = vadd.f32 %v2060_v41, %v2039_v39  ;;  %v2089_v23 = vmul.f32 %v4648_v2, %v2076_v22 }
 0x5ba   : > { %v3229_v62 = vpop.eup %3228  ;;  %v2063_v12 = vadd.f32 %v2055_v8, %v2034_v46  ;;  %v2004_v16 = vadd.f32 1e-05, %v1996_v19 }
 0x5bb   : > { %v2022_v48 = vmul.f32 %v3229_v62, %v4558_v40  ;;  %v2043_v35 = vmul.f32 %v3229_v62, %v4560_v45  ;;  %v2072_v27 = vmul.f32 %v3229_v62, %v4562_v26  ;;  %v2000_v33 = vmul.f32 0.33333334, %v1992_v7 }
 0x5bc   : > { %v2092_v24 = vadd.f32 %v2084_v29, %v2063_v12  ;;  %3234 = vrsqrt.f32 %v2004_v16  ;;  %v2065_v45 = vadd.f32 %v2057_v0, %v2036_v55 }
 0x5bd   : > { %v3231_v51 = vpop.eup %3230  ;;  %v2035_v11 = vmul.f32 %v4626_v14, %v2022_v48  ;;  %v2056_v40 = vmul.f32 %v4637_v63, %v2043_v35  ;;  %v2008_v18 = vadd.f32 1e-05, %v2000_v33  ;;  %v2085_v60 = vmul.f32 %v4648_v2, %v2072_v27 }
 0x5be   : > { %v2025_v26 = vmul.f32 %v3231_v51, %v4569_v30  ;;  %v2046_v61 = vmul.f32 %v3231_v51, %v4571_v3  ;;  %v4670_v42 = vadd.f32 %v4664_v6, %v2092_v24  ;;  %v2075_v38 = vmul.f32 %v3231_v51, %v4573_v56 }
 0x5bf   : > { %v2064_v52 = vadd.f32 %v2056_v40, %v2035_v11  ;;  %3236 = vrsqrt.f32 %v2008_v18  ;;  %v2094_v57 = vadd.f32 %v2086_v50, %v2065_v45 }
 0x5c0   : > { %v3233_v34 = vpop.eup %3232  ;;  %v2038_v43 = vmul.f32 %v4626_v14, %v2025_v26  ;;  %v2117_v4 = vsel %vm438_vm0, %v4670_v42, 0.0  ;;  %v2059_v30 = vmul.f32 %v4637_v63, %v2046_v61  ;;  %v2088_v36 = vmul.f32 %v4648_v2, %v2075_v38 }
 0x5c1   : > { %v2027_v3 = vmul.f32 %v3233_v34, %v4582_v54  ;;  %v2048_v13 = vmul.f32 %v3233_v34, %v4584_v47  ;;  %2118 = vadd.xlane.f32.xlu1 %v2117_v4  ;;  %v2093_v20 = vadd.f32 %v2085_v60, %v2064_v52  ;;  %v2077_v56 = vmul.f32 %v3233_v34, %v4586_v5 }
 0x5c2   : > { %v2067_v49 = vadd.f32 %v2059_v30, %v2038_v43  ;;  %v2097_v54 = vadd.f32 %v2089_v23, %v2068_v44  ;;  %v2107_v21 = vadd.f32 %v4664_v6, %v2094_v57 }
 0x5c3   : > { %v2106_v59 = vadd.f32 %v4664_v6, %v2093_v20  ;;  %v2040_v37 = vmul.f32 %v4626_v14, %v2027_v3  ;;  %v2061_v25 = vmul.f32 %v4637_v63, %v2048_v13  ;;  %v2090_v46 = vmul.f32 %v4648_v2, %v2077_v56 }
 0x5c4   : > { %v2096_v58 = vadd.f32 %v2088_v36, %v2067_v49  ;;  %v2110_v53 = vadd.f32 %v4664_v6, %v2097_v54  ;;  %v2123_v19 = vsel %vm438_vm0, %v2107_v21, 0.0 }
 0x5c5   : > { %v2120_v47 = vsel %vm438_vm0, %v2106_v59, 0.0  ;;  %v2069_v31 = vadd.f32 %v2061_v25, %v2040_v37 }
 0x5c6   : > { %2121 = vadd.xlane.f32.xlu1 %v2120_v47  ;;  %v2109_v5 = vadd.f32 %v4664_v6, %v2096_v58  ;;  %v2132_v7 = vsel %vm438_vm0, %v2110_v53, 0.0 }
 0x5c7   : > { %v2098_v8 = vadd.f32 %v2090_v46, %v2069_v31 }
 0x5c8   : > { %v2129_v28 = vsel %vm438_vm0, %v2109_v5, 0.0 }
 0x5c9   : > { %2130 = vadd.xlane.f32.xlu0 %v2129_v28  ;;  %v3235_v55 = vpop.eup %3234  ;;  %v2111_v12 = vadd.f32 %v4664_v6, %v2098_v8 }
 0x5ca   : > { %2124 = vadd.xlane.f32.xlu1 %v2123_v19  ;;  %v2020_v0 = vmul.f32 %v3235_v55, %v4601_v32  ;;  %v2041_v39 = vmul.f32 %v3235_v55, %v4603_v17  ;;  %v2070_v62 = vmul.f32 %v3235_v55, %v4605_v9 }
 0x5cb   : > { %v2135_v9 = vsel %vm438_vm0, %v2111_v12, 0.0 }
 0x5cc   : > { %v3237_v29 = vpop.eup %3236  ;;  %v2033_v41 = vmul.f32 %v4626_v14, %v2020_v0  ;;  %v2054_v48 = vmul.f32 %v4637_v63, %v2041_v39  ;;  %v2083_v17 = vmul.f32 %v4648_v2, %v2070_v62 }
 0x5cd   : > { %2133 = vadd.xlane.f32.xlu0 %v2132_v7  ;;  %v2024_v35 = vmul.f32 %v3237_v29, %v4613_v15  ;;  %v2045_v16 = vmul.f32 %v3237_v29, %v4615_v1  ;;  %v2074_v32 = vmul.f32 %v3237_v29, %v4617_v10 }
 0x5ce   : > { %v2062_v27 = vadd.f32 %v2054_v48, %v2033_v41 }
 0x5cf   : > { %v2037_v50 = vmul.f32 %v4626_v14, %v2024_v35  ;;  %v2058_v22 = vmul.f32 %v4637_v63, %v2045_v16  ;;  %v2087_v24 = vmul.f32 %v4648_v2, %v2074_v32 }
 0x5d0   : > { %v2091_v33 = vadd.f32 %v2083_v17, %v2062_v27 }
 0x5d1   : > { %2136 = vadd.xlane.f32.xlu0 %v2135_v9  ;;  %v2066_v51 = vadd.f32 %v2058_v22, %v2037_v50 }
 0x5d2   : > { %v2104_v15 = vadd.f32 %v4664_v6, %v2091_v33 }
 0x5d3   : > { %v2095_v11 = vadd.f32 %v2087_v24, %v2066_v51  ;;  %v4756_v51 = vld [vmem:[%s5215_s6] ss:$0 sm:$0xff] }
 0x5d4   : > { %v2114_v1 = vsel %vm438_vm0, %v2104_v15, 0.0 }
 0x5d5   : > { %2115 = vadd.xlane.f32.xlu1 %v2114_v1  ;;  %v2108_v10 = vadd.f32 %v4664_v6, %v2095_v11  ;;  %v4762_v1 = vld [vmem:[%s5215_s6 + $0x1] ss:$0 sm:$0xff] }
 0x5d7   : > { %v2126_v40 = vsel %vm438_vm0, %v2108_v10, 0.0 }
 0x5d8   : > { %2127 = vadd.xlane.f32.xlu0 %v2126_v40 }
 0x64a   : > { %v2119_v45 = vpop.xlane.xlu1 %2118 }
 0x64b   : > { %v2139_v14 = vmul.f32 0.03125, %v2119_v45 }
 0x64d   : > { %v4713_v63 = vsub.f32 %v4670_v42, %v2139_v14 }
 0x64f   : > { %v2122_v26 = vpop.xlane.xlu1 %2121  ;;  %v2155_v2 = vmul.f32 %v4713_v63, %v4713_v63 }
 0x650   : > { %v2140_v61 = vmul.f32 0.03125, %v2122_v26 }
 0x651   : > { %v2165_v18 = vsel %vm438_vm0, %v2155_v2, 0.0 }
 0x652   : > { %v4718_v52 = vsub.f32 %v2106_v59, %v2140_v61  ;;  %2166 = vadd.xlane.f32.xlu1 %v2165_v18  ;;  %v2131_v60 = vpop.xlane.xlu0 %2130 }
 0x653   : > { %v2125_v6 = vpop.xlane.xlu1 %2124  ;;  %v2143_v38 = vmul.f32 0.03125, %v2131_v60 }
 0x654   : > { %v2141_v44 = vmul.f32 0.03125, %v2125_v6  ;;  %v2156_v34 = vmul.f32 %v4718_v52, %v4718_v52 }
 0x655   : > { %v4722_v43 = vsub.f32 %v2109_v5, %v2143_v38 }
 0x656   : > { %v4724_v42 = vsub.f32 %v2107_v21, %v2141_v44  ;;  %v2168_v4 = vsel %vm438_vm0, %v2156_v34, 0.0  ;;  %v2134_v30 = vpop.xlane.xlu0 %2133 }
 0x657   : > { %2169 = vadd.xlane.f32.xlu1 %v2168_v4  ;;  %v2144_v3 = vmul.f32 0.03125, %v2134_v30  ;;  %v2159_v13 = vmul.f32 %v4722_v43, %v4722_v43 }
 0x658   : > { %v2157_v20 = vmul.f32 %v4724_v42, %v4724_v42 }
 0x659   : > { %v4731_v57 = vsub.f32 %v2110_v53, %v2144_v3  ;;  %v2177_v23 = vsel %vm438_vm0, %v2159_v13, 0.0 }
 0x65a   : > { %v2171_v56 = vsel %vm438_vm0, %v2157_v20, 0.0  ;;  %2178 = vadd.xlane.f32.xlu0 %v2177_v23  ;;  %v2137_v49 = vpop.xlane.xlu0 %2136  ;;  %v3277_v23 = vld [vmem:[%s3645_s29 + $0x10] sm:$0xff] }
 0x65b   : > { %2172 = vadd.xlane.f32.xlu1 %v2171_v56  ;;  %v2145_v36 = vmul.f32 0.03125, %v2137_v49  ;;  %v2160_v59 = vmul.f32 %v4731_v57, %v4731_v57 }
 0x65d   : > { %v4737_v37 = vsub.f32 %v2111_v12, %v2145_v36  ;;  %v2180_v25 = vsel %vm438_vm0, %v2160_v59, 0.0  ;;  %v3278_v59 = vld [vmem:[%s3645_s29 + $0x28] sm:$0xff] }
 0x65e   : > { %2181 = vadd.xlane.f32.xlu0 %v2180_v25  ;;  %v2116_v58 = vpop.xlane.xlu1 %2115 }
 0x65f   : > { %v2161_v54 = vmul.f32 %v4737_v37, %v4737_v37  ;;  %v2138_v47 = vmul.f32 0.03125, %v2116_v58 }
 0x661   : > { %v2183_v21 = vsel %vm438_vm0, %v2161_v54, 0.0  ;;  %v4743_v31 = vsub.f32 %v2104_v15, %v2138_v47  ;;  %v2128_v46 = vpop.xlane.xlu0 %2127  ;;  %v5226_v54 = vmov 0.0  }
 0x662   : > { %2184 = vadd.xlane.f32.xlu0 %v2183_v21  ;;  %v2142_v5 = vmul.f32 0.03125, %v2128_v46  ;;  %2363 = vmatprep.mubr.f32.mxu1 %v5226_v54 }
 0x663   : > { %v2154_v28 = vmul.f32 %v4743_v31, %v4743_v31 }
 0x664   : > { %v4747_v53 = vsub.f32 %v2108_v10, %v2142_v5 }
 0x665   : > { %v2162_v8 = vsel %vm438_vm0, %v2154_v28, 0.0 }
 0x666   : > { %2163 = vadd.xlane.f32.xlu1 %v2162_v8  ;;  %v2158_v19 = vmul.f32 %v4747_v53, %v4747_v53 }
 0x668   : > { %v2174_v55 = vsel %vm438_vm0, %v2158_v19, 0.0 }
 0x669   : > { %2175 = vadd.xlane.f32.xlu0 %v2174_v55 }
 0x6db   : > { %v2167_v0 = vpop.xlane.xlu1 %2166 }
 0x6dc   : > { %v2187_v39 = vmul.f32 0.03125, %v2167_v0  ;;  %v3280_v0 = vld [vmem:[%s3645_s29 + $0x18] sm:$0xff] }
 0x6de   : > { %v2195_v62 = vadd.f32 1e-05, %v2187_v39 }
 0x6e0   : > { %3238 = vrsqrt.f32 %v2195_v62  ;;  %v2170_v7 = vpop.xlane.xlu1 %2169  ;;  %v3281_v62 = vld [vmem:[%s3645_s29 + $0x38] sm:$0xff] }
 0x6e1   : > { %v2188_v12 = vmul.f32 0.03125, %v2170_v7 }
 0x6e3   : > { %v2196_v29 = vadd.f32 1e-05, %v2188_v12  ;;  %v2179_v41 = vpop.xlane.xlu0 %2178 }
 0x6e4   : > { %v2173_v48 = vpop.xlane.xlu1 %2172  ;;  %v2191_v35 = vmul.f32 0.03125, %v2179_v41 }
 0x6e5   : > { %3240 = vrsqrt.f32 %v2196_v29  ;;  %v2189_v16 = vmul.f32 0.03125, %v2173_v48 }
 0x6e6   : > { %v2199_v32 = vadd.f32 1e-05, %v2191_v35  ;;  %v4795_v35 = vld [vmem:[#allocation8 + $0xf8] sm:$0xff] }
 0x6e7   : > { %v2197_v27 = vadd.f32 1e-05, %v2189_v16  ;;  %v2182_v17 = vpop.xlane.xlu0 %2181  ;;  %v4799_v16 = vld [vmem:[#allocation8 + $0xe8] sm:$0xff]  ;;  %2452 = vmatprep.subr.mxu0 %v4795_v35 }
 0x6e8   : > { %3242 = vrsqrt.f32 %v2199_v32  ;;  %v2192_v9 = vmul.f32 0.03125, %v2182_v17  ;;  %v4802_v32 = vld [vmem:[#allocation8 + $0xe0] sm:$0xff]  ;;  %v4811_v17 = vld [vmem:[#allocation8 + $0xd0] sm:$0xff] }
 0x6e9   : > { %3244 = vrsqrt.f32 %v2197_v27 }
 0x6ea   : > { %v2200_v50 = vadd.f32 1e-05, %v2192_v9  ;;  %v4814_v9 = vld [vmem:[#allocation8 + $0xc8] sm:$0xff] }
 0x6eb   : > { %v2185_v22 = vpop.xlane.xlu0 %2184 }
 0x6ec   : > { %3246 = vrsqrt.f32 %v2200_v50  ;;  %v2193_v33 = vmul.f32 0.03125, %v2185_v22  ;;  %v4817_v50 = vld [vmem:[#allocation8 + $0xc0] sm:$0xff]  ;;  %v4820_v22 = vld [vmem:[#allocation8 + $0xb8] sm:$0xff] }
 0x6ed   : > { %v3239_v24 = vpop.eup %3238 }
 0x6ee   : > { %v2201_v15 = vadd.f32 1e-05, %v2193_v33  ;;  %v2211_v11 = vmul.f32 %v3239_v24, %v4713_v63  ;;  %v3276_v63 = vld [vmem:[%s3645_s29 + $0x8] sm:$0xff]  ;;  %v4823_v33 = vld [vmem:[#allocation8 + $0xb0] sm:$0xff] }
 0x6ef   : > { %v2164_v10 = vpop.xlane.xlu1 %2163  ;;  %v4826_v24 = vld [vmem:[#allocation8 + $0xa8] sm:$0xff] }
 0x6f0   : > { %3248 = vrsqrt.f32 %v2201_v15  ;;  %v2223_v40 = vmul.f32 %v4756_v51, %v2211_v11  ;;  %v2186_v45 = vmul.f32 0.03125, %v2164_v10  ;;  %v4832_v15 = vld [vmem:[#allocation8 + $0x98] sm:$0xff]  ;;  %v4835_v11 = vld [vmem:[#allocation8 + $0x90] sm:$0xff]  ;;  %v4841_v10 = vld [vmem:[#allocation8 + $0x80] sm:$0xff] }
 0x6f2   : > { %v3241_v14 = vpop.eup %3240  ;;  %v2235_v26 = vadd.f32 %v4762_v1, %v2223_v40  ;;  %v2194_v2 = vadd.f32 1e-05, %v2186_v45  ;;  %v2176_v61 = vpop.xlane.xlu0 %2175  ;;  %v4844_v40 = vld [vmem:[#allocation8 + $0x78] sm:$0xff]  ;;  %v4847_v45 = vld [vmem:[#allocation8 + $0x70] sm:$0xff] }
 0x6f3   : > { %v2212_v18 = vmul.f32 %v3241_v14, %v4718_v52  ;;  %v2190_v60 = vmul.f32 0.03125, %v2176_v61  ;;  %v4850_v14 = vld [vmem:[#allocation8 + $0x68] sm:$0xff]  ;;  %v4859_v61 = vld [vmem:[#allocation8 + $0x50] sm:$0xff] }
 0x6f4   : > { %v2243_v6 = vadd.f32 %v3276_v63, %v2235_v26  ;;  %3250 = vrsqrt.f32 %v2194_v2  ;;  %v4853_v26 = vld [vmem:[#allocation8 + $0x60] sm:$0xff]  ;;  %v4856_v2 = vld [vmem:[#allocation8 + $0x58] sm:$0xff] }
 0x6f5   : > { %v3243_v38 = vpop.eup %3242  ;;  %v2224_v44 = vmul.f32 %v4756_v51, %v2212_v18  ;;  %v2198_v4 = vadd.f32 1e-05, %v2190_v60  ;;  %v4862_v18 = vld [vmem:[#allocation8 + $0x48] sm:$0xff]  ;;  %v4865_v60 = vld [vmem:[#allocation8 + $0x40] sm:$0xff]  ;;  %v4868_v63 = vld [vmem:[#allocation8 + $0x38] sm:$0xff] }
 0x6f6   : > { %v3245_v34 = vpop.eup %3244  ;;  %2251 = vrot.lane.b32.xlu1 %v2243_v6, %s3441_s25  ;;  %v2215_v30 = vmul.f32 %v3243_v38, %v4722_v43  ;;  %v4871_v6 = vld [vmem:[#allocation8 + $0x30] sm:$0xff]  ;;  %v4874_v38 = vld [vmem:[#allocation8 + $0x28] sm:$0xff] }
 0x6f7   : > { %v2236_v3 = vadd.f32 %v4762_v1, %v2224_v44  ;;  %3252 = vrsqrt.f32 %v2198_v4  ;;  %v2213_v13 = vmul.f32 %v3245_v34, %v4724_v42  ;;  %v4877_v44 = vld [vmem:[#allocation8 + $0x20] sm:$0xff]  ;;  %v4880_v34 = vld [vmem:[#allocation8 + $0x18] sm:$0xff]  ;;  %v4883_v4 = vld [vmem:[#allocation8 + $0x10] sm:$0xff] }
 0x6f8   : > { %v2227_v52 = vmul.f32 %v4756_v51, %v2215_v30  ;;  %v4886_v30 = vld [vmem:[#allocation8 + $0x8] sm:$0xff] }
 0x6f9   : > { %v3247_v20 = vpop.eup %3246  ;;  %v2244_v56 = vadd.f32 %v3277_v23, %v2236_v3  ;;  %v2225_v58 = vmul.f32 %v4756_v51, %v2213_v13  ;;  %v4889_v3 = vld [vmem:[#allocation8] sm:$0xff]  ;;  %v4895_v13 = vld [vmem:[#allocation8 + $0x1f0] sm:$0xff] }
 0x6fa   : > { %v2239_v49 = vadd.f32 %v4762_v1, %v2227_v52  ;;  %v2216_v36 = vmul.f32 %v3247_v20, %v4731_v57  ;;  %v3279_v57 = vld [vmem:[%s3645_s29 + $0x30] sm:$0xff]  ;;  %v4892_v52 = vld [vmem:[#allocation8 + $0x1f8] sm:$0xff]  ;;  %v4898_v20 = vld [vmem:[#allocation8 + $0x1e8] sm:$0xff] }
 0x6fb   : > { %2255 = vrot.lane.b32.xlu1 %v2244_v56, %s3442_s27  ;;  %v2237_v5 = vadd.f32 %v4762_v1, %v2225_v58  ;;  %v4901_v23 = vld [vmem:[#allocation8 + $0x1e0] sm:$0xff]  ;;  %v4904_v56 = vld [vmem:[#allocation8 + $0x1d8] sm:$0xff]  ;;  %v4922_v58 = vld [vmem:[#allocation8 + $0x1a8] sm:$0xff] }
 0x6fc   : > { %v2247_v25 = vadd.f32 %v3278_v59, %v2239_v49  ;;  %v2228_v43 = vmul.f32 %v4756_v51, %v2216_v36  ;;  %v4907_v49 = vld [vmem:[#allocation8 + $0x1d0] sm:$0xff]  ;;  %v4910_v36 = vld [vmem:[#allocation8 + $0x1c8] sm:$0xff]  ;;  %v4913_v59 = vld [vmem:[#allocation8 + $0x1c0] sm:$0xff] }
 0x6fd   : > { %v3249_v42 = vpop.eup %3248  ;;  %v2245_v39 = vadd.f32 %v3280_v0, %v2237_v5  ;;  %v4940_v5 = vld [vmem:[#allocation8 + $0x178] sm:$0xff]  ;;  %v4955_v0 = vld [vmem:[#allocation8 + $0x150] sm:$0xff] }
 0x6fe   : > { %2263 = vrot.lane.b32.xlu0 %v2247_v25, %s3441_s25  ;;  %v2240_v47 = vadd.f32 %v4762_v1, %v2228_v43  ;;  %v2217_v21 = vmul.f32 %v3249_v42, %v4737_v37  ;;  %v4916_v25 = vld [vmem:[#allocation8 + $0x1b8] sm:$0xff]  ;;  %v4919_v43 = vld [vmem:[#allocation8 + $0x1b0] sm:$0xff]  ;;  %v4925_v42 = vld [vmem:[#allocation8 + $0x1a0] sm:$0xff]  ;;  %5263 = vst [vmem:[#allocation17_spill] sm:$0xff] %v4940_v5 }
 0x6ff   : > { %5268 = vst [vmem:[#allocation22_spill] sm:$0xff] %v4955_v0 }
 0x700   : > { %v2248_v46 = vadd.f32 %v3279_v57, %v2240_v47  ;;  %v2229_v28 = vmul.f32 %v4756_v51, %v2217_v21  ;;  %v4928_v47 = vld [vmem:[#allocation8 + $0x198] sm:$0xff]  ;;  %v4931_v21 = vld [vmem:[#allocation8 + $0x190] sm:$0xff]  ;;  %v4934_v57 = vld [vmem:[#allocation8 + $0x188] sm:$0xff] }
 0x701   : > { %v3251_v8 = vpop.eup %3250  ;;  %5260 = vst [vmem:[#allocation14_spill] sm:$0xff] %v4931_v21  ;;  %5261 = vst [vmem:[#allocation15_spill] sm:$0xff] %v4934_v57 }
 0x702   : > { %2267 = vrot.lane.b32.xlu1 %v2248_v46, %s3442_s27  ;;  %v2241_v19 = vadd.f32 %v4762_v1, %v2229_v28  ;;  %v2210_v55 = vmul.f32 %v3251_v8, %v4743_v31  ;;  %v4797_v31 = vld [vmem:[#allocation8 + $0xf0] sm:$0xff]  ;;  %v4937_v46 = vld [vmem:[#allocation8 + $0x180] sm:$0xff]  ;;  %v4946_v8 = vld [vmem:[#allocation8 + $0x168] sm:$0xff] }
 0x703   : > { %2453 = vmatpush1.msra.mxu0 %v4797_v31  ;;  %5262 = vst [vmem:[#allocation16_spill] sm:$0xff] %v4937_v46  ;;  %v4943_v28 = vld [vmem:[#allocation8 + $0x170] sm:$0xff]  ;;  %5265 = vst [vmem:[#allocation19_spill] sm:$0xff] %v4946_v8 }
 0x704   : > { %v2249_v7 = vadd.f32 %v3281_v62, %v2241_v19  ;;  %v3253_v12 = vpop.eup %3252  ;;  %v2222_v29 = vmul.f32 %v4756_v51, %v2210_v55  ;;  %2454 = vmatprep.subr.mxu0 %v4799_v16  ;;  %5264 = vst [vmem:[#allocation18_spill] sm:$0xff] %v4943_v28  ;;  %v4949_v19 = vld [vmem:[#allocation8 + $0x160] sm:$0xff]  ;;  %v4952_v55 = vld [vmem:[#allocation8 + $0x158] sm:$0xff] }
 0x705   : > { %v2214_v37 = vmul.f32 %v3253_v12, %v4747_v53  ;;  %v4808_v53 = vld [vmem:[#allocation8 + $0xd8] sm:$0xff]  ;;  %2455 = vmatpush1.msra.mxu0 %v4802_v32  ;;  %5266 = vst [vmem:[#allocation20_spill] sm:$0xff] %v4949_v19  ;;  %5267 = vst [vmem:[#allocation21_spill] sm:$0xff] %v4952_v55  ;;  %v4961_v62 = vld [vmem:[#allocation8 + $0x140] sm:$0xff] }
 0x706   : > { %2259 = vrot.lane.b32.xlu1 %v2245_v39, %s3444_s2  ;;  %2271 = vrot.lane.b32.xlu0 %v2249_v7, %s3444_s2  ;;  %v4792_v41 = vadd.f32 %v4762_v1, %v2222_v29  ;;  %v4958_v39 = vld [vmem:[#allocation8 + $0x148] sm:$0xff]  ;;  %5270 = vst [vmem:[#allocation24_spill] sm:$0xff] %v4961_v62  ;;  %v4964_v7 = vld [vmem:[#allocation8 + $0x138] sm:$0xff]  ;;  %v4967_v12 = vld [vmem:[#allocation8 + $0x130] sm:$0xff]  ;;  %s5141_s2 = scalar_lea.vmem [#allocation9], %s2850_s12  ;;  %s2904_s12 = sshll.u32 %s3527_s4, 10 }
 0x707   : > { %v2226_v48 = vmul.f32 %v4756_v51, %v2214_v37  ;;  %2456 = vmatprep.subr.mxu0 %v4808_v53  ;;  %v4829_v51 = vld [vmem:[#allocation8 + $0xa0] sm:$0xff]  ;;  %5269 = vst [vmem:[#allocation23_spill] sm:$0xff] %v4958_v39  ;;  %5271 = vst [vmem:[#allocation25_spill] sm:$0xff] %v4964_v7  ;;  %v4970_v29 = vld [vmem:[#allocation8 + $0x128] sm:$0xff]  ;;  %s2749_s14 = sshll.u32 %s5141_s2, 4  ;;  %s5162_s22 = scalar_lea.hbm %s5219_s10, %s2904_s12  ;;  %s5164_s14 = int_to_ptr.vmem [resolvable:$true] %s2749_s14 }
 0x708   : > { %2457 = vmatpush1.msra.mxu0 %v4811_v17  ;;  %5272 = vst [vmem:[#allocation26_spill] sm:$0xff] %v4967_v12  ;;  %5273 = vst [vmem:[#allocation27_spill] sm:$0xff] %v4970_v29  ;;  %v4973_v37 = vld [vmem:[#allocation8 + $0x120] sm:$0xff]  ;;  %s3364_s4 = scalar_lea.vmem %s5164_s14, 1024  ;;  %p3371_p13 = scmp.lt.s32.totalorder %s5164_s14, %s3369_s24 }
 0x709   : > { %v4805_v27 = vadd.f32 %v4762_v1, %v2226_v48  ;;  %2458 = vmatprep.subr.mxu0 %v4814_v9  ;;  %v4838_v1 = vld [vmem:[#allocation8 + $0x88] sm:$0xff]  ;;  %5274 = vst [vmem:[#allocation28_spill] sm:$0xff] %v4973_v37  ;;  %p3365_p10 = scmp.ne.s32.totalorder %s5164_s14, %s3364_s4  ;;  %p3372_p0 = scmp.lt.s32.totalorder %s3370_s11, %s3364_s4 }
 0x70a   : > { %2459 = vmatpush1.msra.mxu0 %v4817_v50 }
 0x70b   : > { %2460 = vmatprep.subr.mxu0 %v4820_v22  ;;  %p3366_p7 = pnand %p3365_p10, %p5291_p2  ;;  %p3373_p5 = por %p3372_p0, %p3371_p13 }
 0x70c   : > { %2461 = vmatpush1.msra.mxu0 %v4823_v33 }
 0x70d   : > { %2462 = vmatprep.subr.mxu0 %v4826_v24  ;;  %p3367_p12 = pneg %p3366_p7 }
 0x70e   : > { %2463 = vmatpush1.msra.mxu0 %v4829_v51 }
 0x70f   : > { %2464 = vmatprep.subr.mxu0 %v4832_v15  ;;  %p3374_p3 = pnand %p3373_p5, %p3367_p12 }
 0x710   : > { %2465 = vmatpush1.msra.mxu0 %v4835_v11 }
 0x711   : > { %2466 = vmatprep.subr.mxu0 %v4838_v1 }
 0x712   : > { %2467 = vmatpush1.msra.mxu0 %v4841_v10 }
 0x713   : > { %2468 = vmatprep.subr.mxu0 %v4844_v40 }
 0x714   : > { %2469 = vmatpush1.msra.mxu0 %v4847_v45 }
 0x715   : > { %2470 = vmatprep.subr.mxu0 %v4850_v14 }
 0x716   : > { %2471 = vmatpush1.msra.mxu0 %v4853_v26 }
 0x717   : > { %2472 = vmatprep.subr.mxu0 %v4856_v2 }
 0x718   : > { %2473 = vmatpush1.msra.mxu0 %v4859_v61 }
 0x719   : > { %2474 = vmatprep.subr.mxu0 %v4862_v18 }
 0x71a   : > { %2475 = vmatpush1.msra.mxu0 %v4865_v60 }
 0x71b   : > { %2476 = vmatprep.subr.mxu0 %v4868_v63 }
 0x71c   : > { %2477 = vmatpush1.msra.mxu0 %v4871_v6 }
 0x71d   : > { %2478 = vmatprep.subr.mxu0 %v4874_v38 }
 0x71e   : > { %2479 = vmatpush1.msra.mxu0 %v4877_v44 }
 0x71f   : > { %2480 = vmatprep.subr.mxu0 %v4880_v34 }
 0x720   : > { %2481 = vmatpush1.msra.mxu0 %v4883_v4 }
 0x721   : > { %2482 = vmatprep.subr.mxu0 %v4886_v30 }
 0x722   : > { %2483 = vmatpush1.msra.mxu0 %v4889_v3 }
 0x723   : > { %2484 = vmatprep.subr.mxu0 %v4892_v52 }
 0x724   : > { %2485 = vmatpush2.msra.mxu0 %v4895_v13 }
 0x725   : > { %2486 = vmatprep.subr.mxu0 %v4898_v20 }
 0x726   : > { %2487 = vmatpush2.msra.mxu0 %v4901_v23 }
 0x727   : > { %2488 = vmatprep.subr.mxu0 %v4904_v56 }
 0x728   : > { %2489 = vmatpush2.msra.mxu0 %v4907_v49 }
 0x729   : > { %2490 = vmatprep.subr.mxu0 %v4910_v36 }
 0x72a   : > { %2491 = vmatpush2.msra.mxu0 %v4913_v59 }
 0x72b   : > { %2492 = vmatprep.subr.mxu0 %v4916_v25 }
 0x72c   : > { %2493 = vmatpush2.msra.mxu0 %v4919_v43 }
 0x72d   : > { %2494 = vmatprep.subr.mxu0 %v4922_v58 }
 0x72e   : > { %2495 = vmatpush2.msra.mxu0 %v4925_v42 }
 0x72f   : > { %2496 = vmatprep.subr.mxu0 %v4928_v47 }
 0x730   : > { %2497 = vmatpush2.msra.mxu0 %v4931_v21  ;;  %v2282_v21 = vld [vmem:[%s5218_s9] sm:$0xff] }
 0x731   : > { %2498 = vmatprep.subr.mxu0 %v4934_v57 }
 0x732   : > { %2499 = vmatpush2.msra.mxu0 %v4937_v46 }
 0x733   : > { %2500 = vmatprep.subr.mxu0 %v4940_v5 }
 0x734   : > { %2501 = vmatpush2.msra.mxu0 %v4943_v28 }
 0x735   : > { %2502 = vmatprep.subr.mxu0 %v4946_v8 }
 0x736   : > { %2503 = vmatpush2.msra.mxu0 %v4949_v19 }
 0x737   : > { %2504 = vmatprep.subr.mxu0 %v4952_v55  ;;  %v3282_v55 = vld [vmem:[%s3645_s29] sm:$0xff] }
 0x738   : > { %2505 = vmatpush2.msra.mxu0 %v4955_v0  ;;  %v2242_v19 = vadd.f32 %v3282_v55, %v4792_v41  ;;  %v5275_v41 = vmov 0.0  }
 0x739   : > { %2506 = vmatprep.subr.mxu0 %v4958_v39 }
 0x73a   : > { %2507 = vmatpush2.msra.mxu0 %v4961_v62  ;;  %v3283_v62 = vld [vmem:[%s3645_s29 + $0x20] sm:$0xff] }
 0x73b   : > { %2508 = vmatprep.subr.mxu0 %v4964_v7  ;;  %v2246_v8 = vadd.f32 %v3283_v62, %v4805_v27  ;;  %v5278_v27 = vld [vmem:[#allocation16_spill] sm:$0xff] }
 0x73c   : > { %2509 = vmatpush2.msra.mxu0 %v4967_v12 }
 0x73d   : > { %2510 = vmatprep.subr.mxu0 %v4970_v29 }
 0x73e   : > { %2511 = vmatpush2.msra.mxu0 %v4973_v37 }
 0x768   : > { %v2252_v48 = vpop.permute.xlu1 %2251 }
 0x769   : > { %v2274_v7 = vsel %vm438_vm0, %v2242_v19, %v2252_v48 }
 0x76d   : > { %v2256_v54 = vpop.permute.xlu1 %2255 }
 0x76e   : > { %v2276_v28 = vsel %vm2275_vm1, %v2274_v7, %v2256_v54  ;;  %v2283_v54 = vld [vmem:[%s5218_s9 + $0x8] sm:$0xff] }
 0x770   : > { %v2264_v39 = vpop.permute.xlu0 %2263 }
 0x771   : > { %v2279_v12 = vsel %vm438_vm0, %v2246_v8, %v2264_v39 }
 0x774   : > { %v2268_v0 = vpop.permute.xlu1 %2267 }
 0x775   : > { %v2280_v29 = vsel %vm2275_vm1, %v2279_v12, %v2268_v0 }
 0x778   : > { %v2260_v5 = vpop.permute.xlu1 %2259  ;;  %v2272_v37 = vpop.permute.xlu0 %2271 }
 0x779   : > { %v2278_v46 = vsel %vm2277_vm2, %v2276_v28, %v2260_v5  ;;  %v2281_v57 = vsel %vm2277_vm2, %v2280_v29, %v2272_v37  ;;  %v2688_v28 = vlaneseq }
 0x77a   : > { %2329 = vmatprep.subr.mxu1 %v2281_v57 }
 0x77b   : > { %2330 = vmatpush1.msra.mxu1 %v2278_v46  ;;  %v2689_v48 = vshrl.u32 %v2688_v28, 7 }
 0x77c   : > { %2893 = vmatmul.mubr.msk.f32.vlgmr.msra.gmra.mxu1 %vm2286_vm3, %v2282_v21  ;;  %2549 = vmatprep.subr.mxu1 %v4795_v35  ;;  %v2284_v35 = vld [vmem:[%s5218_s9 + $0x10] sm:$0xff] }
 0x77d   : > { %2369 = vmatprep.mubr.f32.mxu1 %v5275_v41  ;;  %2550 = vmatpush1.msra.mxu1 %v4797_v31  ;;  %v2285_v31 = vld [vmem:[%s5218_s9 + $0x18] sm:$0xff] }
 0x77e   : > { %2551 = vmatprep.subr.mxu1 %v4799_v16  ;;  %v5276_v16 = vld [vmem:[#allocation14_spill] sm:$0xff] }
 0x77f   : > { %2552 = vmatpush1.msra.mxu1 %v4802_v32  ;;  %v5277_v32 = vld [vmem:[#allocation15_spill] sm:$0xff] }
 0x780   : > { %2894 = vmatmul.mubr.msk.f32.gmra.mxu1 %vm2286_vm3, %v2283_v54  ;;  %2553 = vmatprep.subr.mxu1 %v4808_v53  ;;  %v5279_v53 = vld [vmem:[#allocation17_spill] sm:$0xff] }
 0x781   : > { %2375 = vmatprep.mubr.f32.mxu1 %v5275_v41  ;;  %2554 = vmatpush1.msra.mxu1 %v4811_v17  ;;  %v5280_v17 = vld [vmem:[#allocation18_spill] sm:$0xff] }
 0x782   : > { %2555 = vmatprep.subr.mxu1 %v4814_v9  ;;  %v5281_v9 = vld [vmem:[#allocation19_spill] sm:$0xff] }
 0x783   : > { %2556 = vmatpush1.msra.mxu1 %v4817_v50  ;;  %v5282_v50 = vld [vmem:[#allocation20_spill] sm:$0xff] }
 0x784   : > { %2895 = vmatmul.mubr.msk.f32.gmra.mxu1 %vm2286_vm3, %v2284_v35  ;;  %2557 = vmatprep.subr.mxu1 %v4820_v22  ;;  %v5283_v22 = vld [vmem:[#allocation21_spill] sm:$0xff] }
 0x785   : > { %2381 = vmatprep.mubr.f32.mxu1 %v5275_v41  ;;  %2558 = vmatpush1.msra.mxu1 %v4823_v33  ;;  %v5284_v33 = vld [vmem:[#allocation22_spill] sm:$0xff] }
 0x786   : > { %2559 = vmatprep.subr.mxu1 %v4826_v24  ;;  %v5285_v24 = vld [vmem:[#allocation23_spill] sm:$0xff] }
 0x787   : > { %2560 = vmatpush1.msra.mxu1 %v4829_v51  ;;  %v5286_v51 = vld [vmem:[#allocation24_spill] sm:$0xff] }
 0x788   : > { %2896 = vmatmul.mubr.msk.f32.gmra.mxu1 %vm2286_vm3, %v2285_v31  ;;  %2561 = vmatprep.subr.mxu1 %v4832_v15  ;;  %v5287_v15 = vld [vmem:[#allocation25_spill] sm:$0xff] }
 0x789   : > { %2562 = vmatpush1.msra.mxu1 %v4835_v11  ;;  %v5288_v11 = vld [vmem:[#allocation26_spill] sm:$0xff] }
 0x78a   : > { %2563 = vmatprep.subr.mxu1 %v4838_v1  ;;  %v5289_v1 = vld [vmem:[#allocation27_spill] sm:$0xff] }
 0x78b   : > { %2564 = vmatpush1.msra.mxu1 %v4841_v10  ;;  %v5290_v10 = vld [vmem:[#allocation28_spill] sm:$0xff] }
 0x78c   : > { %2565 = vmatprep.subr.mxu1 %v4844_v40  ;;  %v2423_v40 = vld [vmem:[#allocation8 + $0x118] sm:$0xff] }
 0x78d   : > { %2566 = vmatpush1.msra.mxu1 %v4847_v45  ;;  %v2422_v45 = vld [vmem:[#allocation8 + $0x110] sm:$0xff]  ;;  %2512 = vmatprep.subr.mxu0 %v2423_v40 }
 0x78e   : > { %2567 = vmatprep.subr.mxu1 %v4850_v14  ;;  %2513 = vmatpush2.msra.mxu0 %v2422_v45  ;;  %v2421_v14 = vld [vmem:[#allocation8 + $0x108] sm:$0xff] }
 0x78f   : > { %2568 = vmatpush1.msra.mxu1 %v4853_v26  ;;  %v2420_v26 = vld [vmem:[#allocation8 + $0x100] sm:$0xff]  ;;  %2514 = vmatprep.subr.mxu0 %v2421_v14 }
 0x790   : > { %2569 = vmatprep.subr.mxu1 %v4856_v2  ;;  %2515 = vmatpush2.msra.mxu0 %v2420_v26 }
 0x791   : > { %2570 = vmatpush1.msra.mxu1 %v4859_v61 }
 0x792   : > { %2571 = vmatprep.subr.mxu1 %v4862_v18 }
 0x793   : > { %2572 = vmatpush1.msra.mxu1 %v4865_v60 }
 0x794   : > { %2573 = vmatprep.subr.mxu1 %v4868_v63 }
 0x795   : > { %2574 = vmatpush1.msra.mxu1 %v4871_v6 }
 0x796   : > { %2575 = vmatprep.subr.mxu1 %v4874_v38 }
 0x797   : > { %2576 = vmatpush1.msra.mxu1 %v4877_v44 }
 0x798   : > { %2577 = vmatprep.subr.mxu1 %v4880_v34 }
 0x799   : > { %2578 = vmatpush1.msra.mxu1 %v4883_v4 }
 0x79a   : > { %2579 = vmatprep.subr.mxu1 %v4886_v30 }
 0x79b   : > { %2580 = vmatpush1.msra.mxu1 %v4889_v3 }
 0x79c   : > { %2581 = vmatprep.subr.mxu1 %v4892_v52 }
 0x79d   : > { %2582 = vmatpush2.msra.mxu1 %v4895_v13 }
 0x79e   : > { %2583 = vmatprep.subr.mxu1 %v4898_v20 }
 0x79f   : > { %2584 = vmatpush2.msra.mxu1 %v4901_v23 }
 0x7a0   : > { %2585 = vmatprep.subr.mxu1 %v4904_v56 }
 0x7a1   : > { %2586 = vmatpush2.msra.mxu1 %v4907_v49 }
 0x7a2   : > { %2587 = vmatprep.subr.mxu1 %v4910_v36 }
 0x7a3   : > { %2588 = vmatpush2.msra.mxu1 %v4913_v59 }
 0x7a4   : > { %2589 = vmatprep.subr.mxu1 %v4916_v25 }
 0x7a5   : > { %2590 = vmatpush2.msra.mxu1 %v4919_v43 }
 0x7a6   : > { %2591 = vmatprep.subr.mxu1 %v4922_v58 }
 0x7a7   : > { %2592 = vmatpush2.msra.mxu1 %v4925_v42 }
 0x7a8   : > { %2593 = vmatprep.subr.mxu1 %v4928_v47 }
 0x7a9   : > { %2594 = vmatpush2.msra.mxu1 %v5276_v16 }
 0x7aa   : > { %2595 = vmatprep.subr.mxu1 %v5277_v32 }
 0x7ab   : > { %2596 = vmatpush2.msra.mxu1 %v5278_v27 }
 0x7ac   : > { %2597 = vmatprep.subr.mxu1 %v5279_v53 }
 0x7ad   : > { %2598 = vmatpush2.msra.mxu1 %v5280_v17 }
 0x7ae   : > { %2599 = vmatprep.subr.mxu1 %v5281_v9 }
 0x7af   : > { %2600 = vmatpush2.msra.mxu1 %v5282_v50  ;;  %v2690_v50 = vsub.s32 0, %v2689_v48 }
 0x7b0   : > { %2601 = vmatprep.subr.mxu1 %v5283_v22 }
 0x7b1   : > { %2602 = vmatpush2.msra.mxu1 %v5284_v33 }
 0x7b2   : > { %2603 = vmatprep.subr.mxu1 %v5285_v24  ;;  %v2686_v24 = vld [vmem:[%s5216_s7] ss:$2 sm:$0x3] }
 0x7b3   : > { %2604 = vmatpush2.msra.mxu1 %v5286_v51 }
 0x7b4   : > { %2605 = vmatprep.subr.mxu1 %v5287_v15 }
 0x7b5   : > { %2606 = vmatpush2.msra.mxu1 %v5288_v11  ;;  %v2897_v11 = vld [vmem:[%s5216_s7 + $0x1] ss:$2 sm:$0x3] }
 0x7b6   : > { %2607 = vmatprep.subr.mxu1 %v5289_v1  ;;  %v2694_v1 = vsub.s32 1, %v2689_v48 }
 0x7b7   : > { %2608 = vmatpush2.msra.mxu1 %v5290_v10 }
 0x7b8   : > { %2609 = vmatprep.subr.mxu1 %v2423_v40 }
 0x7b9   : > { %2610 = vmatpush2.msra.mxu1 %v2422_v45 }
 0x7ba   : > { %2611 = vmatprep.subr.mxu1 %v2421_v14  ;;  %v2691_v14 = vrot.slane %v2686_v24, %v2690_v50 }
 0x7bb   : > { %2612 = vmatpush2.msra.mxu1 %v2420_v26 }
 0x83c   : > { %v5063_v2 = vpop.f32.mrf.mxu1 }
 0x83d   : > { %v2541_v60 = vmul.f32 %v5063_v2, %v5063_v2 }
 0x83e   : > { %v5065_v61 = vpop.f32.mrf.mxu1 }
 0x83f   : > { %v2542_v18 = vmul.f32 %v5065_v61, %v5065_v61  ;;  %2516 = vmatprep.mubr.f32.mxu0 %v5065_v61 }
 0x840   : > { %v5072_v63 = vpop.f32.mrf.mxu1  ;;  %2517 = vmatmul.mubr.f32.vlgmr.msra.gmra.mxu0 %v5063_v2 }
 0x841   : > { %2613 = vmatprep.mubr.f32.mxu1 %v2542_v18  ;;  %v2543_v44 = vmul.f32 %v5072_v63, %v5072_v63 }
 0x842   : > { %v5075_v6 = vpop.f32.mrf.mxu1  ;;  %2614 = vmatmul.mubr.f32.vlgmr.msra.gmra.mxu1 %v2541_v60  ;;  %v2712_v60 = vrot.slane %v2897_v11, %v2690_v50 }
 0x843   : > { %v2544_v38 = vmul.f32 %v5075_v6, %v5075_v6  ;;  %2522 = vmatprep.mubr.f32.mxu0 %v5075_v6 }
 0x844   : > { %v5082_v34 = vpop.f32.mrf.mxu1  ;;  %2523 = vmatmul.mubr.f32.gmra.mxu0 %v5072_v63 }
 0x845   : > { %2619 = vmatprep.mubr.f32.mxu1 %v2544_v38  ;;  %v2545_v3 = vmul.f32 %v5082_v34, %v5082_v34 }
 0x846   : > { %v5085_v4 = vpop.f32.mrf.mxu1  ;;  %2620 = vmatmul.mubr.f32.gmra.mxu1 %v2543_v44 }
 0x847   : > { %v2546_v30 = vmul.f32 %v5085_v4, %v5085_v4  ;;  %2528 = vmatprep.mubr.f32.mxu0 %v5085_v4 }
 0x848   : > { %v5092_v52 = vpop.f32.mrf.mxu1  ;;  %2529 = vmatmul.mubr.f32.gmra.mxu0 %v5082_v34 }
 0x849   : > { %2625 = vmatprep.mubr.f32.mxu1 %v2546_v30  ;;  %v2547_v23 = vmul.f32 %v5092_v52, %v5092_v52  ;;  %v2695_v30 = vrot.slane %v2686_v24, %v2694_v1 }
 0x84a   : > { %v5095_v13 = vpop.f32.mrf.mxu1  ;;  %2626 = vmatmul.mubr.f32.gmra.mxu1 %v2545_v3 }
 0x84b   : > { %v2548_v20 = vmul.f32 %v5095_v13, %v5095_v13  ;;  %2534 = vmatprep.mubr.f32.mxu0 %v5095_v13 }
 0x84c   : > { %2535 = vmatmul.mubr.f32.gmra.mxu0 %v5092_v52 }
 0x84d   : > { %2631 = vmatprep.mubr.f32.mxu1 %v2548_v20 }
 0x84e   : > { %2632 = vmatmul.mubr.f32.gmra.mxu1 %v2547_v23 }
 0x900   : > { %v2518_v56 = vpop.f32.mrf.mxu0 }
 0x901   : > { %v2646_v49 = vmul.f32 %v2518_v56, %v2518_v56  ;;  %v2638_v45 = vsub.f32 %v5063_v2, %v2518_v56 }
 0x902   : > { %v2520_v36 = vpop.f32.mrf.mxu0  ;;  %v2615_v59 = vpop.f32.mrf.mxu1 }
 0x903   : > { %v2647_v25 = vmul.f32 %v2520_v36, %v2520_v36  ;;  %v2654_v43 = vsub.f32 %v2615_v59, %v2646_v49  ;;  %v2639_v38 = vsub.f32 %v5065_v61, %v2520_v36  ;;  %v2716_v49 = vrot.slane %v2897_v11, %v2694_v1 }
 0x904   : > { %v5103_v58 = vpop.f32.mrf.mxu0  ;;  %v2617_v42 = vpop.f32.mrf.mxu1 }
 0x905   : > { %v2662_v47 = vadd.f32 1e-05, %v2654_v43  ;;  %v2648_v21 = vmul.f32 %v5103_v58, %v5103_v58  ;;  %v2655_v57 = vsub.f32 %v2617_v42, %v2647_v25  ;;  %v2640_v59 = vsub.f32 %v5072_v63, %v5103_v58 }
 0x906   : > { %v5107_v46 = vpop.f32.mrf.mxu0  ;;  %v2621_v5 = vpop.f32.mrf.mxu1 }
 0x907   : > { %3254 = vrsqrt.f32 %v2662_v47  ;;  %v2663_v8 = vadd.f32 1e-05, %v2655_v57  ;;  %v2649_v19 = vmul.f32 %v5107_v46, %v5107_v46  ;;  %v2656_v55 = vsub.f32 %v2621_v5, %v2648_v21 }
 0x908   : > { %v5111_v0 = vpop.f32.mrf.mxu0  ;;  %v2623_v39 = vpop.f32.mrf.mxu1  ;;  %v2641_v43 = vsub.f32 %v5075_v6, %v5107_v46 }
 0x909   : > { %3256 = vrsqrt.f32 %v2663_v8  ;;  %v2650_v62 = vmul.f32 %v5111_v0, %v5111_v0  ;;  %v2657_v7 = vsub.f32 %v2623_v39, %v2649_v19  ;;  %v2664_v12 = vadd.f32 1e-05, %v2656_v55 }
 0x90a   : > { %v5115_v29 = vpop.f32.mrf.mxu0  ;;  %v2627_v37 = vpop.f32.mrf.mxu1  ;;  %v2642_v36 = vsub.f32 %v5082_v34, %v5111_v0 }
 0x90b   : > { %v2665_v41 = vadd.f32 1e-05, %v2657_v7  ;;  %v2651_v54 = vmul.f32 %v5115_v29, %v5115_v29  ;;  %v2658_v35 = vsub.f32 %v2627_v37, %v2650_v62  ;;  %3258 = vrsqrt.f32 %v2664_v12 }
 0x90c   : > { %v5119_v31 = vpop.f32.mrf.mxu0  ;;  %v2629_v16 = vpop.f32.mrf.mxu1  ;;  %v2643_v5 = vsub.f32 %v5085_v4, %v5115_v29 }
 0x90d   : > { %3260 = vrsqrt.f32 %v2665_v41  ;;  %v2666_v32 = vadd.f32 1e-05, %v2658_v35  ;;  %v2652_v27 = vmul.f32 %v5119_v31, %v5119_v31  ;;  %v2659_v53 = vsub.f32 %v2629_v16, %v2651_v54 }
 0x90e   : > { %v5123_v17 = vpop.f32.mrf.mxu0  ;;  %v2633_v9 = vpop.f32.mrf.mxu1  ;;  %v2644_v34 = vsub.f32 %v5092_v52, %v5119_v31 }
 0x90f   : > { %3262 = vrsqrt.f32 %v2666_v32  ;;  %v2653_v22 = vmul.f32 %v5123_v17, %v5123_v17  ;;  %v2660_v33 = vsub.f32 %v2633_v9, %v2652_v27  ;;  %v2667_v51 = vadd.f32 1e-05, %v2659_v53 }
 0x910   : > { %v2635_v15 = vpop.f32.mrf.mxu1  ;;  %v2645_v62 = vsub.f32 %v5095_v13, %v5123_v17 }
 0x911   : > { %v2668_v10 = vadd.f32 1e-05, %v2660_v33  ;;  %v2661_v40 = vsub.f32 %v2635_v15, %v2653_v22  ;;  %3264 = vrsqrt.f32 %v2667_v51 }
 0x913   : > { %3266 = vrsqrt.f32 %v2668_v10  ;;  %v2669_v26 = vadd.f32 1e-05, %v2661_v40 }
 0x914   : > { %v3255_v18 = vpop.eup %3254 }
 0x915   : > { %v2678_v44 = vmul.f32 %v3255_v18, %v2638_v45  ;;  %3268 = vrsqrt.f32 %v2669_v26 }
 0x916   : > { %v3257_v3 = vpop.eup %3256 }
 0x917   : > { %v2698_v20 = vmul.f32 %v2691_v14, %v2678_v44  ;;  %v2679_v23 = vmul.f32 %v3257_v3, %v2639_v38 }
 0x918   : > { %v3259_v25 = vpop.eup %3258 }
 0x919   : > { %v2719_v2 = vadd.f32 %v2712_v60, %v2698_v20  ;;  %v2699_v56 = vmul.f32 %v2695_v30, %v2679_v23  ;;  %v2680_v47 = vmul.f32 %v3259_v25, %v2640_v59 }
 0x91a   : > { %v3261_v42 = vpop.eup %3260 }
 0x91b   : > { %2727 = vst [vmem:[%s5141_s2] sm:$0xff] %v2719_v2  ;;  %v2720_v61 = vadd.f32 %v2716_v49, %v2699_v56  ;;  %v2681_v63 = vmul.f32 %v3261_v42, %v2641_v43  ;;  %v2700_v21 = vmul.f32 %v2691_v14, %v2680_v47 }
 0x91c   : > { %v3263_v58 = vpop.eup %3262 }
 0x91d   : > { %2728 = vst [vmem:[%s5141_s2 + $0x8] sm:$0xff] %v2720_v61  ;;  %v2701_v57 = vmul.f32 %v2695_v30, %v2681_v63  ;;  %v2682_v6 = vmul.f32 %v3263_v58, %v2642_v36  ;;  %v2721_v46 = vadd.f32 %v2712_v60, %v2700_v21 }
 0x91e   : > { %v3265_v28 = vpop.eup %3264 }
 0x91f   : > { %v2722_v8 = vadd.f32 %v2716_v49, %v2701_v57  ;;  %v2702_v19 = vmul.f32 %v2691_v14, %v2682_v6  ;;  %2729 = vst [vmem:[%s5141_s2 + $0x10] sm:$0xff] %v2721_v46  ;;  %v2683_v0 = vmul.f32 %v3265_v28, %v2643_v5 }
 0x920   : > { %v3267_v55 = vpop.eup %3266 }
 0x921   : > { %2730 = vst [vmem:[%s5141_s2 + $0x18] sm:$0xff] %v2722_v8  ;;  %v2723_v39 = vadd.f32 %v2712_v60, %v2702_v19  ;;  %v2684_v7 = vmul.f32 %v3267_v55, %v2644_v34  ;;  %v2703_v12 = vmul.f32 %v2695_v30, %v2683_v0 }
 0x922   : > { %v3269_v4 = vpop.eup %3268 }
 0x923   : > { %2731 = vst [vmem:[%s5141_s2 + $0x20] sm:$0xff] %v2723_v39  ;;  %v2704_v29 = vmul.f32 %v2691_v14, %v2684_v7  ;;  %v2685_v37 = vmul.f32 %v3269_v4, %v2645_v62  ;;  %v2724_v52 = vadd.f32 %v2716_v49, %v2703_v12 }
 0x925   : > { %v2725_v48 = vadd.f32 %v2712_v60, %v2704_v29  ;;  %v2705_v41 = vmul.f32 %v2695_v30, %v2685_v37  ;;  %2732 = vst [vmem:[%s5141_s2 + $0x28] sm:$0xff] %v2724_v52 }
 0x927   : > { %2733 = vst [vmem:[%s5141_s2 + $0x30] sm:$0xff] %v2725_v48  ;;  %v2726_v13 = vadd.f32 %v2716_v49, %v2705_v41 }
 0x929   : > { %2734 = vst [vmem:[%s5141_s2 + $0x38] sm:$0xff] %v2726_v13 }
 0x92a   : > { %3377 = shalt.err (!%p3374_p3)
}
 0x92b   : > { %s3378_s19 = scalar_lea.hbm %s5162_s22, 1024  ;;  %s3382_s27 = scalar_lea.hbm %s5219_s10, 2048 }
 0x92c   : > { %p3379_p11 = scmp.ne.s32.totalorder %s5162_s22, %s3378_s19  ;;  %p3383_p4 = scmp.lt.s32.totalorder %s5162_s22, %s5219_s10 }
 0x92d   : > { %p3384_p6 = scmp.lt.s32.totalorder %s3382_s27, %s3378_s19 }
 0x92e   : > { %p3380_p9 = pnand %p3379_p11, %p5291_p2 }
 0x92f   : > { %p3385_p8 = por %p3384_p6, %p3383_p4 }
 0x930   : > { %p3381_p1 = pneg %p3380_p9 }
 0x932   : > { %p3386_p10 = pnand %p3385_p8, %p3381_p1 }
 0x934   : > { %3389 = shalt.err (!%p3386_p10)
}
 0x935   : > { %s3446_s23 = smov 256   ;;  %s3447_s29 = smov 16  }
 0x936   : > { %3011 = dma.vmem_to_hbm [thread:$0]  (%p5291_p2), %s5164_s14, 1024, %s5162_s22, %s2736_s30, %s3446_s23, %s3446_s23, %s3447_s29  }
 0x937 PF: > { %s2764_s4 = sand.u32 1, %s3420_s15   ;;  %p5292_p7 = scmp.ne.s32.totalorder %s5246_s21, 0 }
 0x938   : > { %p5293_p12 = scmp.ge.s32.totalorder %s3432_s18, 2  ;;  %s2765_s20 = scalar_lea.sflag [#allocation5], %s2764_s4 }
 0x93a   : > { %p3025_p13 = pnand %p5293_p12, %p5292_p7 }
 0x93c   : > { %p3026_p0 = pneg %p3025_p13 }
 0x93e   : > { %3415 = dma.done.wait (%p3026_p0), %s2765_s20, 1024  }
 0x93f   : > { %3417 = vsyncadd (%p3026_p0), %s2765_s20, 4294966272  ;;  %s5294_s24 = sld [smem:[#allocation13_spill]]  ;;  %p25_p5 = scmp.ge.s32.totalorder %s3581_s26, 4  }
 0x940   : > { %s5295_s15 = smov %s3424_s16  ;;  %s5296_s16 = smov %s3428_s17 }
 0x941   : > { %s5298_s18 = smov %s3581_s26  ;;  %27 = sbr.rel (!%p25_p5) target bundleno = 10 (0xa), region = 116 }
 0x945   : > { %s5297_s17 = smov %s5294_s24 }
 0x946   :  { %2770 = vsyncpa [#allocation4], 1 }
 0x947   :  { %2772 = vsyncpa [#allocation4 + $0x1], 1 }
 0x948   :  { %2773 = vsyncpa [#allocation7], 1 }
 0x949   :  { %2774 = vsyncpa [#allocation5], 1 }
 0x94a   :  { %2776 = vsyncpa [#allocation5 + $0x1], 1 }

</bundles_post_ra>
